<compile_context>
chip_gen: v7x
topology: tpu7x:2x2x1
jax: 0.10.0
libtpu: 0.0.40
codegen_flags: <defaults>
</compile_context>

<pallas_src>
import functools

import numpy as np
import jax
import jax.numpy as jnp
from jax import lax
from jax.experimental import pallas as pl
from jax.experimental.pallas import tpu as pltpu


def _round_up(x, m):
    return (x + m - 1) // m * m


def _gaussian_1d(window_size, sigma=1.5):
    xs = np.arange(window_size)
    g = np.exp(-((xs - window_size // 2) ** 2) / (2.0 * sigma ** 2))
    return (g / g.sum()).astype(np.float32)


def _conv_matrices(window_size, H, W, Ho_pad, Wo_pad):
    """Banded Gaussian matrices so that conv(x) = Gv @ x @ Gh (valid padding).

    Returns Gh: (W, Wo_pad) for the horizontal pass (x @ Gh) and
            Gv^T: (H, Ho_pad) for the vertical pass (applied after a minor-dim
            transpose as another plain 2D matmul).
    Padded rows/cols are zero and get masked out when summing the SSIM map.
    """
    g = _gaussian_1d(window_size)
    Ho = H - window_size + 1
    Wo = W - window_size + 1
    gh = np.zeros((W, Wo_pad), np.float32)
    gvt = np.zeros((H, Ho_pad), np.float32)
    for j in range(Wo):
        gh[j:j + window_size, j] = g
    for i in range(Ho):
        gvt[i:i + window_size, i] = g
    return gh, gvt


def _ssim_kernel(img1_ref, img2_ref, gh_ref, gvt_ref, o_ref, *,
                 tb, h, w, ho, wo, ho_pad, wo_pad, c1, c2):
    a = img1_ref[...]                        # (TB, H, W) float32
    b = img2_ref[...]
    gh = gh_ref[...]                         # (W, Wo_pad)
    gvt = gvt_ref[...]                       # (H, Ho_pad)

    # Stack the five conv operands -> one MXU pass per conv direction.
    planes = jnp.concatenate([a, b, a * a, b * b, a * b], axis=0)  # (5TB, H, W)
    x2 = planes.reshape(5 * tb * h, w)

    # Horizontal Gaussian conv (along W) as a single matmul on the MXU.
    t = jnp.dot(x2, gh, preferred_element_type=jnp.float32)        # (5TB*H, Wo_pad)
    t = t.reshape(5 * tb, h, wo_pad)

    # Vertical Gaussian conv (along H): minor-dim transpose, then one matmul.
    tt = jnp.swapaxes(t, 1, 2).reshape(5 * tb * wo_pad, h)         # (5TB*Wo_pad, H)
    y = jnp.dot(tt, gvt, preferred_element_type=jnp.float32)       # (5TB*Wo_pad, Ho_pad)
    y = y.reshape(5 * tb, wo_pad, ho_pad)    # conv planes in (Wo, Ho) orientation

    mu1 = y[0 * tb:1 * tb]
    mu2 = y[1 * tb:2 * tb]
    e11 = y[2 * tb:3 * tb]
    e22 = y[3 * tb:4 * tb]
    e12 = y[4 * tb:5 * tb]

    mu1_sq = mu1 * mu1
    mu2_sq = mu2 * mu2
    mu1_mu2 = mu1 * mu2
    sigma1_sq = e11 - mu1_sq
    sigma2_sq = e22 - mu2_sq
    sigma12 = e12 - mu1_mu2

    ssim_map = ((2.0 * mu1_mu2 + c1) * (2.0 * sigma12 + c2)
                / ((mu1_sq + mu2_sq + c1) * (sigma1_sq + sigma2_sq + c2)))

    # Zero-padded rows/cols of Gh/Gv give mu = sigma = 0 there (ssim == 1);
    # mask them out of the partial sum.
    r = lax.broadcasted_iota(jnp.int32, (wo_pad, ho_pad), 0)   # Wo axis
    c = lax.broadcasted_iota(jnp.int32, (wo_pad, ho_pad), 1)   # Ho axis
    valid = (r < wo) & (c < ho)
    partial = jnp.sum(jnp.where(valid[None, :, :], ssim_map, 0.0))

    # Lane-dense per-block partial sum; no carried state across grid steps, so
    # the grid axis can be "parallel" (v7x megacore).  Final mean in wrapper.
    o_ref[...] = jnp.broadcast_to(partial, o_ref.shape).astype(jnp.float32)


def _choose_tb(n, h, w, ho_pad, wo_pad, budget_bytes=20 * 1024 * 1024):
    """Largest divisor of n whose per-grid-step VMEM footprint fits the budget
    (conservative so it stays well inside v7x's 64 MiB VMEM)."""
    per_plane = 4 * (4 * h * w                 # 2 inputs x 2 pipeline buffers
                     + 5 * h * w               # stacked operand
                     + 10 * h * wo_pad         # horizontal conv result + transpose
                     + 16 * wo_pad * ho_pad)   # vertical conv result + SSIM temps
    fixed = 4 * 2 * (h * ho_pad + w * wo_pad)  # Gaussian matrices
    avail = max(budget_bytes - fixed, per_plane)
    cap = max(1, avail // per_plane)
    best = 1
    for d in range(1, n + 1):
        if n % d == 0 and d <= cap:
            best = d
    return int(best)


def ssim_pallas(img1, img2, window_size=11):
    """img1, img2: float32 NCHW.  Returns scalar SSIM (size_average=True)."""
    B, C, H, W = img1.shape
    assert img2.shape == img1.shape
    Ho = H - window_size + 1
    Wo = W - window_size + 1
    assert Ho > 0 and Wo > 0, "image smaller than the SSIM window"
    Ho_pad = _round_up(Ho, 8)      # lane axis after the minor-dim transpose
    Wo_pad = _round_up(Wo, 128)    # lane axis of the first matmul output
    N = B * C
    TB = _choose_tb(N, H, W, Ho_pad, Wo_pad)
    G = N // TB
    c1, c2 = 0.01 ** 2, 0.03 ** 2

    # TODO(synk): for very large planes (2K/4K) add spatial H-tiling with a
    # (window_size-1)-row halo instead of whole-plane blocks, so Gv/Gh and the
    # intermediates stay within the VMEM budget.

    x1 = img1.reshape(N, H, W).astype(jnp.float32)   # single cast site
    x2 = img2.reshape(N, H, W).astype(jnp.float32)
    gh_np, gvt_np = _conv_matrices(window_size, H, W, Ho_pad, Wo_pad)
    gh = jnp.asarray(gh_np)
    gvt = jnp.asarray(gvt_np)

    kernel = functools.partial(
        _ssim_kernel, tb=TB, h=H, w=W, ho=Ho, wo=Wo,
        ho_pad=Ho_pad, wo_pad=Wo_pad, c1=c1, c2=c2)

    out = pl.pallas_call(
        kernel,
        out_shape=jax.ShapeDtypeStruct((G, 8, 128), jnp.float32),
        grid_spec=pltpu.PrefetchScalarGridSpec(
            num_scalar_prefetch=0,
            grid=(G,),
            in_specs=[
                pl.BlockSpec((TB, H, W), lambda i: (i, 0, 0)),
                pl.BlockSpec((TB, H, W), lambda i: (i, 0, 0)),
                pl.BlockSpec((W, Wo_pad), lambda i: (0, 0)),
                pl.BlockSpec((H, Ho_pad), lambda i: (0, 0)),
            ],
            out_specs=pl.BlockSpec((1, 8, 128), lambda i: (i, 0, 0)),
        ),
        compiler_params=pltpu.CompilerParams(
            dimension_semantics=("parallel",),
            vmem_limit_bytes=48 * 1024 * 1024),
    )(x1, x2, gh, gvt)

    total = jnp.sum(out[:, 0, 0])
    return total / jnp.float32(N * Ho * Wo)


def ssim_reference(img1, img2, window_size=11):
    """Pure-JAX reference mirroring the PyTorch _ssim (direct 2D window)."""
    g = jnp.asarray(_gaussian_1d(window_size))
    w2d = jnp.outer(g, g)
    B, C, H, W = img1.shape
    Ho, Wo = H - window_size + 1, W - window_size + 1

    def conv(x):
        out = jnp.zeros((B, C, Ho, Wo), jnp.float32)
        for p in range(window_size):
            for q in range(window_size):
                out = out + w2d[p, q] * x[:, :, p:p + Ho, q:q + Wo]
        return out

    c1, c2 = 0.01 ** 2, 0.03 ** 2
    mu1, mu2 = conv(img1), conv(img2)
    mu1_sq, mu2_sq, mu1_mu2 = mu1 * mu1, mu2 * mu2, mu1 * mu2
    s1 = conv(img1 * img1) - mu1_sq
    s2 = conv(img2 * img2) - mu2_sq
    s12 = conv(img1 * img2) - mu1_mu2
    ssim_map = ((2 * mu1_mu2 + c1) * (2 * s12 + c2)
                / ((mu1_sq + mu2_sq + c1) * (s1 + s2 + c2)))
    return jnp.mean(ssim_map)


if __name__ == "__main__":
    key = jax.random.PRNGKey(0)
    k1, k2 = jax.random.split(key)
    img1 = jax.random.uniform(k1, (2, 4, 16, 16), dtype=jnp.float32)
    noise = jax.random.uniform(k2, (2, 4, 16, 16), dtype=jnp.float32)
    # Typical SSIM usage: compare an image against a mild distortion of itself.
    img2 = jnp.clip(img1 + 0.1 * (noise - 0.5), 0.0, 1.0)

    out = ssim_pallas(img1, img2)
    jax.block_until_ready(out)

    ref = ssim_reference(img1, img2)
    np.testing.assert_allclose(np.asarray(out), np.asarray(ref),
                               rtol=5e-3, atol=5e-4)
    print("KERNEL_OK")
</pallas_src>

<mosaic_0001>
module attributes {stable_mosaic.version = 11 : i64} {
  func.func @_ssim_kernel(%arg0: i32, %arg1: memref<8x16x16xf32, #tpu.memory_space<vmem>>, %arg2: memref<8x16x16xf32, #tpu.memory_space<vmem>>, %arg3: memref<16x128xf32, #tpu.memory_space<vmem>>, %arg4: memref<16x8xf32, #tpu.memory_space<vmem>>, %arg5: memref<1x8x128xf32, #tpu.memory_space<vmem>>) attributes {dimension_semantics = [#tpu.dimension_semantics<parallel>], iteration_bounds = array<i64: 1>, scalar_prefetch = 0 : i64, scratch_operands = 0 : i64, tpu.core_type = #tpu.core_type<tc>, window_params = [{transform_indices = @transform_0, window_bounds = array<i64: 8, 16, 16>}, {transform_indices = @transform_1, window_bounds = array<i64: 8, 16, 16>}, {pipeline_mode = #tpu.pipeline_mode<synchronous>, transform_indices = @transform_2, window_bounds = array<i64: 16, 128>}, {pipeline_mode = #tpu.pipeline_mode<synchronous>, transform_indices = @transform_3, window_bounds = array<i64: 16, 8>}, {transform_indices = @transform_4, window_bounds = array<i64: 1, 8, 128>}]} {
    %c0 = arith.constant 0 : index
    %c0_0 = arith.constant 0 : index
    %c0_1 = arith.constant 0 : index
    %0 = vector.load %arg1[%c0, %c0_0, %c0_1] : memref<8x16x16xf32, #tpu.memory_space<vmem>>, vector<8x16x16xf32>
    %c0_2 = arith.constant 0 : index
    %c0_3 = arith.constant 0 : index
    %c0_4 = arith.constant 0 : index
    %1 = vector.load %arg2[%c0_2, %c0_3, %c0_4] : memref<8x16x16xf32, #tpu.memory_space<vmem>>, vector<8x16x16xf32>
    %c0_5 = arith.constant 0 : index
    %c0_6 = arith.constant 0 : index
    %2 = vector.load %arg3[%c0_5, %c0_6] : memref<16x128xf32, #tpu.memory_space<vmem>>, vector<16x128xf32>
    %c0_7 = arith.constant 0 : index
    %c0_8 = arith.constant 0 : index
    %3 = vector.load %arg4[%c0_7, %c0_8] : memref<16x8xf32, #tpu.memory_space<vmem>>, vector<16x8xf32>
    %4 = arith.mulf %0, %0 : vector<8x16x16xf32>
    %5 = arith.mulf %1, %1 : vector<8x16x16xf32>
    %6 = arith.mulf %0, %1 : vector<8x16x16xf32>
    %7 = tpu.concatenate %0, %1, %4, %5, %6 in 0 : vector<8x16x16xf32>, vector<8x16x16xf32>, vector<8x16x16xf32>, vector<8x16x16xf32>, vector<8x16x16xf32> -> vector<40x16x16xf32>
    %8 = vector.shape_cast %7 : vector<40x16x16xf32> to vector<640x16xf32>
    %cst = arith.constant dense<0.000000e+00> : vector<640x128xf32>
    %9 = tpu.matmul %8, %2, %cst {dimension_numbers = #tpu.dot_dimension_numbers<[1], [0], [0], [1], [0, 0, 1, 1], [], []>} : vector<640x16xf32>, vector<16x128xf32>, vector<640x128xf32> -> vector<640x128xf32>
    %10 = vector.shape_cast %9 : vector<640x128xf32> to vector<40x16x128xf32>
    %11 = tpu.transpose %10, [0, 2, 1] : vector<40x16x128xf32> -> vector<40x128x16xf32>
    %12 = vector.shape_cast %11 : vector<40x128x16xf32> to vector<5120x16xf32>
    %cst_9 = arith.constant dense<0.000000e+00> : vector<5120x8xf32>
    %13 = tpu.matmul %12, %3, %cst_9 {dimension_numbers = #tpu.dot_dimension_numbers<[1], [0], [0], [1], [0, 0, 1, 1], [], []>} : vector<5120x16xf32>, vector<16x8xf32>, vector<5120x8xf32> -> vector<5120x8xf32>
    %14 = vector.shape_cast %13 : vector<5120x8xf32> to vector<40x128x8xf32>
    %15 = vector.extract_strided_slice %14 {offsets = [0, 0, 0], sizes = [8, 128, 8], strides = [1, 1, 1]} : vector<40x128x8xf32> to vector<8x128x8xf32>
    %16 = vector.extract_strided_slice %14 {offsets = [8, 0, 0], sizes = [8, 128, 8], strides = [1, 1, 1]} : vector<40x128x8xf32> to vector<8x128x8xf32>
    %17 = vector.extract_strided_slice %14 {offsets = [16, 0, 0], sizes = [8, 128, 8], strides = [1, 1, 1]} : vector<40x128x8xf32> to vector<8x128x8xf32>
    %18 = vector.extract_strided_slice %14 {offsets = [24, 0, 0], sizes = [8, 128, 8], strides = [1, 1, 1]} : vector<40x128x8xf32> to vector<8x128x8xf32>
    %19 = vector.extract_strided_slice %14 {offsets = [32, 0, 0], sizes = [8, 128, 8], strides = [1, 1, 1]} : vector<40x128x8xf32> to vector<8x128x8xf32>
    %20 = arith.mulf %15, %15 : vector<8x128x8xf32>
    %21 = arith.mulf %16, %16 : vector<8x128x8xf32>
    %22 = arith.mulf %15, %16 : vector<8x128x8xf32>
    %23 = arith.subf %17, %20 : vector<8x128x8xf32>
    %24 = arith.subf %18, %21 : vector<8x128x8xf32>
    %25 = arith.subf %19, %22 : vector<8x128x8xf32>
    %cst_10 = arith.constant 2.000000e+00 : f32
    %26 = vector.broadcast %cst_10 : f32 to vector<8x128x8xf32>
    %27 = arith.mulf %26, %22 : vector<8x128x8xf32>
    %cst_11 = arith.constant 9.99999974E-5 : f32
    %28 = vector.broadcast %cst_11 : f32 to vector<8x128x8xf32>
    %29 = arith.addf %27, %28 : vector<8x128x8xf32>
    %cst_12 = arith.constant 2.000000e+00 : f32
    %30 = vector.broadcast %cst_12 : f32 to vector<8x128x8xf32>
    %31 = arith.mulf %30, %25 : vector<8x128x8xf32>
    %cst_13 = arith.constant 8.99999984E-4 : f32
    %32 = vector.broadcast %cst_13 : f32 to vector<8x128x8xf32>
    %33 = arith.addf %31, %32 : vector<8x128x8xf32>
    %34 = arith.mulf %29, %33 : vector<8x128x8xf32>
    %35 = arith.addf %20, %21 : vector<8x128x8xf32>
    %cst_14 = arith.constant 9.99999974E-5 : f32
    %36 = vector.broadcast %cst_14 : f32 to vector<8x128x8xf32>
    %37 = arith.addf %35, %36 : vector<8x128x8xf32>
    %38 = arith.addf %23, %24 : vector<8x128x8xf32>
    %cst_15 = arith.constant 8.99999984E-4 : f32
    %39 = vector.broadcast %cst_15 : f32 to vector<8x128x8xf32>
    %40 = arith.addf %38, %39 : vector<8x128x8xf32>
    %41 = arith.mulf %37, %40 : vector<8x128x8xf32>
    %42 = arith.divf %34, %41 : vector<8x128x8xf32>
    %43 = tpu.iota {dimensions = array<i32: 0>} : vector<128x8xi32>
    %44 = tpu.iota {dimensions = array<i32: 1>} : vector<128x8xi32>
    %c6_i32 = arith.constant 6 : i32
    %45 = vector.broadcast %c6_i32 : i32 to vector<128x8xi32>
    %46 = arith.cmpi slt, %43, %45 : vector<128x8xi32>
    %c6_i32_16 = arith.constant 6 : i32
    %47 = vector.broadcast %c6_i32_16 : i32 to vector<128x8xi32>
    %48 = arith.cmpi slt, %44, %47 : vector<128x8xi32>
    %49 = arith.andi %46, %48 : vector<128x8xi1>
    %50 = vector.shape_cast %49 : vector<128x8xi1> to vector<1x128x8xi1>
    %cst_17 = arith.constant 0.000000e+00 : f32
    %51 = vector.shape_cast %50 : vector<1x128x8xi1> to vector<1x128x8xi1>
    %52 = vector.broadcast %51 : vector<1x128x8xi1> to vector<8x128x8xi1>
    %53 = vector.broadcast %cst_17 : f32 to vector<8x128x8xf32>
    %54 = arith.select %52, %42, %53 : vector<8x128x8xi1>, vector<8x128x8xf32>
    %55 = vector.shape_cast %54 : vector<8x128x8xf32> to vector<1x8x128x8xf32>
    %cst_18 = arith.constant dense<0.000000e+00> : vector<1xf32>
    %56 = vector.multi_reduction <add>, %55, %cst_18 [1, 2, 3] : vector<1x8x128x8xf32> to vector<1xf32>
    %57 = vector.shape_cast %56 : vector<1xf32> to vector<1x1x1x1xf32>
    %58 = vector.extract %57[0, 0, 0, 0] : f32 from vector<1x1x1x1xf32>
    %59 = vector.broadcast %58 : f32 to vector<1x8x128xf32>
    %c0_19 = arith.constant 0 : index
    %c0_20 = arith.constant 0 : index
    %c0_21 = arith.constant 0 : index
    %60 = vector.load %arg5[%c0_19, %c0_20, %c0_21] : memref<1x8x128xf32, #tpu.memory_space<vmem>>, vector<1x8x128xf32>
    tpu.vector_store %arg5[%c0_19, %c0_20, %c0_21], %59 {strides = array<i32>} : memref<1x8x128xf32, #tpu.memory_space<vmem>>, vector<1x8x128xf32>,
    return
  }
  func.func @transform_0(%arg0: i32) -> (i32, i32, i32) {
    %c0_i32 = arith.constant 0 : i32
    %c0_i32_0 = arith.constant 0 : i32
    %c0_i32_1 = arith.constant 0 : i32
    return %arg0, %c0_i32, %c0_i32_0 : i32, i32, i32
  }
  func.func @transform_1(%arg0: i32) -> (i32, i32, i32) {
    %c0_i32 = arith.constant 0 : i32
    %c0_i32_0 = arith.constant 0 : i32
    %c0_i32_1 = arith.constant 0 : i32
    return %arg0, %c0_i32, %c0_i32_0 : i32, i32, i32
  }
  func.func @transform_2(%arg0: i32) -> (i32, i32) {
    %c0_i32 = arith.constant 0 : i32
    %c0_i32_0 = arith.constant 0 : i32
    %c0_i32_1 = arith.constant 0 : i32
    return %c0_i32, %c0_i32_0 : i32, i32
  }
  func.func @transform_3(%arg0: i32) -> (i32, i32) {
    %c0_i32 = arith.constant 0 : i32
    %c0_i32_0 = arith.constant 0 : i32
    %c0_i32_1 = arith.constant 0 : i32
    return %c0_i32, %c0_i32_0 : i32, i32
  }
  func.func @transform_4(%arg0: i32) -> (i32, i32, i32) {
    %c0_i32 = arith.constant 0 : i32
    %c0_i32_0 = arith.constant 0 : i32
    %c0_i32_1 = arith.constant 0 : i32
    return %arg0, %c0_i32, %c0_i32_0 : i32, i32, i32
  }
}

</mosaic_0001>

<bundles_post_ra>
// kernel: tpu_custom_call.1
= control target key start
LH: loop header
LB: loop body
LE: loop exit
PB: predicated region body
PF: predicated region fallthrough
CT: control target
= control target key end

     0   :  { %9 = vsyncpa [#allocation3], 0  ;;  %s14423_s0 = inlined_call_operand.hbm [shape: f32[8,16,16], index: 0, kind: input, shape index: {}]   ;;  %s14424_s1 = inlined_call_operand.hbm [shape: f32[8,16,16], index: 1, kind: input, shape index: {}]   ;;  %s14425_s2 = inlined_call_operand.vmem [shape: f32[16,128], index: 2, kind: input, shape index: {}]   ;;  %s14426_s3 = inlined_call_operand.vmem [shape: f32[16,8], index: 3, kind: input, shape index: {}]   ;;  %s14427_s4 = inlined_call_operand.hbm [shape: f32[1,8,128], index: 4, kind: output, shape index: {}]  }
   0x1   :  { %10 = vsyncpa [#allocation6], 0 }
   0x2   :  { %11 = vsyncpa [#allocation4], 0  ;;  %s12738_s15 = smov [#allocation2]   ;;  %s12666_s19 = scalar_lea.hbm %s14423_s0, 2048 }
   0x3   :  { %s17_s16 = sshll.u32 %s12738_s15, 4  ;;  %p12667_p0 = scmp.ne.s32.totalorder %s14423_s0, %s12666_s19  ;;  %s18_s16 = int_to_ptr.vmem [resolvable:$true] %s17_s16 }
   0x4   :  { %p12670_p1 = scmp.lt.u32.totalorder %s12666_s19, %s14423_s0 }
   0x6   :  { %p12672_p2 = pnand %p12670_p1, %p12667_p0 }
   0x8   :  { %12675 = shalt.err (!%p12672_p2)
}
   0x9   :  { %s12676_s24 = scalar_lea.vmem %s18_s16, 2048  ;;  %p12681_p4 = scmp.lt.s32.totalorder %s18_s16, %s18_s16 }
   0xa   :  { %p12677_p3 = scmp.ne.s32.totalorder %s18_s16, %s12676_s24  ;;  %p12682_p5 = scmp.lt.s32.totalorder %s12676_s24, %s12676_s24 }
   0xc   :  { %p12683_p6 = por %p12682_p5, %p12681_p4 }
   0xe   :  { %p12684_p7 = pnand %p12683_p6, %p12677_p3 }
  0x10   :  { %12687 = shalt.err (!%p12684_p7)
}
  0x11   :  { %s12739_s25 = smov 128   ;;  %s12740_s26 = smov 8  }
  0x12   :  { %23 = dma.hbm_to_vmem [thread:$0]  %s14423_s0, 2048, %s18_s16, [#allocation3], %s12739_s25, %s12739_s25, %s12740_s26  }
  0x13   :  { %s12741_s29 = smov [#allocation5]   ;;  %s12688_s7 = scalar_lea.hbm %s14424_s1, 2048 }
  0x14   :  { %s29_s30 = sshll.u32 %s12741_s29, 4  ;;  %p12689_p8 = scmp.ne.s32.totalorder %s14424_s1, %s12688_s7  ;;  %s30_s30 = int_to_ptr.vmem [resolvable:$true] %s29_s30 }
  0x15   :  { %p12692_p9 = scmp.lt.u32.totalorder %s12688_s7, %s14424_s1 }
  0x17   :  { %p12694_p10 = pnand %p12692_p9, %p12689_p8 }
  0x19   :  { %12697 = shalt.err (!%p12694_p10)
}
  0x1a   :  { %s12698_s12 = scalar_lea.vmem %s30_s30, 2048  ;;  %p12703_p12 = scmp.lt.s32.totalorder %s30_s30, %s30_s30 }
  0x1b   :  { %p12699_p11 = scmp.ne.s32.totalorder %s30_s30, %s12698_s12  ;;  %p12704_p13 = scmp.lt.s32.totalorder %s12698_s12, %s12698_s12 }
  0x1d   :  { %p12705_p0 = por %p12704_p13, %p12703_p12 }
  0x1f   :  { %p12706_p1 = pnand %p12705_p0, %p12699_p11 }
  0x21   :  { %12709 = shalt.err (!%p12706_p1)
}
  0x22   :  { %35 = dma.hbm_to_vmem [thread:$0]  %s14424_s1, 2048, %s30_s30, [#allocation6], %s12739_s25, %s12739_s25, %s12740_s26  }
  0x23   :  { %12732 = dma.done.wait [#allocation3], 2048  }
  0x24   :  { %12733 = vsyncadd [#allocation3], 4294965248 }
  0x25   :  { %12734 = dma.done.wait [#allocation6], 2048  }
  0x26   :  { %12735 = vsyncadd [#allocation6], 4294965248  ;;  %vm130_vm0 = vcmask 130048   ;;  %v78_v0 = vld [vmem:[%s14425_s2] sm:$0xff]  ;;  %v79_v1 = vld [vmem:[%s14425_s2 + $0x8] sm:$0xff]  ;;  %vm9817_vm4 = vcmask 64512  }
  0x27   :  { %v12798_v2 = vld [vmem:[#allocation2] sm:$0xff]  ;;  %v12632_v3 = vpack.c.bf16 %v79_v1, %v78_v0  ;;  %v12802_v4 = vld [vmem:[#allocation2 + $0x8] sm:$0xff]  ;;  %v12804_v5 = vld [vmem:[#allocation2 + $0x10] sm:$0xff] }
  0x28   :  { %11548 = vmatprep.mubr.msk.f32.mxu0 %vm130_vm0, %v12798_v2  ;;  %v12806_v6 = vld [vmem:[#allocation2 + $0x18] sm:$0xff]  ;;  %v12808_v7 = vld [vmem:[#allocation2 + $0x20] sm:$0xff]  ;;  %v12810_v8 = vld [vmem:[#allocation2 + $0x28] sm:$0xff]  ;;  %v82_v51 = vmul.f32 %v12798_v2, %v12798_v2  ;;  %v83_v52 = vmul.f32 %v12802_v4, %v12802_v4  ;;  %v84_v53 = vmul.f32 %v12804_v5, %v12804_v5 }
  0x29   :  { %12633 = vmatprep.subr.bf16.mxu0 %v12632_v3  ;;  %v12812_v9 = vld [vmem:[#allocation5] sm:$0xff]  ;;  %v12814_v10 = vld [vmem:[#allocation5 + $0x8] sm:$0xff]  ;;  %v12818_v11 = vld [vmem:[#allocation2 + $0x30] sm:$0xff]  ;;  %v85_v54 = vmul.f32 %v12806_v6, %v12806_v6  ;;  %v86_v55 = vmul.f32 %v12808_v7, %v12808_v7  ;;  %v87_v56 = vmul.f32 %v12810_v8, %v12810_v8 }
  0x2a   :  { %12635 = vmatpush3.bf16.msra.mxu0 %v12632_v3  ;;  %v12820_v12 = vld [vmem:[#allocation2 + $0x38] sm:$0xff]  ;;  %v12824_v13 = vmul.f32 %v12812_v9, %v12798_v2  ;;  %v12828_v14 = vmul.f32 %v12814_v10, %v12802_v4  ;;  %v12830_v15 = vld [vmem:[#allocation5 + $0x10] sm:$0xff]  ;;  %v12836_v17 = vld [vmem:[#allocation2 + $0x40] sm:$0xff]  ;;  %v88_v57 = vmul.f32 %v12818_v11, %v12818_v11  ;;  %v98_v3 = vmul.f32 %v12812_v9, %v12812_v9 }
  0x2b   :  { %v12832_v16 = vld [vmem:[#allocation5 + $0x18] sm:$0xff]  ;;  %v12838_v18 = vld [vmem:[#allocation2 + $0x48] sm:$0xff]  ;;  %v12842_v19 = vmul.f32 %v12830_v15, %v12804_v5  ;;  %v12848_v21 = vld [vmem:[#allocation5 + $0x20] sm:$0xff]  ;;  %v89_v58 = vmul.f32 %v12820_v12, %v12820_v12  ;;  %v90_v59 = vmul.f32 %v12836_v17, %v12836_v17 }
  0x2c   :  { %v12846_v20 = vmul.f32 %v12832_v16, %v12806_v6  ;;  %v12850_v22 = vld [vmem:[#allocation5 + $0x28] sm:$0xff]  ;;  %v12852_v23 = vld [vmem:[#allocation2 + $0x50] sm:$0xff]  ;;  %v12854_v24 = vld [vmem:[#allocation2 + $0x58] sm:$0xff]  ;;  %v12858_v25 = vmul.f32 %v12848_v21, %v12808_v7  ;;  %v91_v60 = vmul.f32 %v12838_v18, %v12838_v18 }
  0x2d   :  { %11549 = vmatmul.mubr.msk.f32.vlgmr.msra.gmra.mrb[0].mxu0 %vm130_vm0, %v12802_v4  ;;  %v12862_v26 = vmul.f32 %v12850_v22, %v12810_v8  ;;  %v12864_v27 = vld [vmem:[#allocation5 + $0x30] sm:$0xff]  ;;  %v12866_v28 = vld [vmem:[#allocation5 + $0x38] sm:$0xff]  ;;  %v12868_v29 = vld [vmem:[#allocation2 + $0x60] sm:$0xff]  ;;  %v92_v61 = vmul.f32 %v12852_v23, %v12852_v23  ;;  %v93_v62 = vmul.f32 %v12854_v24, %v12854_v24  ;;  %v99_v4 = vmul.f32 %v12814_v10, %v12814_v10 }
  0x2e   :  { %11551 = vmatprep.mubr.msk.f32.mxu0 %vm130_vm0, %v12804_v5  ;;  %v12872_v30 = vmul.f32 %v12864_v27, %v12818_v11  ;;  %v12876_v31 = vmul.f32 %v12866_v28, %v12820_v12  ;;  %v12878_v32 = vld [vmem:[#allocation5 + $0x40] sm:$0xff]  ;;  %v12880_v33 = vld [vmem:[#allocation5 + $0x48] sm:$0xff]  ;;  %v12894_v37 = vld [vmem:[#allocation5 + $0x50] sm:$0xff]  ;;  %v94_v63 = vmul.f32 %v12868_v29, %v12868_v29  ;;  %v100_v5 = vmul.f32 %v12830_v15, %v12830_v15 }
  0x2f   :  { %v12884_v34 = vld [vmem:[#allocation2 + $0x68] sm:$0xff]  ;;  %v12888_v35 = vmul.f32 %v12878_v32, %v12836_v17  ;;  %v12892_v36 = vmul.f32 %v12880_v33, %v12838_v18  ;;  %v12896_v38 = vld [vmem:[#allocation5 + $0x58] sm:$0xff]  ;;  %v12900_v39 = vld [vmem:[#allocation2 + $0x70] sm:$0xff]  ;;  %v12904_v40 = vmul.f32 %v12894_v37, %v12852_v23 }
  0x30   :  { %v12908_v41 = vmul.f32 %v12896_v38, %v12854_v24  ;;  %v12910_v42 = vld [vmem:[#allocation5 + $0x60] sm:$0xff]  ;;  %v12912_v43 = vld [vmem:[#allocation5 + $0x68] sm:$0xff]  ;;  %v61_v44 = vld [vmem:[#allocation2 + $0x78] sm:$0xff]  ;;  %v95_v0 = vmul.f32 %v12884_v34, %v12884_v34  ;;  %v96_v1 = vmul.f32 %v12900_v39, %v12900_v39 }
  0x31   :  { %11552 = vmatmul.mubr.msk.f32.gmra.mrb[2].mxu0 %vm130_vm0, %v12806_v6  ;;  %v12916_v45 = vmul.f32 %v12910_v42, %v12868_v29  ;;  %v12920_v46 = vmul.f32 %v12912_v43, %v12884_v34  ;;  %v12922_v47 = vld [vmem:[#allocation5 + $0x70] sm:$0xff]  ;;  %v12924_v48 = vld [vmem:[#allocation5 + $0x78] sm:$0xff]  ;;  %v97_v2 = vmul.f32 %v61_v44, %v61_v44  ;;  %v101_v6 = vmul.f32 %v12832_v16, %v12832_v16 }
  0x32   :  { %11554 = vmatprep.mubr.msk.f32.mxu0 %vm130_vm0, %v12808_v7  ;;  %v12928_v49 = vmul.f32 %v12922_v47, %v12900_v39  ;;  %v12931_v50 = vmul.f32 %v12924_v48, %v61_v44  ;;  %v102_v7 = vmul.f32 %v12848_v21, %v12848_v21 }
  0x35   :  { %11555 = vmatmul.mubr.msk.f32.gmra.mrb[4].mxu0 %vm130_vm0, %v12810_v8  ;;  %v103_v8 = vmul.f32 %v12850_v22, %v12850_v22 }
  0x36   :  { %11557 = vmatprep.mubr.msk.f32.mxu0 %vm130_vm0, %v12818_v11  ;;  %v106_v11 = vmul.f32 %v12878_v32, %v12878_v32 }
  0x39   :  { %11558 = vmatmul.mubr.msk.f32.gmra.mrb[6].mxu0 %vm130_vm0, %v12820_v12  ;;  %v107_v12 = vmul.f32 %v12880_v33, %v12880_v33 }
  0x3a   :  { %11560 = vmatprep.mubr.msk.f32.mxu0 %vm130_vm0, %v12836_v17  ;;  %v110_v17 = vmul.f32 %v12910_v42, %v12910_v42 }
  0x3d   :  { %11561 = vmatmul.mubr.msk.f32.gmra.mrb[8].mxu0 %vm130_vm0, %v12838_v18  ;;  %v111_v18 = vmul.f32 %v12912_v43, %v12912_v43 }
  0x3e   :  { %11563 = vmatprep.mubr.msk.f32.mxu0 %vm130_vm0, %v12852_v23 }
  0x41   :  { %11564 = vmatmul.mubr.msk.f32.gmra.mrb[10].mxu0 %vm130_vm0, %v12854_v24 }
  0x42   :  { %11566 = vmatprep.mubr.msk.f32.mxu0 %vm130_vm0, %v12868_v29 }
  0x45   :  { %11567 = vmatmul.mubr.msk.f32.gmra.mrb[12].mxu0 %vm130_vm0, %v12884_v34 }
  0x46   :  { %11569 = vmatprep.mubr.msk.f32.mxu0 %vm130_vm0, %v12900_v39 }
  0x49   :  { %11570 = vmatmul.mubr.msk.f32.gmra.mrb[14].mxu0 %vm130_vm0, %v61_v44 }
  0x4a   :  { %11572 = vmatprep.mubr.msk.f32.mxu0 %vm130_vm0, %v12812_v9  ;;  %v104_v9 = vmul.f32 %v12864_v27, %v12864_v27 }
  0x4d   :  { %11573 = vmatmul.mubr.msk.f32.gmra.mrb[16].mxu0 %vm130_vm0, %v12814_v10  ;;  %v105_v10 = vmul.f32 %v12866_v28, %v12866_v28 }
  0x4e   :  { %11575 = vmatprep.mubr.msk.f32.mxu0 %vm130_vm0, %v12830_v15  ;;  %v108_v15 = vmul.f32 %v12894_v37, %v12894_v37 }
  0x51   :  { %11576 = vmatmul.mubr.msk.f32.gmra.mrb[18].mxu0 %vm130_vm0, %v12832_v16  ;;  %v109_v16 = vmul.f32 %v12896_v38, %v12896_v38 }
  0x52   :  { %11578 = vmatprep.mubr.msk.f32.mxu0 %vm130_vm0, %v12848_v21  ;;  %v112_v21 = vmul.f32 %v12922_v47, %v12922_v47 }
  0x55   :  { %11579 = vmatmul.mubr.msk.f32.gmra.mrb[20].mxu0 %vm130_vm0, %v12850_v22  ;;  %v113_v22 = vmul.f32 %v12924_v48, %v12924_v48 }
  0x56   :  { %11581 = vmatprep.mubr.msk.f32.mxu0 %vm130_vm0, %v12864_v27 }
  0x59   :  { %11582 = vmatmul.mubr.msk.f32.gmra.mrb[22].mxu0 %vm130_vm0, %v12866_v28 }
  0x5a   :  { %11584 = vmatprep.mubr.msk.f32.mxu0 %vm130_vm0, %v12878_v32 }
  0x5d   :  { %11585 = vmatmul.mubr.msk.f32.gmra.mrb[24].mxu0 %vm130_vm0, %v12880_v33 }
  0x5e   :  { %11587 = vmatprep.mubr.msk.f32.mxu0 %vm130_vm0, %v12894_v37 }
  0x61   :  { %11588 = vmatmul.mubr.msk.f32.gmra.mrb[26].mxu0 %vm130_vm0, %v12896_v38 }
  0x62   :  { %11590 = vmatprep.mubr.msk.f32.mxu0 %vm130_vm0, %v12910_v42 }
  0x65   :  { %11591 = vmatmul.mubr.msk.f32.gmra.mrb[28].mxu0 %vm130_vm0, %v12912_v43 }
  0x66   :  { %11593 = vmatprep.mubr.msk.f32.mxu0 %vm130_vm0, %v12922_v47 }
  0x69   :  { %11594 = vmatmul.mubr.msk.f32.gmra.mrb[30].mxu0 %vm130_vm0, %v12924_v48 }
  0x6a   :  { %11596 = vmatprep.mubr.msk.f32.mxu0 %vm130_vm0, %v82_v51 }
  0x6d   :  { %11597 = vmatmul.mubr.msk.f32.gmra.mrb[32].mxu0 %vm130_vm0, %v83_v52 }
  0x6e   :  { %11599 = vmatprep.mubr.msk.f32.mxu0 %vm130_vm0, %v84_v53 }
  0x71   :  { %11600 = vmatmul.mubr.msk.f32.gmra.mrb[34].mxu0 %vm130_vm0, %v85_v54 }
  0x72   :  { %11602 = vmatprep.mubr.msk.f32.mxu0 %vm130_vm0, %v86_v55 }
  0x75   :  { %11603 = vmatmul.mubr.msk.f32.gmra.mrb[36].mxu0 %vm130_vm0, %v87_v56 }
  0x76   :  { %11605 = vmatprep.mubr.msk.f32.mxu0 %vm130_vm0, %v88_v57 }
  0x79   :  { %11606 = vmatmul.mubr.msk.f32.gmra.mrb[38].mxu0 %vm130_vm0, %v89_v58 }
  0x7a   :  { %11608 = vmatprep.mubr.msk.f32.mxu0 %vm130_vm0, %v90_v59 }
  0x7d   :  { %11609 = vmatmul.mubr.msk.f32.gmra.mrb[40].mxu0 %vm130_vm0, %v91_v60 }
  0x7e   :  { %11611 = vmatprep.mubr.msk.f32.mxu0 %vm130_vm0, %v92_v61 }
  0x81   :  { %11612 = vmatmul.mubr.msk.f32.gmra.mrb[42].mxu0 %vm130_vm0, %v93_v62 }
  0x82   :  { %11614 = vmatprep.mubr.msk.f32.mxu0 %vm130_vm0, %v94_v63 }
  0x85   :  { %11615 = vmatmul.mubr.msk.f32.gmra.mrb[44].mxu0 %vm130_vm0, %v95_v0 }
  0x86   :  { %11617 = vmatprep.mubr.msk.f32.mxu0 %vm130_vm0, %v96_v1 }
  0x89   :  { %11618 = vmatmul.mubr.msk.f32.gmra.mrb[46].mxu0 %vm130_vm0, %v97_v2 }
  0x8a   :  { %11620 = vmatprep.mubr.msk.f32.mxu0 %vm130_vm0, %v98_v3 }
  0x8d   :  { %11621 = vmatmul.mubr.msk.f32.gmra.mrb[48].mxu0 %vm130_vm0, %v99_v4 }
  0x8e   :  { %11623 = vmatprep.mubr.msk.f32.mxu0 %vm130_vm0, %v100_v5 }
  0x91   :  { %11624 = vmatmul.mubr.msk.f32.gmra.mrb[50].mxu0 %vm130_vm0, %v101_v6 }
  0x92   :  { %11626 = vmatprep.mubr.msk.f32.mxu0 %vm130_vm0, %v102_v7 }
  0x95   :  { %11627 = vmatmul.mubr.msk.f32.gmra.mrb[52].mxu0 %vm130_vm0, %v103_v8 }
  0x96   :  { %11629 = vmatprep.mubr.msk.f32.mxu0 %vm130_vm0, %v104_v9 }
  0x99   :  { %11630 = vmatmul.mubr.msk.f32.gmra.mrb[54].mxu0 %vm130_vm0, %v105_v10 }
  0x9a   :  { %11632 = vmatprep.mubr.msk.f32.mxu0 %vm130_vm0, %v106_v11 }
  0x9d   :  { %11633 = vmatmul.mubr.msk.f32.gmra.mrb[56].mxu0 %vm130_vm0, %v107_v12 }
  0x9e   :  { %11635 = vmatprep.mubr.msk.f32.mxu0 %vm130_vm0, %v108_v15 }
  0xa1   :  { %11636 = vmatmul.mubr.msk.f32.gmra.mrb[58].mxu0 %vm130_vm0, %v109_v16 }
  0xa2   :  { %11638 = vmatprep.mubr.msk.f32.mxu0 %vm130_vm0, %v110_v17 }
  0xa5   :  { %11639 = vmatmul.mubr.msk.f32.gmra.mrb[60].mxu0 %vm130_vm0, %v111_v18 }
  0xa6   :  { %11641 = vmatprep.mubr.msk.f32.mxu0 %vm130_vm0, %v112_v21 }
  0xa9   :  { %11642 = vmatmul.mubr.msk.f32.gmra.mrb[62].mxu0 %vm130_vm0, %v113_v22 }
  0xaa   :  { %11644 = vmatprep.mubr.msk.f32.mxu0 %vm130_vm0, %v12824_v13 }
  0xad   :  { %11645 = vmatmul.mubr.msk.f32.gmra.mrb[64].mxu0 %vm130_vm0, %v12828_v14  ;;  %v80_v14 = vld [vmem:[%s14426_s3] sm:$0xff] }
  0xae   :  { %11647 = vmatprep.mubr.msk.f32.mxu0 %vm130_vm0, %v12842_v19  ;;  %v81_v19 = vld [vmem:[%s14426_s3 + $0x8] sm:$0xff]  ;;  %s12742_s3 = smov [#allocation7]  }
  0xaf   :  { %v12636_v23 = vpack.c.bf16 %v81_v19, %v80_v14  ;;  %s10090_s20 = sshll.u32 %s12742_s3, 4  ;;  %s10091_s20 = int_to_ptr.vmem [resolvable:$true] %s10090_s20 }
  0xb0   :  { %s12710_s22 = scalar_lea.vmem %s10091_s20, 128  ;;  %p12715_p3 = scmp.lt.s32.totalorder %s10091_s20, %s10091_s20 }
  0xb1   :  { %11648 = vmatmul.mubr.msk.f32.gmra.mrb[66].mxu0 %vm130_vm0, %v12846_v20  ;;  %12637 = vmatprep.subr.bf16.mxu0 %v12636_v23  ;;  %p12711_p2 = scmp.ne.s32.totalorder %s10091_s20, %s12710_s22  ;;  %p12716_p4 = scmp.lt.s32.totalorder %s12710_s22, %s12710_s22 }
  0xb2   :  { %11650 = vmatprep.mubr.msk.f32.mxu0 %vm130_vm0, %v12858_v25  ;;  %12640 = vmatprep.subr.bf16.mxu1 %v12636_v23 }
  0xb3   :  { %12639 = vmatpush3.bf16.msra.mxu0 %v12636_v23  ;;  %12641 = vmatpush3.bf16.msra.mxu1 %v12636_v23  ;;  %p12717_p5 = por %p12716_p4, %p12715_p3 }
  0xb5   :  { %11651 = vmatmul.mubr.msk.f32.gmra.mrb[68].mxu0 %vm130_vm0, %v12862_v26  ;;  %p12718_p6 = pnand %p12717_p5, %p12711_p2 }
  0xb6   :  { %11653 = vmatprep.mubr.msk.f32.mxu0 %vm130_vm0, %v12872_v30 }
  0xb9   :  { %11654 = vmatmul.mubr.msk.f32.gmra.mrb[70].mxu0 %vm130_vm0, %v12876_v31 }
  0xba   :  { %11656 = vmatprep.mubr.msk.f32.mxu0 %vm130_vm0, %v12888_v35 }
  0xbd   :  { %11657 = vmatmul.mubr.msk.f32.gmra.mrb[72].mxu0 %vm130_vm0, %v12892_v36 }
  0xbe   :  { %11659 = vmatprep.mubr.msk.f32.mxu0 %vm130_vm0, %v12904_v40 }
  0xc1   :  { %11660 = vmatmul.mubr.msk.f32.gmra.mrb[74].mxu0 %vm130_vm0, %v12908_v41 }
  0xc2   :  { %11662 = vmatprep.mubr.msk.f32.mxu0 %vm130_vm0, %v12916_v45 }
  0xc5   :  { %11663 = vmatmul.mubr.msk.f32.gmra.mrb[76].mxu0 %vm130_vm0, %v12920_v46 }
  0xc6   :  { %11665 = vmatprep.mubr.msk.f32.mxu0 %vm130_vm0, %v12928_v49 }
  0xc9   :  { %11666 = vmatmul.mubr.msk.f32.gmra.mrb[78].mxu0 %vm130_vm0, %v12931_v50 }
 0x100   :  { %v11550_v13 = vpop.f32.mrb[0].mxu0 }
 0x101   :  { %v437_v20 = vpop.f32.mrb[1].mxu0 }
 0x102   :  { %836 = vxpose.xlu0.b32.start [1/2] (short) %v437_v20, 128 }
 0x104   :  { %v11553_v24 = vpop.f32.mrb[2].mxu0 }
 0x105   :  { %v447_v25 = vpop.f32.mrb[3].mxu0 }
 0x106   :  { %837 = vxpose.xlu0.b32.end [2/2] (short) %v11550_v13, 128  ;;  %868 = vxpose.xlu1.b32.start [1/2] (short) %v447_v25, 128 }
 0x108   :  { %v11556_v26 = vpop.f32.mrb[4].mxu0 }
 0x109   :  { %v457_v27 = vpop.f32.mrb[5].mxu0 }
 0x10a   :  { %869 = vxpose.xlu1.b32.end [2/2] (short) %v11553_v24, 128 }
 0x10c   :  { %v11559_v28 = vpop.f32.mrb[6].mxu0 }
 0x10d   :  { %v467_v29 = vpop.f32.mrb[7].mxu0 }
 0x110   :  { %v11562_v30 = vpop.f32.mrb[8].mxu0 }
 0x111   :  { %v477_v31 = vpop.f32.mrb[9].mxu0 }
 0x114   :  { %v11565_v32 = vpop.f32.mrb[10].mxu0 }
 0x115   :  { %v487_v33 = vpop.f32.mrb[11].mxu0 }
 0x118   :  { %v13118_v34 = vpop.f32.mrb[12].mxu0 }
 0x119   :  { %v13120_v35 = vpop.f32.mrb[13].mxu0 }
 0x11c   :  { %v13122_v36 = vpop.f32.mrb[14].mxu0 }
 0x11d   :  { %v13124_v37 = vpop.f32.mrb[15].mxu0 }
 0x120   :  { %v13126_v38 = vpop.f32.mrb[16].mxu0 }
 0x121   :  { %v13128_v39 = vpop.f32.mrb[17].mxu0 }
 0x124   :  { %v13130_v40 = vpop.f32.mrb[18].mxu0 }
 0x125   :  { %v13132_v41 = vpop.f32.mrb[19].mxu0 }
 0x128   :  { %v13134_v42 = vpop.f32.mrb[20].mxu0 }
 0x129   :  { %v13136_v43 = vpop.f32.mrb[21].mxu0 }
 0x12c   :  { %v13138_v44 = vpop.f32.mrb[22].mxu0 }
 0x12d   :  { %v13140_v45 = vpop.f32.mrb[23].mxu0 }
 0x130   :  { %v13142_v46 = vpop.f32.mrb[24].mxu0 }
 0x131   :  { %14428 = vst [vmem:[#allocation11_spill] sm:$0xff] %v13142_v46  ;;  %v13144_v47 = vpop.f32.mrb[25].mxu0 }
 0x132   :  { %14429 = vst [vmem:[#allocation12_spill] sm:$0xff] %v13144_v47 }
 0x134   :  { %v13146_v48 = vpop.f32.mrb[26].mxu0 }
 0x135   :  { %14430 = vst [vmem:[#allocation13_spill] sm:$0xff] %v13146_v48  ;;  %v13148_v49 = vpop.f32.mrb[27].mxu0 }
 0x136   :  { %14431 = vst [vmem:[#allocation14_spill] sm:$0xff] %v13148_v49 }
 0x138   :  { %v13150_v50 = vpop.f32.mrb[28].mxu0 }
 0x139   :  { %14432 = vst [vmem:[#allocation15_spill] sm:$0xff] %v13150_v50  ;;  %v13152_v51 = vpop.f32.mrb[29].mxu0 }
 0x13a   :  { %14433 = vst [vmem:[#allocation16_spill] sm:$0xff] %v13152_v51 }
 0x13c   :  { %v13154_v52 = vpop.f32.mrb[30].mxu0 }
 0x13d   :  { %14434 = vst [vmem:[#allocation17_spill] sm:$0xff] %v13154_v52  ;;  %v13156_v53 = vpop.f32.mrb[31].mxu0 }
 0x13e   :  { %14435 = vst [vmem:[#allocation18_spill] sm:$0xff] %v13156_v53 }
 0x13f   :  { %900 = vxpose.xlu0.b32.start [1/2] (short) %v457_v27, 128 }
 0x140   :  { %v13158_v54 = vpop.f32.mrb[32].mxu0 }
 0x141   :  { %14436 = vst [vmem:[#allocation19_spill] sm:$0xff] %v13158_v54  ;;  %v13160_v55 = vpop.f32.mrb[33].mxu0 }
 0x142   :  { %14437 = vst [vmem:[#allocation20_spill] sm:$0xff] %v13160_v55 }
 0x143   :  { %901 = vxpose.xlu0.b32.end [2/2] (short) %v11556_v26, 128  ;;  %932 = vxpose.xlu1.b32.start [1/2] (short) %v467_v29, 128 }
 0x144   :  { %v13162_v56 = vpop.f32.mrb[34].mxu0 }
 0x145   :  { %v13164_v57 = vpop.f32.mrb[35].mxu0 }
 0x147   :  { %933 = vxpose.xlu1.b32.end [2/2] (short) %v11559_v28, 128 }
 0x148   :  { %v13166_v58 = vpop.f32.mrb[36].mxu0 }
 0x149   :  { %v13168_v59 = vpop.f32.mrb[37].mxu0 }
 0x14c   :  { %v13171_v61 = vpop.f32.mrb[38].mxu0 }
 0x14d   :  { %v13173_v62 = vpop.f32.mrb[39].mxu0 }
 0x150   :  { %v13195_v23 = vpop.f32.mrb[40].mxu0 }
 0x151   :  { %v13197_v24 = vpop.f32.mrb[41].mxu0 }
 0x154   :  { %v13199_v25 = vpop.f32.mrb[42].mxu0 }
 0x155   :  { %v13202_v28 = vpop.f32.mrb[43].mxu0 }
 0x158   :  { %v13204_v29 = vpop.f32.mrb[44].mxu0 }
 0x17c   :  { %964 = vxpose.xlu0.b32.start [1/2] (short) %v477_v31, 128 }
 0x180   :  { %965 = vxpose.xlu0.b32.end [2/2] (short) %v11562_v30, 128  ;;  %996 = vxpose.xlu1.b32.start [1/2] (short) %v487_v33, 128  ;;  %v13206_v30 = vpop.f32.mrb[45].mxu0 }
 0x181   :  { %v13210_v33 = vpop.f32.mrb[46].mxu0 }
 0x182   :  { %v852_v60 = vpop.trf.xlu0 }
 0x183   :  { %11672 = vmatprep.mubr.msk.f32.mxu0 %vm130_vm0, %v852_v60  ;;  %v13212_v60 = vpop.f32.mrb[47].mxu0 }
 0x184   :  { %997 = vxpose.xlu1.b32.end [2/2] (short) %v11565_v32, 128 }
 0x186   :  { %v853_v63 = vpop.trf.xlu0  ;;  %v884_v0 = vpop.trf.xlu1 }
 0x187   :  { %11673 = vmatmul.mubr.msk.f32.vlgmr.msra.gmra.mrb[80].mxu0 %vm130_vm0, %v853_v63  ;;  %v13214_v63 = vpop.f32.mrb[48].mxu0 }
 0x18a   :  { %v854_v1 = vpop.trf.xlu0  ;;  %v885_v2 = vpop.trf.xlu1 }
 0x18b   :  { %11675 = vmatprep.mubr.msk.f32.mxu0 %vm130_vm0, %v854_v1 }
 0x18e   :  { %v855_v3 = vpop.trf.xlu0  ;;  %v886_v4 = vpop.trf.xlu1 }
 0x18f   :  { %11676 = vmatmul.mubr.msk.f32.gmra.mrb[82].mxu0 %vm130_vm0, %v855_v3 }
 0x192   :  { %v856_v5 = vpop.trf.xlu0  ;;  %v887_v6 = vpop.trf.xlu1 }
 0x193   :  { %11678 = vmatprep.mubr.msk.f32.mxu0 %vm130_vm0, %v856_v5  ;;  %v13219_v5 = vpop.f32.mrb[49].mxu0 }
 0x196   :  { %v857_v7 = vpop.trf.xlu0  ;;  %v888_v8 = vpop.trf.xlu1 }
 0x197   :  { %11679 = vmatmul.mubr.msk.f32.gmra.mrb[84].mxu0 %vm130_vm0, %v857_v7 }
 0x19a   :  { %v858_v9 = vpop.trf.xlu0  ;;  %v889_v10 = vpop.trf.xlu1 }
 0x19b   :  { %11681 = vmatprep.mubr.msk.f32.mxu0 %vm130_vm0, %v858_v9 }
 0x19e   :  { %v859_v11 = vpop.trf.xlu0  ;;  %v890_v12 = vpop.trf.xlu1 }
 0x19f   :  { %11682 = vmatmul.mubr.msk.f32.gmra.mrb[86].mxu0 %vm130_vm0, %v859_v11 }
 0x1a2   :  { %v860_v15 = vpop.trf.xlu0  ;;  %v13182_v16 = vpop.trf.xlu1 }
 0x1a3   :  { %11684 = vmatprep.mubr.msk.f32.mxu0 %vm130_vm0, %v860_v15 }
 0x1a6   :  { %v861_v17 = vpop.trf.xlu0  ;;  %v892_v18 = vpop.trf.xlu1 }
 0x1a7   :  { %11685 = vmatmul.mubr.msk.f32.gmra.mrb[88].mxu0 %vm130_vm0, %v861_v17 }
 0x1aa   :  { %v862_v21 = vpop.trf.xlu0  ;;  %v13186_v22 = vpop.trf.xlu1 }
 0x1ab   :  { %11687 = vmatprep.mubr.msk.f32.mxu0 %vm130_vm0, %v862_v21 }
 0x1ae   :  { %v863_v13 = vpop.trf.xlu0  ;;  %v13189_v14 = vpop.trf.xlu1 }
 0x1af   :  { %11688 = vmatmul.mubr.msk.f32.gmra.mrb[90].mxu0 %vm130_vm0, %v863_v13 }
 0x1b2   :  { %v864_v19 = vpop.trf.xlu0  ;;  %v13192_v20 = vpop.trf.xlu1 }
 0x1b3   :  { %11690 = vmatprep.mubr.msk.f32.mxu0 %vm130_vm0, %v864_v19 }
 0x1b6   :  { %v865_v26 = vpop.trf.xlu0  ;;  %v896_v27 = vpop.trf.xlu1 }
 0x1b7   :  { %11691 = vmatmul.mubr.msk.f32.gmra.mrb[92].mxu0 %vm130_vm0, %v865_v26 }
 0x1ba   :  { %v866_v31 = vpop.trf.xlu0  ;;  %v897_v32 = vpop.trf.xlu1  ;;  %1028 = vxpose.xlu0.b32.start [1/2] (short) %v13120_v35, 128 }
 0x1bb   :  { %11693 = vmatprep.mubr.msk.f32.mxu0 %vm130_vm0, %v866_v31  ;;  %v13222_v35 = vpop.f32.mrb[50].mxu0 }
 0x1bc   :  { %v13224_v7 = vpop.f32.mrb[51].mxu0 }
 0x1bd   :  { %v13228_v15 = vpop.f32.mrb[52].mxu0 }
 0x1be   :  { %v867_v1 = vpop.trf.xlu0  ;;  %v898_v3 = vpop.trf.xlu1  ;;  %1029 = vxpose.xlu0.b32.end [2/2] (short) %v13118_v34, 128  ;;  %1380 = vxpose.xlu1.b32.start [1/2] (short) %v13164_v57, 128 }
 0x1bf   :  { %11694 = vmatmul.mubr.msk.f32.gmra.mrb[94].mxu0 %vm130_vm0, %v867_v1  ;;  %v13231_v34 = vpop.f32.mrb[53].mxu0 }
 0x1c0   :  { %11696 = vmatprep.mubr.msk.f32.mxu0 %vm130_vm0, %v884_v0  ;;  %v13233_v57 = vpop.f32.mrb[54].mxu0 }
 0x1c1   :  { %v13238_v21 = vpop.f32.mrb[55].mxu0 }
 0x1c2   :  { %v899_v9 = vpop.trf.xlu1  ;;  %v916_v11 = vpop.trf.xlu0  ;;  %1381 = vxpose.xlu1.b32.end [2/2] (short) %v13162_v56, 128 }
 0x1c3   :  { %11697 = vmatmul.mubr.msk.f32.gmra.mrb[96].mxu0 %vm130_vm0, %v885_v2  ;;  %v13241_v56 = vpop.f32.mrb[56].mxu0 }
 0x1c4   :  { %11699 = vmatprep.mubr.msk.f32.mxu0 %vm130_vm0, %v886_v4  ;;  %v13243_v2 = vpop.f32.mrb[57].mxu0 }
 0x1c5   :  { %v13248_v4 = vpop.f32.mrb[58].mxu0 }
 0x1c6   :  { %v917_v17 = vpop.trf.xlu0  ;;  %v13235_v0 = vpop.trf.xlu1 }
 0x1c7   :  { %11700 = vmatmul.mubr.msk.f32.gmra.mrb[98].mxu0 %vm130_vm0, %v887_v6  ;;  %v13251_v26 = vpop.f32.mrb[59].mxu0 }
 0x1c8   :  { %11702 = vmatprep.mubr.msk.f32.mxu0 %vm130_vm0, %v888_v8  ;;  %v13253_v6 = vpop.f32.mrb[60].mxu0 }
 0x1c9   :  { %v13259_v8 = vpop.f32.mrb[61].mxu0 }
 0x1ca   :  { %v918_v13 = vpop.trf.xlu0  ;;  %v13245_v19 = vpop.trf.xlu1 }
 0x1cb   :  { %11703 = vmatmul.mubr.msk.f32.gmra.mrb[100].mxu0 %vm130_vm0, %v889_v10  ;;  %v13262_v54 = vpop.f32.mrb[62].mxu0 }
 0x1cc   :  { %11705 = vmatprep.mubr.msk.f32.mxu0 %vm130_vm0, %v890_v12  ;;  %v13264_v10 = vpop.f32.mrb[63].mxu0 }
 0x1cd   :  { %v13270_v52 = vpop.f32.mrb[64].mxu0 }
 0x1ce   :  { %v919_v31 = vpop.trf.xlu0  ;;  %v13255_v1 = vpop.trf.xlu1 }
 0x1cf   :  { %11706 = vmatmul.mubr.msk.f32.gmra.mrb[102].mxu0 %vm130_vm0, %v13182_v16  ;;  %v13274_v16 = vpop.f32.mrb[65].mxu0 }
 0x1d0   :  { %11708 = vmatprep.mubr.msk.f32.mxu0 %vm130_vm0, %v892_v18  ;;  %v13276_v53 = vpop.f32.mrb[66].mxu0 }
 0x1d1   :  { %14438 = vst [vmem:[#allocation21_spill] sm:$0xff] %v13276_v53  ;;  %v13282_v51 = vpop.f32.mrb[67].mxu0 }
 0x1d2   :  { %v920_v55 = vpop.trf.xlu0  ;;  %v13266_v12 = vpop.trf.xlu1  ;;  %14439 = vst [vmem:[#allocation22_spill] sm:$0xff] %v13282_v51 }
 0x1d3   :  { %11709 = vmatmul.mubr.msk.f32.gmra.mrb[104].mxu0 %vm130_vm0, %v13186_v22  ;;  %v13285_v22 = vpop.f32.mrb[68].mxu0 }
 0x1d4   :  { %11711 = vmatprep.mubr.msk.f32.mxu0 %vm130_vm0, %v13189_v14  ;;  %14440 = vst [vmem:[#allocation23_spill] sm:$0xff] %v13285_v22  ;;  %v13287_v48 = vpop.f32.mrb[69].mxu0 }
 0x1d5   :  { %14441 = vst [vmem:[#allocation24_spill] sm:$0xff] %v13287_v48  ;;  %v13292_v46 = vpop.f32.mrb[70].mxu0 }
 0x1d6   :  { %v921_v18 = vpop.trf.xlu0  ;;  %v13278_v50 = vpop.trf.xlu1  ;;  %14442 = vst [vmem:[#allocation25_spill] sm:$0xff] %v13292_v46 }
 0x1d7   :  { %11712 = vmatmul.mubr.msk.f32.gmra.mrb[106].mxu0 %vm130_vm0, %v13192_v20  ;;  %v13295_v47 = vpop.f32.mrb[71].mxu0 }
 0x1d8   :  { %11714 = vmatprep.mubr.msk.f32.mxu0 %vm130_vm0, %v896_v27  ;;  %14443 = vst [vmem:[#allocation26_spill] sm:$0xff] %v13295_v47  ;;  %v13297_v20 = vpop.f32.mrb[72].mxu0 }
 0x1d9   :  { %14444 = vst [vmem:[#allocation27_spill] sm:$0xff] %v13297_v20  ;;  %v13300_v27 = vpop.f32.mrb[73].mxu0 }
 0x1da   :  { %v922_v49 = vpop.trf.xlu0  ;;  %v13289_v14 = vpop.trf.xlu1  ;;  %14445 = vst [vmem:[#allocation28_spill] sm:$0xff] %v13300_v27 }
 0x1db   :  { %11715 = vmatmul.mubr.msk.f32.gmra.mrb[108].mxu0 %vm130_vm0, %v897_v32  ;;  %v13303_v22 = vpop.f32.mrb[74].mxu0 }
 0x1dc   :  { %11717 = vmatprep.mubr.msk.f32.mxu0 %vm130_vm0, %v898_v3  ;;  %14446 = vst [vmem:[#allocation29_spill] sm:$0xff] %v13303_v22  ;;  %v13305_v48 = vpop.f32.mrb[75].mxu0 }
 0x1dd   :  { %14447 = vst [vmem:[#allocation30_spill] sm:$0xff] %v13305_v48  ;;  %v13308_v3 = vpop.f32.mrb[76].mxu0 }
 0x1de   :  { %v923_v53 = vpop.trf.xlu0  ;;  %v954_v51 = vpop.trf.xlu1  ;;  %14448 = vst [vmem:[#allocation31_spill] sm:$0xff] %v13308_v3 }
 0x1df   :  { %11718 = vmatmul.mubr.msk.f32.gmra.mrb[110].mxu0 %vm130_vm0, %v899_v9  ;;  %v13311_v20 = vpop.f32.mrb[77].mxu0 }
 0x1e0   :  { %11720 = vmatprep.mubr.msk.f32.mxu0 %vm130_vm0, %v916_v11  ;;  %v13313_v47 = vpop.f32.mrb[78].mxu0 }
 0x1e1   :  { %14449 = vst [vmem:[#allocation32_spill] sm:$0xff] %v13313_v47  ;;  %v13316_v11 = vpop.f32.mrb[79].mxu0 }
 0x1e2   :  { %v924_v32 = vpop.trf.xlu0  ;;  %v955_v46 = vpop.trf.xlu1 }
 0x1e3   :  { %11721 = vmatmul.mubr.msk.f32.gmra.mrb[112].mxu0 %vm130_vm0, %v917_v17 }
 0x1e4   :  { %11723 = vmatprep.mubr.msk.f32.mxu0 %vm130_vm0, %v918_v13 }
 0x1e6   :  { %v925_v9 = vpop.trf.xlu0  ;;  %v956_v27 = vpop.trf.xlu1 }
 0x1e7   :  { %11724 = vmatmul.mubr.msk.f32.gmra.mrb[114].mxu0 %vm130_vm0, %v919_v31 }
 0x1e8   :  { %11726 = vmatprep.mubr.msk.f32.mxu0 %vm130_vm0, %v920_v55 }
 0x1ea   :  { %v926_v22 = vpop.trf.xlu0  ;;  %v957_v48 = vpop.trf.xlu1 }
 0x1eb   :  { %11727 = vmatmul.mubr.msk.f32.gmra.mrb[116].mxu0 %vm130_vm0, %v921_v18 }
 0x1ec   :  { %11729 = vmatprep.mubr.msk.f32.mxu0 %vm130_vm0, %v922_v49 }
 0x1ee   :  { %v927_v17 = vpop.trf.xlu0  ;;  %v958_v13 = vpop.trf.xlu1 }
 0x1ef   :  { %11730 = vmatmul.mubr.msk.f32.gmra.mrb[118].mxu0 %vm130_vm0, %v923_v53 }
 0x1f0   :  { %11732 = vmatprep.mubr.msk.f32.mxu0 %vm130_vm0, %v924_v32 }
 0x1f2   :  { %v928_v47 = vpop.trf.xlu0  ;;  %v959_v3 = vpop.trf.xlu1 }
 0x1f3   :  { %11733 = vmatmul.mubr.msk.f32.gmra.mrb[120].mxu0 %vm130_vm0, %v925_v9 }
 0x1f4   :  { %11735 = vmatprep.mubr.msk.f32.mxu0 %vm130_vm0, %v926_v22 }
 0x1f6   :  { %v929_v31 = vpop.trf.xlu0  ;;  %v960_v55 = vpop.trf.xlu1 }
 0x1f7   :  { %11736 = vmatmul.mubr.msk.f32.gmra.mrb[122].mxu0 %vm130_vm0, %v927_v17 }
 0x1f8   :  { %11738 = vmatprep.mubr.msk.f32.mxu0 %vm130_vm0, %v928_v47 }
 0x1fa   :  { %v930_v18 = vpop.trf.xlu0  ;;  %v961_v49 = vpop.trf.xlu1  ;;  %1412 = vxpose.xlu0.b32.start [1/2] (short) %v13168_v59, 128 }
 0x1fb   :  { %11739 = vmatmul.mubr.msk.f32.gmra.mrb[124].mxu0 %vm130_vm0, %v929_v31 }
 0x1fc   :  { %11741 = vmatprep.mubr.msk.f32.mxu0 %vm130_vm0, %v930_v18 }
 0x1fe   :  { %v931_v53 = vpop.trf.xlu0  ;;  %v962_v32 = vpop.trf.xlu1  ;;  %1413 = vxpose.xlu0.b32.end [2/2] (short) %v13166_v58, 128  ;;  %1444 = vxpose.xlu1.b32.start [1/2] (short) %v13173_v62, 128 }
 0x1ff   :  { %11742 = vmatmul.mubr.msk.f32.gmra.mrb[126].mxu0 %vm130_vm0, %v931_v53 }
 0x200   :  { %11744 = vmatprep.mubr.msk.f32.mxu0 %vm130_vm0, %v13235_v0 }
 0x202   :  { %v963_v47 = vpop.trf.xlu1  ;;  %v980_v22 = vpop.trf.xlu0  ;;  %1445 = vxpose.xlu1.b32.end [2/2] (short) %v13171_v61, 128 }
 0x203   :  { %11745 = vmatmul.mubr.msk.f32.gmra.mrb[128].mxu0 %vm130_vm0, %v13245_v19 }
 0x204   :  { %11747 = vmatprep.mubr.msk.f32.mxu0 %vm130_vm0, %v13255_v1 }
 0x206   :  { %v981_v59 = vpop.trf.xlu0  ;;  %v1012_v9 = vpop.trf.xlu1 }
 0x207   :  { %11748 = vmatmul.mubr.msk.f32.gmra.mrb[130].mxu0 %vm130_vm0, %v13266_v12 }
 0x208   :  { %11750 = vmatprep.mubr.msk.f32.mxu0 %vm130_vm0, %v13278_v50 }
 0x20a   :  { %v982_v58 = vpop.trf.xlu0  ;;  %v1013_v62 = vpop.trf.xlu1 }
 0x20b   :  { %11751 = vmatmul.mubr.msk.f32.gmra.mrb[132].mxu0 %vm130_vm0, %v13289_v14 }
 0x20c   :  { %11753 = vmatprep.mubr.msk.f32.mxu0 %vm130_vm0, %v954_v51 }
 0x20e   :  { %v983_v61 = vpop.trf.xlu0  ;;  %v1014_v0 = vpop.trf.xlu1 }
 0x20f   :  { %11754 = vmatmul.mubr.msk.f32.gmra.mrb[134].mxu0 %vm130_vm0, %v955_v46 }
 0x210   :  { %11756 = vmatprep.mubr.msk.f32.mxu0 %vm130_vm0, %v956_v27 }
 0x212   :  { %v984_v19 = vpop.trf.xlu0  ;;  %v1015_v1 = vpop.trf.xlu1 }
 0x213   :  { %11757 = vmatmul.mubr.msk.f32.gmra.mrb[136].mxu0 %vm130_vm0, %v957_v48 }
 0x214   :  { %11759 = vmatprep.mubr.msk.f32.mxu0 %vm130_vm0, %v958_v13 }
 0x216   :  { %v985_v50 = vpop.trf.xlu0  ;;  %v1016_v12 = vpop.trf.xlu1 }
 0x217   :  { %11760 = vmatmul.mubr.msk.f32.gmra.mrb[138].mxu0 %vm130_vm0, %v959_v3 }
 0x218   :  { %11762 = vmatprep.mubr.msk.f32.mxu0 %vm130_vm0, %v960_v55 }
 0x21a   :  { %v986_v14 = vpop.trf.xlu0  ;;  %v1017_v51 = vpop.trf.xlu1 }
 0x21b   :  { %11763 = vmatmul.mubr.msk.f32.gmra.mrb[140].mxu0 %vm130_vm0, %v961_v49 }
 0x21c   :  { %11765 = vmatprep.mubr.msk.f32.mxu0 %vm130_vm0, %v962_v32 }
 0x21e   :  { %v987_v46 = vpop.trf.xlu0  ;;  %v1018_v27 = vpop.trf.xlu1 }
 0x21f   :  { %11766 = vmatmul.mubr.msk.f32.gmra.mrb[142].mxu0 %vm130_vm0, %v963_v47 }
 0x220   :  { %11768 = vmatprep.mubr.msk.f32.mxu0 %vm130_vm0, %v980_v22 }
 0x222   :  { %v988_v48 = vpop.trf.xlu0  ;;  %v1019_v17 = vpop.trf.xlu1 }
 0x223   :  { %11769 = vmatmul.mubr.msk.f32.gmra.mrb[144].mxu0 %vm130_vm0, %v981_v59 }
 0x224   :  { %11771 = vmatprep.mubr.msk.f32.mxu0 %vm130_vm0, %v982_v58 }
 0x226   :  { %v989_v3 = vpop.trf.xlu0  ;;  %v1020_v13 = vpop.trf.xlu1 }
 0x227   :  { %11772 = vmatmul.mubr.msk.f32.gmra.mrb[146].mxu0 %vm130_vm0, %v983_v61 }
 0x228   :  { %11774 = vmatprep.mubr.msk.f32.mxu0 %vm130_vm0, %v984_v19 }
 0x22a   :  { %v990_v31 = vpop.trf.xlu0  ;;  %v1021_v55 = vpop.trf.xlu1 }
 0x22b   :  { %11775 = vmatmul.mubr.msk.f32.gmra.mrb[148].mxu0 %vm130_vm0, %v985_v50 }
 0x22c   :  { %11777 = vmatprep.mubr.msk.f32.mxu0 %vm130_vm0, %v986_v14 }
 0x22e   :  { %v991_v18 = vpop.trf.xlu0  ;;  %v1022_v49 = vpop.trf.xlu1 }
 0x22f   :  { %11778 = vmatmul.mubr.msk.f32.gmra.mrb[150].mxu0 %vm130_vm0, %v987_v46 }
 0x230   :  { %11780 = vmatprep.mubr.msk.f32.mxu0 %vm130_vm0, %v988_v48 }
 0x232   :  { %v992_v53 = vpop.trf.xlu0  ;;  %v1023_v32 = vpop.trf.xlu1 }
 0x233   :  { %11781 = vmatmul.mubr.msk.f32.gmra.mrb[152].mxu0 %vm130_vm0, %v989_v3 }
 0x234   :  { %11783 = vmatprep.mubr.msk.f32.mxu0 %vm130_vm0, %v990_v31 }
 0x236   :  { %v993_v47 = vpop.trf.xlu0  ;;  %v1024_v22 = vpop.trf.xlu1 }
 0x237   :  { %11784 = vmatmul.mubr.msk.f32.gmra.mrb[154].mxu0 %vm130_vm0, %v991_v18 }
 0x238   :  { %11786 = vmatprep.mubr.msk.f32.mxu0 %vm130_vm0, %v992_v53 }
 0x23a   :  { %v994_v59 = vpop.trf.xlu0  ;;  %v1025_v58 = vpop.trf.xlu1  ;;  %1476 = vxpose.xlu0.b32.start [1/2] (short) %v13197_v24, 128 }
 0x23b   :  { %11787 = vmatmul.mubr.msk.f32.gmra.mrb[156].mxu0 %vm130_vm0, %v993_v47 }
 0x23c   :  { %11789 = vmatprep.mubr.msk.f32.mxu0 %vm130_vm0, %v994_v59 }
 0x23e   :  { %v995_v61 = vpop.trf.xlu0  ;;  %v1026_v19 = vpop.trf.xlu1  ;;  %1477 = vxpose.xlu0.b32.end [2/2] (short) %v13195_v23, 128  ;;  %1508 = vxpose.xlu1.b32.start [1/2] (short) %v13202_v28, 128 }
 0x23f   :  { %11790 = vmatmul.mubr.msk.f32.gmra.mrb[158].mxu0 %vm130_vm0, %v995_v61 }
 0x240   :  { %11792 = vmatprep.mubr.msk.f32.mxu0 %vm130_vm0, %v1012_v9 }
 0x242   :  { %v1027_v50 = vpop.trf.xlu1  ;;  %v1044_v14 = vpop.trf.xlu0  ;;  %1509 = vxpose.xlu1.b32.end [2/2] (short) %v13199_v25, 128 }
 0x243   :  { %11793 = vmatmul.mubr.msk.f32.gmra.mrb[160].mxu0 %vm130_vm0, %v1013_v62 }
 0x244   :  { %11795 = vmatprep.mubr.msk.f32.mxu0 %vm130_vm0, %v1014_v0 }
 0x246   :  { %v1045_v24 = vpop.trf.xlu0  ;;  %v13379_v46 = vpop.trf.xlu1 }
 0x247   :  { %11796 = vmatmul.mubr.msk.f32.gmra.mrb[162].mxu0 %vm130_vm0, %v1015_v1 }
 0x248   :  { %11798 = vmatprep.mubr.msk.f32.mxu0 %vm130_vm0, %v1016_v12 }
 0x24a   :  { %v1046_v23 = vpop.trf.xlu0  ;;  %v13383_v28 = vpop.trf.xlu1 }
 0x24b   :  { %11799 = vmatmul.mubr.msk.f32.gmra.mrb[164].mxu0 %vm130_vm0, %v1017_v51 }
 0x24c   :  { %11801 = vmatprep.mubr.msk.f32.mxu0 %vm130_vm0, %v1018_v27 }
 0x24e   :  { %v1047_v9 = vpop.trf.xlu0  ;;  %v13387_v25 = vpop.trf.xlu1 }
 0x24f   :  { %11802 = vmatmul.mubr.msk.f32.gmra.mrb[166].mxu0 %vm130_vm0, %v1019_v17 }
 0x250   :  { %11804 = vmatprep.mubr.msk.f32.mxu0 %vm130_vm0, %v1020_v13 }
 0x252   :  { %v1048_v62 = vpop.trf.xlu0  ;;  %v13391_v0 = vpop.trf.xlu1 }
 0x253   :  { %11805 = vmatmul.mubr.msk.f32.gmra.mrb[168].mxu0 %vm130_vm0, %v1021_v55 }
 0x254   :  { %11807 = vmatprep.mubr.msk.f32.mxu0 %vm130_vm0, %v1022_v49 }
 0x256   :  { %v1049_v1 = vpop.trf.xlu0  ;;  %v13395_v12 = vpop.trf.xlu1 }
 0x257   :  { %11808 = vmatmul.mubr.msk.f32.gmra.mrb[170].mxu0 %vm130_vm0, %v1023_v32 }
 0x258   :  { %11810 = vmatprep.mubr.msk.f32.mxu0 %vm130_vm0, %v1024_v22 }
 0x25a   :  { %v1050_v51 = vpop.trf.xlu0  ;;  %v13399_v27 = vpop.trf.xlu1 }
 0x25b   :  { %v11674_v48 = vpop.f32.mrb[80].mxu0  ;;  %11811 = vmatmul.mubr.msk.f32.gmra.mrb[172].mxu0 %vm130_vm0, %v1025_v58 }
 0x25c   :  { %v13402_v17 = vpop.f32.mrb[81].mxu0  ;;  %11813 = vmatprep.mubr.msk.f32.mxu0 %vm130_vm0, %v1026_v19 }
 0x25e   :  { %v1051_v3 = vpop.trf.xlu0  ;;  %v13405_v13 = vpop.trf.xlu1 }
 0x25f   :  { %11814 = vmatmul.mubr.msk.f32.gmra.mrb[174].mxu0 %vm130_vm0, %v1027_v50 }
 0x260   :  { %11816 = vmatprep.mubr.msk.f32.mxu0 %vm130_vm0, %v1044_v14 }
 0x262   :  { %v1052_v31 = vpop.trf.xlu0  ;;  %v13409_v55 = vpop.trf.xlu1 }
 0x263   :  { %14450 = vst [vmem:[#allocation33_spill] sm:$0xff] %v13409_v55  ;;  %v11677_v18 = vpop.f32.mrb[82].mxu0  ;;  %11817 = vmatmul.mubr.msk.f32.gmra.mrb[176].mxu0 %vm130_vm0, %v1045_v24 }
 0x264   :  { %v4112_v49 = vpop.f32.mrb[83].mxu0  ;;  %11819 = vmatprep.mubr.msk.f32.mxu0 %vm130_vm0, %v1046_v23 }
 0x266   :  { %v1053_v53 = vpop.trf.xlu0  ;;  %v1404_v32 = vpop.trf.xlu1 }
 0x267   :  { %11820 = vmatmul.mubr.msk.f32.gmra.mrb[178].mxu0 %vm130_vm0, %v1047_v9  ;;  %12092 = vmatprep.mubr.msk.f32.mxu1 %vm130_vm0, %v1404_v32 }
 0x268   :  { %11822 = vmatprep.mubr.msk.f32.mxu0 %vm130_vm0, %v1048_v62 }
 0x26a   :  { %v1054_v47 = vpop.trf.xlu0  ;;  %v1405_v22 = vpop.trf.xlu1 }
 0x26b   :  { %v11680_v59 = vpop.f32.mrb[84].mxu0  ;;  %11823 = vmatmul.mubr.msk.f32.gmra.mrb[180].mxu0 %vm130_vm0, %v1049_v1  ;;  %12093 = vmatmul.mubr.msk.f32.vlgmr.msra.gmra.mrb[0].mxu1 %vm130_vm0, %v1405_v22 }
 0x26c   :  { %v4122_v58 = vpop.f32.mrb[85].mxu0  ;;  %11825 = vmatprep.mubr.msk.f32.mxu0 %vm130_vm0, %v1050_v51 }
 0x26e   :  { %v1055_v61 = vpop.trf.xlu0  ;;  %v1406_v19 = vpop.trf.xlu1 }
 0x26f   :  { %11826 = vmatmul.mubr.msk.f32.gmra.mrb[182].mxu0 %vm130_vm0, %v1051_v3  ;;  %12095 = vmatprep.mubr.msk.f32.mxu1 %vm130_vm0, %v1406_v19 }
 0x270   :  { %11828 = vmatprep.mubr.msk.f32.mxu0 %vm130_vm0, %v1052_v31 }
 0x272   :  { %v1056_v50 = vpop.trf.xlu0  ;;  %v1407_v14 = vpop.trf.xlu1 }
 0x273   :  { %v11683_v24 = vpop.f32.mrb[86].mxu0  ;;  %11829 = vmatmul.mubr.msk.f32.gmra.mrb[184].mxu0 %vm130_vm0, %v1053_v53  ;;  %12096 = vmatmul.mubr.msk.f32.gmra.mrb[2].mxu1 %vm130_vm0, %v1407_v14 }
 0x274   :  { %v4132_v23 = vpop.f32.mrb[87].mxu0  ;;  %11831 = vmatprep.mubr.msk.f32.mxu0 %vm130_vm0, %v1054_v47 }
 0x276   :  { %v1057_v9 = vpop.trf.xlu0  ;;  %v1408_v62 = vpop.trf.xlu1 }
 0x277   :  { %11832 = vmatmul.mubr.msk.f32.gmra.mrb[186].mxu0 %vm130_vm0, %v1055_v61  ;;  %12098 = vmatprep.mubr.msk.f32.mxu1 %vm130_vm0, %v1408_v62 }
 0x278   :  { %11834 = vmatprep.mubr.msk.f32.mxu0 %vm130_vm0, %v1056_v50 }
 0x27a   :  { %v1058_v1 = vpop.trf.xlu0  ;;  %v1409_v51 = vpop.trf.xlu1  ;;  %1540 = vxpose.xlu0.b32.start [1/2] (short) %v13206_v30, 128 }
 0x27b   :  { %v11686_v48 = vpop.f32.mrb[88].mxu0  ;;  %11835 = vmatmul.mubr.msk.f32.gmra.mrb[188].mxu0 %vm130_vm0, %v1057_v9  ;;  %12099 = vmatmul.mubr.msk.f32.gmra.mrb[4].mxu1 %vm130_vm0, %v1409_v51 }
 0x27c   :  { %v4142_v3 = vpop.f32.mrb[89].mxu0  ;;  %11837 = vmatprep.mubr.msk.f32.mxu0 %vm130_vm0, %v1058_v1 }
 0x27e   :  { %v1059_v31 = vpop.trf.xlu0  ;;  %v1410_v18 = vpop.trf.xlu1  ;;  %1541 = vxpose.xlu0.b32.end [2/2] (short) %v13204_v29, 128  ;;  %1572 = vxpose.xlu1.b32.start [1/2] (short) %v13212_v60, 128 }
 0x27f   :  { %11838 = vmatmul.mubr.msk.f32.gmra.mrb[190].mxu0 %vm130_vm0, %v1059_v31  ;;  %12101 = vmatprep.mubr.msk.f32.mxu1 %vm130_vm0, %v1410_v18 }
 0x282   :  { %v1411_v49 = vpop.trf.xlu1  ;;  %v1428_v30 = vpop.trf.xlu0  ;;  %1573 = vxpose.xlu1.b32.end [2/2] (short) %v13210_v33, 128 }
 0x283   :  { %v11689_v53 = vpop.f32.mrb[90].mxu0  ;;  %12102 = vmatmul.mubr.msk.f32.gmra.mrb[6].mxu1 %vm130_vm0, %v1411_v49 }
 0x284   :  { %v4152_v32 = vpop.f32.mrb[91].mxu0  ;;  %12104 = vmatprep.mubr.msk.f32.mxu1 %vm130_vm0, %v1428_v30 }
 0x286   :  { %v1429_v47 = vpop.trf.xlu0  ;;  %v13439_v22 = vpop.trf.xlu1 }
 0x287   :  { %12105 = vmatmul.mubr.msk.f32.gmra.mrb[8].mxu1 %vm130_vm0, %v1429_v47 }
 0x28a   :  { %v1430_v29 = vpop.trf.xlu0  ;;  %v13442_v60 = vpop.trf.xlu1 }
 0x28b   :  { %v11692_v59 = vpop.f32.mrb[92].mxu0  ;;  %12107 = vmatprep.mubr.msk.f32.mxu1 %vm130_vm0, %v1430_v29 }
 0x28c   :  { %v4162_v58 = vpop.f32.mrb[93].mxu0 }
 0x28e   :  { %v1431_v61 = vpop.trf.xlu0  ;;  %v13445_v33 = vpop.trf.xlu1 }
 0x28f   :  { %12108 = vmatmul.mubr.msk.f32.gmra.mrb[10].mxu1 %vm130_vm0, %v1431_v61 }
 0x292   :  { %v1432_v19 = vpop.trf.xlu0  ;;  %v13448_v50 = vpop.trf.xlu1 }
 0x293   :  { %v11695_v14 = vpop.f32.mrb[94].mxu0  ;;  %12110 = vmatprep.mubr.msk.f32.mxu1 %vm130_vm0, %v1432_v19 }
 0x294   :  { %v4172_v24 = vpop.f32.mrb[95].mxu0 }
 0x296   :  { %v1433_v23 = vpop.trf.xlu0  ;;  %v13451_v9 = vpop.trf.xlu1 }
 0x297   :  { %v11698_v62 = vpop.f32.mrb[96].mxu0  ;;  %12111 = vmatmul.mubr.msk.f32.gmra.mrb[12].mxu1 %vm130_vm0, %v1433_v23 }
 0x298   :  { %v13454_v1 = vpop.f32.mrb[97].mxu0 }
 0x29a   :  { %v1434_v51 = vpop.trf.xlu0  ;;  %v13456_v48 = vpop.trf.xlu1 }
 0x29b   :  { %v11701_v3 = vpop.f32.mrb[98].mxu0  ;;  %12113 = vmatprep.mubr.msk.f32.mxu1 %vm130_vm0, %v1434_v51 }
 0x29c   :  { %v4192_v31 = vpop.f32.mrb[99].mxu0 }
 0x29e   :  { %v1435_v18 = vpop.trf.xlu0  ;;  %v13459_v49 = vpop.trf.xlu1 }
 0x29f   :  { %v11704_v30 = vpop.f32.mrb[100].mxu0  ;;  %12114 = vmatmul.mubr.msk.f32.gmra.mrb[14].mxu1 %vm130_vm0, %v1435_v18 }
 0x2a0   :  { %v4202_v53 = vpop.f32.mrb[101].mxu0 }
 0x2a2   :  { %v1436_v32 = vpop.trf.xlu0  ;;  %v13462_v47 = vpop.trf.xlu1 }
 0x2a3   :  { %v11707_v29 = vpop.f32.mrb[102].mxu0  ;;  %12116 = vmatprep.mubr.msk.f32.mxu1 %vm130_vm0, %v1436_v32 }
 0x2a4   :  { %v4212_v59 = vpop.f32.mrb[103].mxu0 }
 0x2a6   :  { %v1437_v58 = vpop.trf.xlu0  ;;  %v1468_v61 = vpop.trf.xlu1 }
 0x2a7   :  { %v11710_v19 = vpop.f32.mrb[104].mxu0  ;;  %12117 = vmatmul.mubr.msk.f32.gmra.mrb[16].mxu1 %vm130_vm0, %v1437_v58 }
 0x2a8   :  { %v4222_v14 = vpop.f32.mrb[105].mxu0 }
 0x2aa   :  { %v1438_v24 = vpop.trf.xlu0  ;;  %v1469_v23 = vpop.trf.xlu1 }
 0x2ab   :  { %v11713_v62 = vpop.f32.mrb[106].mxu0  ;;  %12119 = vmatprep.mubr.msk.f32.mxu1 %vm130_vm0, %v1438_v24 }
 0x2ac   :  { %v4232_v51 = vpop.f32.mrb[107].mxu0 }
 0x2ae   :  { %v1439_v3 = vpop.trf.xlu0  ;;  %v1470_v31 = vpop.trf.xlu1 }
 0x2af   :  { %12120 = vmatmul.mubr.msk.f32.gmra.mrb[18].mxu1 %vm130_vm0, %v1439_v3  ;;  %v11716_v18 = vpop.f32.mrb[108].mxu0 }
 0x2b0   :  { %v4242_v30 = vpop.f32.mrb[109].mxu0 }
 0x2b2   :  { %v1440_v53 = vpop.trf.xlu0  ;;  %v1471_v32 = vpop.trf.xlu1 }
 0x2b3   :  { %12122 = vmatprep.mubr.msk.f32.mxu1 %vm130_vm0, %v1440_v53  ;;  %v11719_v29 = vpop.f32.mrb[110].mxu0 }
 0x2b4   :  { %v4252_v59 = vpop.f32.mrb[111].mxu0 }
 0x2b6   :  { %v1441_v58 = vpop.trf.xlu0  ;;  %v1472_v19 = vpop.trf.xlu1 }
 0x2b7   :  { %v11722_v14 = vpop.f32.mrb[112].mxu0  ;;  %12123 = vmatmul.mubr.msk.f32.gmra.mrb[20].mxu1 %vm130_vm0, %v1441_v58 }
 0x2b8   :  { %v13470_v62 = vpop.f32.mrb[113].mxu0 }
 0x2ba   :  { %v1442_v24 = vpop.trf.xlu0  ;;  %v1473_v51 = vpop.trf.xlu1  ;;  %1604 = vxpose.xlu0.b32.start [1/2] (short) %v13219_v5, 128 }
 0x2bb   :  { %v11725_v3 = vpop.f32.mrb[114].mxu0  ;;  %12125 = vmatprep.mubr.msk.f32.mxu1 %vm130_vm0, %v1442_v24 }
 0x2bc   :  { %v4272_v18 = vpop.f32.mrb[115].mxu0 }
 0x2be   :  { %v1443_v30 = vpop.trf.xlu0  ;;  %v1474_v55 = vpop.trf.xlu1  ;;  %1605 = vxpose.xlu0.b32.end [2/2] (short) %v13214_v63, 128  ;;  %1636 = vxpose.xlu1.b32.start [1/2] (short) %v13224_v7, 128 }
 0x2bf   :  { %v11728_v53 = vpop.f32.mrb[116].mxu0  ;;  %12126 = vmatmul.mubr.msk.f32.gmra.mrb[22].mxu1 %vm130_vm0, %v1443_v30 }
 0x2c0   :  { %v4282_v29 = vpop.f32.mrb[117].mxu0  ;;  %12128 = vmatprep.mubr.msk.f32.mxu1 %vm130_vm0, %v13439_v22 }
 0x2c2   :  { %v1475_v59 = vpop.trf.xlu1  ;;  %v1492_v58 = vpop.trf.xlu0  ;;  %1637 = vxpose.xlu1.b32.end [2/2] (short) %v13222_v35, 128 }
 0x2c3   :  { %v11731_v5 = vpop.f32.mrb[118].mxu0  ;;  %12129 = vmatmul.mubr.msk.f32.gmra.mrb[24].mxu1 %vm130_vm0, %v13442_v60 }
 0x2c4   :  { %v4292_v14 = vpop.f32.mrb[119].mxu0  ;;  %12131 = vmatprep.mubr.msk.f32.mxu1 %vm130_vm0, %v13445_v33 }
 0x2c6   :  { %v1493_v63 = vpop.trf.xlu0  ;;  %v13484_v7 = vpop.trf.xlu1 }
 0x2c7   :  { %v11734_v24 = vpop.f32.mrb[120].mxu0  ;;  %12132 = vmatmul.mubr.msk.f32.gmra.mrb[26].mxu1 %vm130_vm0, %v13448_v50 }
 0x2c8   :  { %v4302_v22 = vpop.f32.mrb[121].mxu0  ;;  %12134 = vmatprep.mubr.msk.f32.mxu1 %vm130_vm0, %v13451_v9 }
 0x2ca   :  { %v1494_v35 = vpop.trf.xlu0  ;;  %v13490_v3 = vpop.trf.xlu1 }
 0x2cb   :  { %v11737_v18 = vpop.f32.mrb[122].mxu0  ;;  %12135 = vmatmul.mubr.msk.f32.gmra.mrb[28].mxu1 %vm130_vm0, %v13456_v48 }
 0x2cc   :  { %v4312_v60 = vpop.f32.mrb[123].mxu0  ;;  %12137 = vmatprep.mubr.msk.f32.mxu1 %vm130_vm0, %v13459_v49 }
 0x2ce   :  { %v1495_v33 = vpop.trf.xlu0  ;;  %v13496_v30 = vpop.trf.xlu1 }
 0x2cf   :  { %v11740_v53 = vpop.f32.mrb[124].mxu0  ;;  %12138 = vmatmul.mubr.msk.f32.gmra.mrb[30].mxu1 %vm130_vm0, %v13462_v47 }
 0x2d0   :  { %v4322_v50 = vpop.f32.mrb[125].mxu0  ;;  %12140 = vmatprep.mubr.msk.f32.mxu1 %vm130_vm0, %v1468_v61 }
 0x2d2   :  { %v1496_v9 = vpop.trf.xlu0  ;;  %v13501_v29 = vpop.trf.xlu1 }
 0x2d3   :  { %v11743_v5 = vpop.f32.mrb[126].mxu0  ;;  %12141 = vmatmul.mubr.msk.f32.gmra.mrb[32].mxu1 %vm130_vm0, %v1469_v23 }
 0x2d4   :  { %v4332_v48 = vpop.f32.mrb[127].mxu0  ;;  %12143 = vmatprep.mubr.msk.f32.mxu1 %vm130_vm0, %v1470_v31 }
 0x2d6   :  { %v1497_v49 = vpop.trf.xlu0  ;;  %v13505_v14 = vpop.trf.xlu1 }
 0x2d7   :  { %v11746_v24 = vpop.f32.mrb[128].mxu0  ;;  %12144 = vmatmul.mubr.msk.f32.gmra.mrb[34].mxu1 %vm130_vm0, %v1471_v32 }
 0x2d8   :  { %v13508_v22 = vpop.f32.mrb[129].mxu0  ;;  %12146 = vmatprep.mubr.msk.f32.mxu1 %vm130_vm0, %v1472_v19 }
 0x2da   :  { %v1498_v47 = vpop.trf.xlu0  ;;  %v13511_v61 = vpop.trf.xlu1 }
 0x2db   :  { %v11749_v18 = vpop.f32.mrb[130].mxu0  ;;  %12147 = vmatmul.mubr.msk.f32.gmra.mrb[36].mxu1 %vm130_vm0, %v1473_v51 }
 0x2dc   :  { %v4352_v23 = vpop.f32.mrb[131].mxu0  ;;  %12149 = vmatprep.mubr.msk.f32.mxu1 %vm130_vm0, %v1474_v55 }
 0x2de   :  { %v1499_v31 = vpop.trf.xlu0  ;;  %v13515_v60 = vpop.trf.xlu1 }
 0x2df   :  { %v11752_v53 = vpop.f32.mrb[132].mxu0  ;;  %12150 = vmatmul.mubr.msk.f32.gmra.mrb[38].mxu1 %vm130_vm0, %v1475_v59 }
 0x2e0   :  { %v4362_v32 = vpop.f32.mrb[133].mxu0  ;;  %12152 = vmatprep.mubr.msk.f32.mxu1 %vm130_vm0, %v1492_v58 }
 0x2e2   :  { %v1500_v50 = vpop.trf.xlu0  ;;  %v13519_v19 = vpop.trf.xlu1 }
 0x2e3   :  { %v11755_v5 = vpop.f32.mrb[134].mxu0  ;;  %12153 = vmatmul.mubr.msk.f32.gmra.mrb[40].mxu1 %vm130_vm0, %v1493_v63 }
 0x2e4   :  { %v4372_v48 = vpop.f32.mrb[135].mxu0  ;;  %12155 = vmatprep.mubr.msk.f32.mxu1 %vm130_vm0, %v1494_v35 }
 0x2e6   :  { %v1501_v51 = vpop.trf.xlu0  ;;  %v13523_v55 = vpop.trf.xlu1 }
 0x2e7   :  { %v11758_v24 = vpop.f32.mrb[136].mxu0  ;;  %12156 = vmatmul.mubr.msk.f32.gmra.mrb[42].mxu1 %vm130_vm0, %v1495_v33 }
 0x2e8   :  { %v4382_v18 = vpop.f32.mrb[137].mxu0  ;;  %12158 = vmatprep.mubr.msk.f32.mxu1 %vm130_vm0, %v1496_v9 }
 0x2ea   :  { %v1502_v59 = vpop.trf.xlu0  ;;  %v13527_v58 = vpop.trf.xlu1 }
 0x2eb   :  { %v11761_v23 = vpop.f32.mrb[138].mxu0  ;;  %12159 = vmatmul.mubr.msk.f32.gmra.mrb[44].mxu1 %vm130_vm0, %v1497_v49 }
 0x2ec   :  { %v4392_v53 = vpop.f32.mrb[139].mxu0  ;;  %12161 = vmatprep.mubr.msk.f32.mxu1 %vm130_vm0, %v1498_v47 }
 0x2ee   :  { %v1503_v63 = vpop.trf.xlu0  ;;  %v1534_v35 = vpop.trf.xlu1 }
 0x2ef   :  { %12162 = vmatmul.mubr.msk.f32.gmra.mrb[46].mxu1 %vm130_vm0, %v1499_v31  ;;  %v11764_v32 = vpop.f32.mrb[140].mxu0 }
 0x2f0   :  { %12164 = vmatprep.mubr.msk.f32.mxu1 %vm130_vm0, %v1500_v50  ;;  %v4402_v33 = vpop.f32.mrb[141].mxu0 }
 0x2f2   :  { %v1504_v5 = vpop.trf.xlu0  ;;  %v1535_v48 = vpop.trf.xlu1 }
 0x2f3   :  { %12165 = vmatmul.mubr.msk.f32.gmra.mrb[48].mxu1 %vm130_vm0, %v1501_v51  ;;  %v11767_v9 = vpop.f32.mrb[142].mxu0 }
 0x2f4   :  { %12167 = vmatprep.mubr.msk.f32.mxu1 %vm130_vm0, %v1502_v59  ;;  %v4412_v24 = vpop.f32.mrb[143].mxu0 }
 0x2f6   :  { %v1505_v49 = vpop.trf.xlu0  ;;  %v1536_v18 = vpop.trf.xlu1 }
 0x2f7   :  { %v11770_v23 = vpop.f32.mrb[144].mxu0  ;;  %12168 = vmatmul.mubr.msk.f32.gmra.mrb[50].mxu1 %vm130_vm0, %v1503_v63 }
 0x2f8   :  { %v13536_v47 = vpop.f32.mrb[145].mxu0  ;;  %12170 = vmatprep.mubr.msk.f32.mxu1 %vm130_vm0, %v1504_v5 }
 0x2fa   :  { %v1506_v31 = vpop.trf.xlu0  ;;  %v1537_v50 = vpop.trf.xlu1  ;;  %1668 = vxpose.xlu0.b32.start [1/2] (short) %v13231_v34, 128 }
 0x2fb   :  { %v11773_v53 = vpop.f32.mrb[146].mxu0  ;;  %12171 = vmatmul.mubr.msk.f32.gmra.mrb[52].mxu1 %vm130_vm0, %v1505_v49 }
 0x2fc   :  { %v4432_v51 = vpop.f32.mrb[147].mxu0  ;;  %12173 = vmatprep.mubr.msk.f32.mxu1 %vm130_vm0, %v1506_v31 }
 0x2fe   :  { %v1507_v59 = vpop.trf.xlu0  ;;  %v1538_v32 = vpop.trf.xlu1  ;;  %1669 = vxpose.xlu0.b32.end [2/2] (short) %v13228_v15, 128  ;;  %1700 = vxpose.xlu1.b32.start [1/2] (short) %v13238_v21, 128 }
 0x2ff   :  { %v11776_v63 = vpop.f32.mrb[148].mxu0  ;;  %12174 = vmatmul.mubr.msk.f32.gmra.mrb[54].mxu1 %vm130_vm0, %v1507_v59 }
 0x300   :  { %v4442_v33 = vpop.f32.mrb[149].mxu0  ;;  %12176 = vmatprep.mubr.msk.f32.mxu1 %vm130_vm0, %v13484_v7 }
 0x302   :  { %v1539_v34 = vpop.trf.xlu1  ;;  %v1556_v5 = vpop.trf.xlu0  ;;  %1701 = vxpose.xlu1.b32.end [2/2] (short) %v13233_v57, 128 }
 0x303   :  { %v11779_v9 = vpop.f32.mrb[150].mxu0  ;;  %12177 = vmatmul.mubr.msk.f32.gmra.mrb[56].mxu1 %vm130_vm0, %v13490_v3 }
 0x304   :  { %v4452_v24 = vpop.f32.mrb[151].mxu0  ;;  %12179 = vmatprep.mubr.msk.f32.mxu1 %vm130_vm0, %v13496_v30 }
 0x306   :  { %v1557_v15 = vpop.trf.xlu0  ;;  %v13552_v21 = vpop.trf.xlu1 }
 0x307   :  { %v11782_v49 = vpop.f32.mrb[152].mxu0  ;;  %12180 = vmatmul.mubr.msk.f32.gmra.mrb[58].mxu1 %vm130_vm0, %v13501_v29 }
 0x308   :  { %v4462_v7 = vpop.f32.mrb[153].mxu0  ;;  %12182 = vmatprep.mubr.msk.f32.mxu1 %vm130_vm0, %v13505_v14 }
 0x30a   :  { %v1558_v57 = vpop.trf.xlu0  ;;  %v13558_v23 = vpop.trf.xlu1 }
 0x30b   :  { %v11785_v31 = vpop.f32.mrb[154].mxu0  ;;  %12183 = vmatmul.mubr.msk.f32.gmra.mrb[60].mxu1 %vm130_vm0, %v13511_v61 }
 0x30c   :  { %v4472_v3 = vpop.f32.mrb[155].mxu0  ;;  %12185 = vmatprep.mubr.msk.f32.mxu1 %vm130_vm0, %v13515_v60 }
 0x30e   :  { %v1559_v30 = vpop.trf.xlu0  ;;  %v13564_v53 = vpop.trf.xlu1 }
 0x30f   :  { %v11788_v51 = vpop.f32.mrb[156].mxu0  ;;  %12186 = vmatmul.mubr.msk.f32.gmra.mrb[62].mxu1 %vm130_vm0, %v13519_v19 }
 0x310   :  { %v4482_v29 = vpop.f32.mrb[157].mxu0  ;;  %12188 = vmatprep.mubr.msk.f32.mxu1 %vm130_vm0, %v13523_v55 }
 0x312   :  { %v1560_v14 = vpop.trf.xlu0  ;;  %v13570_v59 = vpop.trf.xlu1 }
 0x313   :  { %v11791_v63 = vpop.f32.mrb[158].mxu0  ;;  %12189 = vmatmul.mubr.msk.f32.gmra.mrb[64].mxu1 %vm130_vm0, %v13527_v58 }
 0x314   :  { %v4492_v61 = vpop.f32.mrb[159].mxu0  ;;  %12191 = vmatprep.mubr.msk.f32.mxu1 %vm130_vm0, %v1534_v35 }
 0x316   :  { %v1561_v60 = vpop.trf.xlu0  ;;  %v13575_v33 = vpop.trf.xlu1 }
 0x317   :  { %v11794_v9 = vpop.f32.mrb[160].mxu0  ;;  %12192 = vmatmul.mubr.msk.f32.gmra.mrb[66].mxu1 %vm130_vm0, %v1535_v48 }
 0x318   :  { %v13578_v19 = vpop.f32.mrb[161].mxu0  ;;  %12194 = vmatprep.mubr.msk.f32.mxu1 %vm130_vm0, %v1536_v18 }
 0x31a   :  { %v1562_v55 = vpop.trf.xlu0  ;;  %v13581_v24 = vpop.trf.xlu1 }
 0x31b   :  { %v11797_v49 = vpop.f32.mrb[162].mxu0  ;;  %12195 = vmatmul.mubr.msk.f32.gmra.mrb[68].mxu1 %vm130_vm0, %v1537_v50 }
 0x31c   :  { %v4512_v58 = vpop.f32.mrb[163].mxu0  ;;  %12197 = vmatprep.mubr.msk.f32.mxu1 %vm130_vm0, %v1538_v32 }
 0x31e   :  { %v1563_v35 = vpop.trf.xlu0  ;;  %v13585_v7 = vpop.trf.xlu1 }
 0x31f   :  { %v11800_v31 = vpop.f32.mrb[164].mxu0  ;;  %12198 = vmatmul.mubr.msk.f32.gmra.mrb[70].mxu1 %vm130_vm0, %v1539_v34 }
 0x320   :  { %v4522_v48 = vpop.f32.mrb[165].mxu0  ;;  %12200 = vmatprep.mubr.msk.f32.mxu1 %vm130_vm0, %v1556_v5 }
 0x322   :  { %v1564_v3 = vpop.trf.xlu0  ;;  %v13589_v18 = vpop.trf.xlu1 }
 0x323   :  { %v11803_v51 = vpop.f32.mrb[166].mxu0  ;;  %12201 = vmatmul.mubr.msk.f32.gmra.mrb[72].mxu1 %vm130_vm0, %v1557_v15 }
 0x324   :  { %v4532_v29 = vpop.f32.mrb[167].mxu0  ;;  %12203 = vmatprep.mubr.msk.f32.mxu1 %vm130_vm0, %v1558_v57 }
 0x326   :  { %v1565_v50 = vpop.trf.xlu0  ;;  %v13593_v32 = vpop.trf.xlu1 }
 0x327   :  { %v11806_v63 = vpop.f32.mrb[168].mxu0  ;;  %12204 = vmatmul.mubr.msk.f32.gmra.mrb[74].mxu1 %vm130_vm0, %v1559_v30 }
 0x328   :  { %v4542_v61 = vpop.f32.mrb[169].mxu0  ;;  %12206 = vmatprep.mubr.msk.f32.mxu1 %vm130_vm0, %v1560_v14 }
 0x32a   :  { %v1566_v34 = vpop.trf.xlu0  ;;  %v13597_v5 = vpop.trf.xlu1 }
 0x32b   :  { %v11809_v9 = vpop.f32.mrb[170].mxu0  ;;  %12207 = vmatmul.mubr.msk.f32.gmra.mrb[76].mxu1 %vm130_vm0, %v1561_v60 }
 0x32c   :  { %v4552_v49 = vpop.f32.mrb[171].mxu0  ;;  %12209 = vmatprep.mubr.msk.f32.mxu1 %vm130_vm0, %v1562_v55 }
 0x32e   :  { %v1567_v15 = vpop.trf.xlu0  ;;  %v13601_v57 = vpop.trf.xlu1 }
 0x32f   :  { %12210 = vmatmul.mubr.msk.f32.gmra.mrb[78].mxu1 %vm130_vm0, %v1563_v35  ;;  %v11812_v58 = vpop.f32.mrb[172].mxu0 }
 0x330   :  { %12212 = vmatprep.mubr.msk.f32.mxu1 %vm130_vm0, %v1564_v3  ;;  %v4562_v30 = vpop.f32.mrb[173].mxu0 }
 0x332   :  { %v1568_v31 = vpop.trf.xlu0  ;;  %v13605_v14 = vpop.trf.xlu1 }
 0x333   :  { %12213 = vmatmul.mubr.msk.f32.gmra.mrb[80].mxu1 %vm130_vm0, %v1565_v50  ;;  %v11815_v48 = vpop.f32.mrb[174].mxu0 }
 0x334   :  { %12215 = vmatprep.mubr.msk.f32.mxu1 %vm130_vm0, %v1566_v34  ;;  %v4572_v60 = vpop.f32.mrb[175].mxu0 }
 0x336   :  { %v1569_v51 = vpop.trf.xlu0  ;;  %v1600_v55 = vpop.trf.xlu1 }
 0x337   :  { %v11818_v29 = vpop.f32.mrb[176].mxu0  ;;  %12216 = vmatmul.mubr.msk.f32.gmra.mrb[82].mxu1 %vm130_vm0, %v1567_v15 }
 0x338   :  { %v13610_v63 = vpop.f32.mrb[177].mxu0  ;;  %12218 = vmatprep.mubr.msk.f32.mxu1 %vm130_vm0, %v1568_v31 }
 0x33a   :  { %v1570_v35 = vpop.trf.xlu0  ;;  %v1601_v3 = vpop.trf.xlu1  ;;  %1732 = vxpose.xlu0.b32.start [1/2] (short) %v13243_v2, 128 }
 0x33b   :  { %v11821_v61 = vpop.f32.mrb[178].mxu0  ;;  %12219 = vmatmul.mubr.msk.f32.gmra.mrb[84].mxu1 %vm130_vm0, %v1569_v51 }
 0x33c   :  { %v4592_v50 = vpop.f32.mrb[179].mxu0  ;;  %12221 = vmatprep.mubr.msk.f32.mxu1 %vm130_vm0, %v1570_v35 }
 0x33e   :  { %v1571_v34 = vpop.trf.xlu0  ;;  %v1602_v9 = vpop.trf.xlu1  ;;  %1060 = vxpose.xlu1.b32.start [1/2] (short) %v13124_v37, 128  ;;  %1733 = vxpose.xlu0.b32.end [2/2] (short) %v13241_v56, 128 }
 0x33f   :  { %v11824_v49 = vpop.f32.mrb[180].mxu0  ;;  %12222 = vmatmul.mubr.msk.f32.gmra.mrb[86].mxu1 %vm130_vm0, %v1571_v34  ;;  %v12094_v15 = vpop.f32.mrb[0].mxu1 }
 0x340   :  { %v4602_v58 = vpop.f32.mrb[181].mxu0  ;;  %12224 = vmatprep.mubr.msk.f32.mxu1 %vm130_vm0, %v13552_v21  ;;  %v5502_v2 = vpop.f32.mrb[1].mxu1 }
 0x342   :  { %v1603_v30 = vpop.trf.xlu1  ;;  %v1620_v31 = vpop.trf.xlu0  ;;  %1061 = vxpose.xlu1.b32.end [2/2] (short) %v13122_v36, 128 }
 0x343   :  { %v11827_v48 = vpop.f32.mrb[182].mxu0  ;;  %12225 = vmatmul.mubr.msk.f32.gmra.mrb[88].mxu1 %vm130_vm0, %v13558_v23 }
 0x344   :  { %v4612_v37 = vpop.f32.mrb[183].mxu0  ;;  %12227 = vmatprep.mubr.msk.f32.mxu1 %vm130_vm0, %v13564_v53 }
 0x346   :  { %v1621_v56 = vpop.trf.xlu0  ;;  %v13626_v60 = vpop.trf.xlu1 }
 0x347   :  { %v11830_v51 = vpop.f32.mrb[184].mxu0  ;;  %12228 = vmatmul.mubr.msk.f32.gmra.mrb[90].mxu1 %vm130_vm0, %v13570_v59  ;;  %v12097_v21 = vpop.f32.mrb[2].mxu1 }
 0x348   :  { %v4622_v29 = vpop.f32.mrb[185].mxu0  ;;  %12230 = vmatprep.mubr.msk.f32.mxu1 %vm130_vm0, %v13575_v33  ;;  %v5512_v36 = vpop.f32.mrb[3].mxu1  ;;  %v13657_v51 = vmul.f32 %v13470_v62, %v13470_v62 }
 0x34a   :  { %v1622_v35 = vpop.trf.xlu0  ;;  %v13632_v61 = vpop.trf.xlu1 }
 0x34b   :  { %v11833_v23 = vpop.f32.mrb[186].mxu0  ;;  %12231 = vmatmul.mubr.msk.f32.gmra.mrb[92].mxu1 %vm130_vm0, %v13581_v24 }
 0x34c   :  { %v4632_v53 = vpop.f32.mrb[187].mxu0  ;;  %12233 = vmatprep.mubr.msk.f32.mxu1 %vm130_vm0, %v13585_v7 }
 0x34e   :  { %v1623_v50 = vpop.trf.xlu0  ;;  %v13638_v34 = vpop.trf.xlu1 }
 0x34f   :  { %v11836_v59 = vpop.f32.mrb[188].mxu0  ;;  %12234 = vmatmul.mubr.msk.f32.gmra.mrb[94].mxu1 %vm130_vm0, %v13589_v18  ;;  %v12100_v33 = vpop.f32.mrb[4].mxu1 }
 0x350   :  { %v4642_v49 = vpop.f32.mrb[189].mxu0  ;;  %12236 = vmatprep.mubr.msk.f32.mxu1 %vm130_vm0, %v13593_v32  ;;  %v5522_v15 = vpop.f32.mrb[5].mxu1 }
 0x352   :  { %v1624_v58 = vpop.trf.xlu0  ;;  %v13644_v2 = vpop.trf.xlu1 }
 0x353   :  { %v11839_v24 = vpop.f32.mrb[190].mxu0  ;;  %12237 = vmatmul.mubr.msk.f32.gmra.mrb[96].mxu1 %vm130_vm0, %v13597_v5 }
 0x354   :  { %v4652_v7 = vpop.f32.mrb[191].mxu0  ;;  %12239 = vmatprep.mubr.msk.f32.mxu1 %vm130_vm0, %v13601_v57 }
 0x356   :  { %v1625_v48 = vpop.trf.xlu0  ;;  %v13650_v37 = vpop.trf.xlu1 }
 0x357   :  { %12240 = vmatmul.mubr.msk.f32.gmra.mrb[98].mxu1 %vm130_vm0, %v13605_v14  ;;  %v12103_v18 = vpop.f32.mrb[6].mxu1 }
 0x358   :  { %v5532_v32 = vpop.f32.mrb[7].mxu1  ;;  %12242 = vmatprep.mubr.msk.f32.mxu1 %vm130_vm0, %v1600_v55 }
 0x35a   :  { %v12106_v21 = vpop.f32.mrb[8].mxu1  ;;  %v1626_v5 = vpop.trf.xlu0 }
 0x35b   :  { %v13659_v29 = vpop.trf.xlu1  ;;  %v13661_v36 = vpop.f32.mrb[9].mxu1  ;;  %12243 = vmatmul.mubr.msk.f32.gmra.mrb[100].mxu1 %vm130_vm0, %v1601_v3 }
 0x35c   :  { %v7717_v57 = vsub.f32 %v13661_v36, %v13657_v51  ;;  %12245 = vmatprep.mubr.msk.f32.mxu1 %vm130_vm0, %v1602_v9 }
 0x35e   :  { %v1627_v14 = vpop.trf.xlu0 }
 0x35f   :  { %v1658_v23 = vpop.trf.xlu1  ;;  %12246 = vmatmul.mubr.msk.f32.gmra.mrb[102].mxu1 %vm130_vm0, %v1603_v30 }
 0x360   :  { %12248 = vmatprep.mubr.msk.f32.mxu1 %vm130_vm0, %v1620_v31 }
 0x362   :  { %v12109_v55 = vpop.f32.mrb[10].mxu1  ;;  %v1628_v53 = vpop.trf.xlu0 }
 0x363   :  { %v1659_v59 = vpop.trf.xlu1  ;;  %v5552_v33 = vpop.f32.mrb[11].mxu1  ;;  %12249 = vmatmul.mubr.msk.f32.gmra.mrb[104].mxu1 %vm130_vm0, %v1621_v56 }
 0x364   :  { %12251 = vmatprep.mubr.msk.f32.mxu1 %vm130_vm0, %v1622_v35 }
 0x366   :  { %v1629_v3 = vpop.trf.xlu0 }
 0x367   :  { %v1660_v49 = vpop.trf.xlu1  ;;  %12252 = vmatmul.mubr.msk.f32.gmra.mrb[106].mxu1 %vm130_vm0, %v1623_v50 }
 0x368   :  { %12254 = vmatprep.mubr.msk.f32.mxu1 %vm130_vm0, %v1624_v58 }
 0x36a   :  { %v12112_v9 = vpop.f32.mrb[12].mxu1  ;;  %v1630_v15 = vpop.trf.xlu0 }
 0x36b   :  { %v1661_v24 = vpop.trf.xlu1  ;;  %v5562_v30 = vpop.f32.mrb[13].mxu1  ;;  %12255 = vmatmul.mubr.msk.f32.gmra.mrb[108].mxu1 %vm130_vm0, %v1625_v48 }
 0x36c   :  { %12257 = vmatprep.mubr.msk.f32.mxu1 %vm130_vm0, %v1626_v5 }
 0x36e   :  { %v1631_v31 = vpop.trf.xlu0 }
 0x36f   :  { %v1662_v7 = vpop.trf.xlu1  ;;  %12258 = vmatmul.mubr.msk.f32.gmra.mrb[110].mxu1 %vm130_vm0, %v1627_v14 }
 0x370   :  { %12260 = vmatprep.mubr.msk.f32.mxu1 %vm130_vm0, %v1628_v53 }
 0x372   :  { %v12115_v56 = vpop.f32.mrb[14].mxu1  ;;  %v1632_v35 = vpop.trf.xlu0 }
 0x373   :  { %v1663_v18 = vpop.trf.xlu1  ;;  %v5572_v50 = vpop.f32.mrb[15].mxu1  ;;  %12261 = vmatmul.mubr.msk.f32.gmra.mrb[112].mxu1 %vm130_vm0, %v1629_v3 }
 0x374   :  { %12263 = vmatprep.mubr.msk.f32.mxu1 %vm130_vm0, %v1630_v15 }
 0x376   :  { %v1633_v58 = vpop.trf.xlu0 }
 0x377   :  { %v1664_v32 = vpop.trf.xlu1  ;;  %12264 = vmatmul.mubr.msk.f32.gmra.mrb[114].mxu1 %vm130_vm0, %v1631_v31 }
 0x378   :  { %12266 = vmatprep.mubr.msk.f32.mxu1 %vm130_vm0, %v1632_v35 }
 0x37a   :  { %v12118_v48 = vpop.f32.mrb[16].mxu1  ;;  %v1634_v21 = vpop.trf.xlu0  ;;  %1764 = vxpose.xlu0.b32.start [1/2] (short) %v13251_v26, 128 }
 0x37b   :  { %v1665_v5 = vpop.trf.xlu1  ;;  %v5582_v14 = vpop.f32.mrb[17].mxu1  ;;  %12267 = vmatmul.mubr.msk.f32.gmra.mrb[116].mxu1 %vm130_vm0, %v1633_v58 }
 0x37c   :  { %12269 = vmatprep.mubr.msk.f32.mxu1 %vm130_vm0, %v1634_v21 }
 0x37e   :  { %v1635_v55 = vpop.trf.xlu0  ;;  %1765 = vxpose.xlu0.b32.end [2/2] (short) %v13248_v4, 128 }
 0x37f   :  { %v1666_v53 = vpop.trf.xlu1  ;;  %1092 = vxpose.xlu1.b32.start [1/2] (short) %v13128_v39, 128  ;;  %12270 = vmatmul.mubr.msk.f32.gmra.mrb[118].mxu1 %vm130_vm0, %v1635_v55 }
 0x380   :  { %12272 = vmatprep.mubr.msk.f32.mxu1 %vm130_vm0, %v13626_v60 }
 0x382   :  { %v12121_v33 = vpop.f32.mrb[18].mxu1  ;;  %v1684_v3 = vpop.trf.xlu0 }
 0x383   :  { %v1667_v26 = vpop.trf.xlu1  ;;  %1093 = vxpose.xlu1.b32.end [2/2] (short) %v13126_v38, 128  ;;  %v5592_v9 = vpop.f32.mrb[19].mxu1  ;;  %12273 = vmatmul.mubr.msk.f32.gmra.mrb[120].mxu1 %vm130_vm0, %v13632_v61 }
 0x384   :  { %12275 = vmatprep.mubr.msk.f32.mxu1 %vm130_vm0, %v13638_v34 }
 0x386   :  { %v1685_v4 = vpop.trf.xlu0 }
 0x387   :  { %v13694_v15 = vpop.trf.xlu1  ;;  %12276 = vmatmul.mubr.msk.f32.gmra.mrb[122].mxu1 %vm130_vm0, %v13644_v2 }
 0x388   :  { %12278 = vmatprep.mubr.msk.f32.mxu1 %vm130_vm0, %v13650_v37 }
 0x38a   :  { %v12124_v39 = vpop.f32.mrb[20].mxu1  ;;  %v1686_v60 = vpop.trf.xlu0 }
 0x38b   :  { %v13700_v30 = vpop.trf.xlu1  ;;  %v5602_v38 = vpop.f32.mrb[21].mxu1  ;;  %12279 = vmatmul.mubr.msk.f32.gmra.mrb[124].mxu1 %vm130_vm0, %v13659_v29  ;;  %v13715_v29 = vmul.f32 %v13508_v22, %v13508_v22 }
 0x38c   :  { %12281 = vmatprep.mubr.msk.f32.mxu1 %vm130_vm0, %v1658_v23 }
 0x38e   :  { %v1687_v61 = vpop.trf.xlu0 }
 0x38f   :  { %v13705_v34 = vpop.trf.xlu1  ;;  %12282 = vmatmul.mubr.msk.f32.gmra.mrb[126].mxu1 %vm130_vm0, %v1659_v59 }
 0x390   :  { %12284 = vmatprep.mubr.msk.f32.mxu1 %vm130_vm0, %v1660_v49 }
 0x392   :  { %v12127_v2 = vpop.f32.mrb[22].mxu1  ;;  %v1688_v31 = vpop.trf.xlu0 }
 0x393   :  { %v13709_v37 = vpop.trf.xlu1  ;;  %v5612_v56 = vpop.f32.mrb[23].mxu1  ;;  %12285 = vmatmul.mubr.msk.f32.gmra.mrb[128].mxu1 %vm130_vm0, %v1661_v24 }
 0x394   :  { %12287 = vmatprep.mubr.msk.f32.mxu1 %vm130_vm0, %v1662_v7 }
 0x396   :  { %v12130_v23 = vpop.f32.mrb[24].mxu1  ;;  %v1689_v35 = vpop.trf.xlu0 }
 0x397   :  { %v13717_v50 = vpop.trf.xlu1  ;;  %v13719_v59 = vpop.f32.mrb[25].mxu1  ;;  %12288 = vmatmul.mubr.msk.f32.gmra.mrb[130].mxu1 %vm130_vm0, %v1663_v18 }
 0x398   :  { %v7733_v49 = vsub.f32 %v13719_v59, %v13715_v29  ;;  %12290 = vmatprep.mubr.msk.f32.mxu1 %vm130_vm0, %v1664_v32 }
 0x39a   :  { %v12133_v24 = vpop.f32.mrb[26].mxu1  ;;  %v1690_v58 = vpop.trf.xlu0 }
 0x39b   :  { %v13725_v7 = vpop.trf.xlu1  ;;  %v5632_v48 = vpop.f32.mrb[27].mxu1  ;;  %12291 = vmatmul.mubr.msk.f32.gmra.mrb[132].mxu1 %vm130_vm0, %v1665_v5 }
 0x39c   :  { %12293 = vmatprep.mubr.msk.f32.mxu1 %vm130_vm0, %v1666_v53 }
 0x39e   :  { %v12136_v21 = vpop.f32.mrb[28].mxu1  ;;  %v1691_v14 = vpop.trf.xlu0 }
 0x39f   :  { %v13729_v55 = vpop.trf.xlu1  ;;  %v5642_v33 = vpop.f32.mrb[29].mxu1  ;;  %12294 = vmatmul.mubr.msk.f32.gmra.mrb[134].mxu1 %vm130_vm0, %v1667_v26 }
 0x3a0   :  { %12296 = vmatprep.mubr.msk.f32.mxu1 %vm130_vm0, %v1684_v3 }
 0x3a2   :  { %v12139_v18 = vpop.f32.mrb[30].mxu1  ;;  %v1692_v32 = vpop.trf.xlu0 }
 0x3a3   :  { %v13733_v9 = vpop.trf.xlu1  ;;  %v5652_v39 = vpop.f32.mrb[31].mxu1  ;;  %12297 = vmatmul.mubr.msk.f32.gmra.mrb[136].mxu1 %vm130_vm0, %v1685_v4 }
 0x3a4   :  { %12299 = vmatprep.mubr.msk.f32.mxu1 %vm130_vm0, %v1686_v60 }
 0x3a6   :  { %v12142_v5 = vpop.f32.mrb[32].mxu1  ;;  %v1693_v53 = vpop.trf.xlu0 }
 0x3a7   :  { %v13737_v38 = vpop.trf.xlu1  ;;  %v5662_v2 = vpop.f32.mrb[33].mxu1  ;;  %12300 = vmatmul.mubr.msk.f32.gmra.mrb[138].mxu1 %vm130_vm0, %v1687_v61 }
 0x3a8   :  { %12302 = vmatprep.mubr.msk.f32.mxu1 %vm130_vm0, %v1688_v31 }
 0x3aa   :  { %v12145_v26 = vpop.f32.mrb[34].mxu1  ;;  %v1694_v3 = vpop.trf.xlu0 }
 0x3ab   :  { %v13741_v56 = vpop.trf.xlu1  ;;  %v5672_v23 = vpop.f32.mrb[35].mxu1  ;;  %12303 = vmatmul.mubr.msk.f32.gmra.mrb[140].mxu1 %vm130_vm0, %v1689_v35  ;;  %v13755_v35 = vmul.f32 %v13536_v47, %v13536_v47 }
 0x3ac   :  { %12305 = vmatprep.mubr.msk.f32.mxu1 %vm130_vm0, %v1690_v58 }
 0x3ae   :  { %v1695_v4 = vpop.trf.xlu0  ;;  %v12148_v60 = vpop.f32.mrb[36].mxu1 }
 0x3af   :  { %v13745_v24 = vpop.trf.xlu1  ;;  %12306 = vmatmul.mubr.msk.f32.gmra.mrb[142].mxu1 %vm130_vm0, %v1691_v14  ;;  %v5682_v48 = vpop.f32.mrb[37].mxu1 }
 0x3b0   :  { %12308 = vmatprep.mubr.msk.f32.mxu1 %vm130_vm0, %v1692_v32 }
 0x3b2   :  { %v1696_v61 = vpop.trf.xlu0  ;;  %v12151_v31 = vpop.f32.mrb[38].mxu1 }
 0x3b3   :  { %v13749_v21 = vpop.trf.xlu1  ;;  %12309 = vmatmul.mubr.msk.f32.gmra.mrb[144].mxu1 %vm130_vm0, %v1693_v53  ;;  %v5692_v33 = vpop.f32.mrb[39].mxu1 }
 0x3b4   :  { %12311 = vmatprep.mubr.msk.f32.mxu1 %vm130_vm0, %v1694_v3 }
 0x3b6   :  { %v12154_v58 = vpop.f32.mrb[40].mxu1  ;;  %v1697_v18 = vpop.trf.xlu0 }
 0x3b7   :  { %v1728_v39 = vpop.trf.xlu1  ;;  %v13757_v14 = vpop.f32.mrb[41].mxu1  ;;  %12312 = vmatmul.mubr.msk.f32.gmra.mrb[146].mxu1 %vm130_vm0, %v1695_v4 }
 0x3b8   :  { %v7749_v32 = vsub.f32 %v13757_v14, %v13755_v35  ;;  %12314 = vmatprep.mubr.msk.f32.mxu1 %vm130_vm0, %v1696_v61 }
 0x3ba   :  { %v12157_v5 = vpop.f32.mrb[42].mxu1  ;;  %v1698_v53 = vpop.trf.xlu0  ;;  %1796 = vxpose.xlu0.b32.start [1/2] (short) %v13259_v8, 128 }
 0x3bb   :  { %v1729_v2 = vpop.trf.xlu1  ;;  %v5712_v26 = vpop.f32.mrb[43].mxu1  ;;  %12315 = vmatmul.mubr.msk.f32.gmra.mrb[148].mxu1 %vm130_vm0, %v1697_v18 }
 0x3bc   :  { %12317 = vmatprep.mubr.msk.f32.mxu1 %vm130_vm0, %v1698_v53 }
 0x3be   :  { %v12160_v3 = vpop.f32.mrb[44].mxu1  ;;  %v1699_v23 = vpop.trf.xlu0  ;;  %1797 = vxpose.xlu0.b32.end [2/2] (short) %v13253_v6, 128 }
 0x3bf   :  { %v1730_v4 = vpop.trf.xlu1  ;;  %1124 = vxpose.xlu1.b32.start [1/2] (short) %v13132_v41, 128  ;;  %v5722_v60 = vpop.f32.mrb[45].mxu1  ;;  %12318 = vmatmul.mubr.msk.f32.gmra.mrb[150].mxu1 %vm130_vm0, %v1699_v23 }
 0x3c0   :  { %12320 = vmatprep.mubr.msk.f32.mxu1 %vm130_vm0, %v13694_v15 }
 0x3c2   :  { %v12163_v8 = vpop.f32.mrb[46].mxu1  ;;  %v1748_v48 = vpop.trf.xlu0 }
 0x3c3   :  { %1125 = vxpose.xlu1.b32.end [2/2] (short) %v13130_v40, 128  ;;  %v1731_v61 = vpop.trf.xlu1  ;;  %v5732_v31 = vpop.f32.mrb[47].mxu1  ;;  %12321 = vmatmul.mubr.msk.f32.gmra.mrb[152].mxu1 %vm130_vm0, %v13700_v30 }
 0x3c4   :  { %12323 = vmatprep.mubr.msk.f32.mxu1 %vm130_vm0, %v13705_v34 }
 0x3c6   :  { %v12166_v6 = vpop.f32.mrb[48].mxu1  ;;  %v1749_v41 = vpop.trf.xlu0 }
 0x3c7   :  { %v1076_v33 = vpop.trf.xlu1  ;;  %v5742_v58 = vpop.f32.mrb[49].mxu1  ;;  %12324 = vmatmul.mubr.msk.f32.gmra.mrb[154].mxu1 %vm130_vm0, %v13709_v37 }
 0x3c8   :  { %12326 = vmatprep.mubr.msk.f32.mxu1 %vm130_vm0, %v13717_v50  ;;  %11840 = vmatprep.mubr.msk.f32.mxu0 %vm130_vm0, %v1076_v33 }
 0x3ca   :  { %v12169_v40 = vpop.f32.mrb[50].mxu1  ;;  %v1750_v15 = vpop.trf.xlu0 }
 0x3cb   :  { %v1077_v18 = vpop.trf.xlu1  ;;  %v5752_v5 = vpop.f32.mrb[51].mxu1  ;;  %12327 = vmatmul.mubr.msk.f32.gmra.mrb[156].mxu1 %vm130_vm0, %v13725_v7 }
 0x3cc   :  { %11841 = vmatmul.mubr.msk.f32.gmra.mrb[192].mxu0 %vm130_vm0, %v1077_v18  ;;  %12329 = vmatprep.mubr.msk.f32.mxu1 %vm130_vm0, %v13729_v55  ;;  %v13798_v55 = vmul.f32 %v13578_v19, %v13578_v19 }
 0x3ce   :  { %v12172_v30 = vpop.f32.mrb[52].mxu1  ;;  %v1751_v34 = vpop.trf.xlu0 }
 0x3cf   :  { %v1078_v37 = vpop.trf.xlu1  ;;  %v5762_v53 = vpop.f32.mrb[53].mxu1  ;;  %12330 = vmatmul.mubr.msk.f32.gmra.mrb[158].mxu1 %vm130_vm0, %v13733_v9 }
 0x3d0   :  { %12332 = vmatprep.mubr.msk.f32.mxu1 %vm130_vm0, %v13737_v38  ;;  %11843 = vmatprep.mubr.msk.f32.mxu0 %vm130_vm0, %v1078_v37 }
 0x3d2   :  { %v12175_v50 = vpop.f32.mrb[54].mxu1  ;;  %v1752_v26 = vpop.trf.xlu0 }
 0x3d3   :  { %v1079_v7 = vpop.trf.xlu1  ;;  %v5772_v3 = vpop.f32.mrb[55].mxu1  ;;  %12333 = vmatmul.mubr.msk.f32.gmra.mrb[160].mxu1 %vm130_vm0, %v13741_v56 }
 0x3d4   :  { %12335 = vmatprep.mubr.msk.f32.mxu1 %vm130_vm0, %v13745_v24  ;;  %11844 = vmatmul.mubr.msk.f32.gmra.mrb[194].mxu0 %vm130_vm0, %v1079_v7 }
 0x3d6   :  { %v12178_v9 = vpop.f32.mrb[56].mxu1  ;;  %v1753_v38 = vpop.trf.xlu0 }
 0x3d7   :  { %v1080_v23 = vpop.trf.xlu1  ;;  %v13800_v60 = vpop.f32.mrb[57].mxu1  ;;  %12336 = vmatmul.mubr.msk.f32.gmra.mrb[162].mxu1 %vm130_vm0, %v13749_v21 }
 0x3d8   :  { %v7765_v56 = vsub.f32 %v13800_v60, %v13798_v55  ;;  %12338 = vmatprep.mubr.msk.f32.mxu1 %vm130_vm0, %v1728_v39  ;;  %11846 = vmatprep.mubr.msk.f32.mxu0 %vm130_vm0, %v1080_v23 }
 0x3da   :  { %v12181_v24 = vpop.f32.mrb[58].mxu1  ;;  %v1754_v8 = vpop.trf.xlu0 }
 0x3db   :  { %v1081_v31 = vpop.trf.xlu1  ;;  %v5792_v6 = vpop.f32.mrb[59].mxu1  ;;  %12339 = vmatmul.mubr.msk.f32.gmra.mrb[164].mxu1 %vm130_vm0, %v1729_v2  ;;  %v13831_v24 = vmul.f32 %v13610_v63, %v13610_v63 }
 0x3dc   :  { %12341 = vmatprep.mubr.msk.f32.mxu1 %vm130_vm0, %v1730_v4  ;;  %11847 = vmatmul.mubr.msk.f32.gmra.mrb[196].mxu0 %vm130_vm0, %v1081_v31 }
 0x3de   :  { %v12184_v33 = vpop.f32.mrb[60].mxu1  ;;  %v1755_v58 = vpop.trf.xlu0 }
 0x3df   :  { %v1082_v21 = vpop.trf.xlu1  ;;  %v5802_v40 = vpop.f32.mrb[61].mxu1  ;;  %12342 = vmatmul.mubr.msk.f32.gmra.mrb[166].mxu1 %vm130_vm0, %v1731_v61 }
 0x3e0   :  { %12344 = vmatprep.mubr.msk.f32.mxu1 %vm130_vm0, %v1748_v48  ;;  %11849 = vmatprep.mubr.msk.f32.mxu0 %vm130_vm0, %v1082_v21 }
 0x3e2   :  { %v12187_v39 = vpop.f32.mrb[62].mxu1  ;;  %v1756_v18 = vpop.trf.xlu0 }
 0x3e3   :  { %v1083_v5 = vpop.trf.xlu1  ;;  %v5812_v30 = vpop.f32.mrb[63].mxu1  ;;  %12345 = vmatmul.mubr.msk.f32.gmra.mrb[168].mxu1 %vm130_vm0, %v1749_v41 }
 0x3e4   :  { %12347 = vmatprep.mubr.msk.f32.mxu1 %vm130_vm0, %v1750_v15  ;;  %11850 = vmatmul.mubr.msk.f32.gmra.mrb[198].mxu0 %vm130_vm0, %v1083_v5 }
 0x3e6   :  { %v12190_v2 = vpop.f32.mrb[64].mxu1  ;;  %v1757_v4 = vpop.trf.xlu0 }
 0x3e7   :  { %v1084_v37 = vpop.trf.xlu1  ;;  %v5822_v53 = vpop.f32.mrb[65].mxu1  ;;  %12348 = vmatmul.mubr.msk.f32.gmra.mrb[170].mxu1 %vm130_vm0, %v1751_v34 }
 0x3e8   :  { %12350 = vmatprep.mubr.msk.f32.mxu1 %vm130_vm0, %v1752_v26  ;;  %11852 = vmatprep.mubr.msk.f32.mxu0 %vm130_vm0, %v1084_v37 }
 0x3ea   :  { %v12193_v48 = vpop.f32.mrb[66].mxu1  ;;  %v1758_v61 = vpop.trf.xlu0 }
 0x3eb   :  { %v1085_v50 = vpop.trf.xlu1  ;;  %v5832_v7 = vpop.f32.mrb[67].mxu1  ;;  %12351 = vmatmul.mubr.msk.f32.gmra.mrb[172].mxu1 %vm130_vm0, %v1753_v38 }
 0x3ec   :  { %12353 = vmatprep.mubr.msk.f32.mxu1 %vm130_vm0, %v1754_v8  ;;  %11853 = vmatmul.mubr.msk.f32.gmra.mrb[200].mxu0 %vm130_vm0, %v1085_v50 }
 0x3ee   :  { %v1759_v41 = vpop.trf.xlu0  ;;  %v12196_v15 = vpop.f32.mrb[68].mxu1 }
 0x3ef   :  { %v1086_v3 = vpop.trf.xlu1  ;;  %12354 = vmatmul.mubr.msk.f32.gmra.mrb[174].mxu1 %vm130_vm0, %v1755_v58  ;;  %v5842_v34 = vpop.f32.mrb[69].mxu1 }
 0x3f0   :  { %12356 = vmatprep.mubr.msk.f32.mxu1 %vm130_vm0, %v1756_v18  ;;  %11855 = vmatprep.mubr.msk.f32.mxu0 %vm130_vm0, %v1086_v3 }
 0x3f2   :  { %v1760_v26 = vpop.trf.xlu0  ;;  %v12199_v9 = vpop.f32.mrb[70].mxu1 }
 0x3f3   :  { %v1087_v23 = vpop.trf.xlu1  ;;  %12357 = vmatmul.mubr.msk.f32.gmra.mrb[176].mxu1 %vm130_vm0, %v1757_v4  ;;  %v5852_v38 = vpop.f32.mrb[71].mxu1 }
 0x3f4   :  { %12359 = vmatprep.mubr.msk.f32.mxu1 %vm130_vm0, %v1758_v61  ;;  %11856 = vmatmul.mubr.msk.f32.gmra.mrb[202].mxu0 %vm130_vm0, %v1087_v23 }
 0x3f6   :  { %v12202_v8 = vpop.f32.mrb[72].mxu1  ;;  %v1761_v31 = vpop.trf.xlu0 }
 0x3f7   :  { %v1088_v6 = vpop.trf.xlu1  ;;  %v13833_v33 = vpop.f32.mrb[73].mxu1  ;;  %12360 = vmatmul.mubr.msk.f32.gmra.mrb[178].mxu1 %vm130_vm0, %v1759_v41 }
 0x3f8   :  { %v7781_v58 = vsub.f32 %v13833_v33, %v13831_v24  ;;  %12362 = vmatprep.mubr.msk.f32.mxu1 %vm130_vm0, %v1760_v26  ;;  %11858 = vmatprep.mubr.msk.f32.mxu0 %vm130_vm0, %v1088_v6 }
 0x3fa   :  { %v12205_v21 = vpop.f32.mrb[74].mxu1  ;;  %v1762_v40 = vpop.trf.xlu0  ;;  %1828 = vxpose.xlu0.b32.start [1/2] (short) %v13264_v10, 128 }
 0x3fb   :  { %v1089_v39 = vpop.trf.xlu1  ;;  %v5872_v18 = vpop.f32.mrb[75].mxu1  ;;  %12363 = vmatmul.mubr.msk.f32.gmra.mrb[180].mxu1 %vm130_vm0, %v1761_v31 }
 0x3fc   :  { %12365 = vmatprep.mubr.msk.f32.mxu1 %vm130_vm0, %v1762_v40  ;;  %11859 = vmatmul.mubr.msk.f32.gmra.mrb[204].mxu0 %vm130_vm0, %v1089_v39 }
 0x3fe   :  { %v12208_v5 = vpop.f32.mrb[76].mxu1  ;;  %v1763_v30 = vpop.trf.xlu0  ;;  %1829 = vxpose.xlu0.b32.end [2/2] (short) %v13262_v54, 128 }
 0x3ff   :  { %v1090_v2 = vpop.trf.xlu1  ;;  %1156 = vxpose.xlu1.b32.start [1/2] (short) %v13136_v43, 128  ;;  %v5882_v4 = vpop.f32.mrb[77].mxu1  ;;  %12366 = vmatmul.mubr.msk.f32.gmra.mrb[182].mxu1 %vm130_vm0, %v1763_v30 }
 0x400   :  { %11861 = vmatprep.mubr.msk.f32.mxu0 %vm130_vm0, %v1090_v2 }
 0x402   :  { %v12211_v10 = vpop.f32.mrb[78].mxu1  ;;  %v1780_v37 = vpop.trf.xlu0 }
 0x403   :  { %1157 = vxpose.xlu1.b32.end [2/2] (short) %v13134_v42, 128  ;;  %v1091_v53 = vpop.trf.xlu1  ;;  %v5892_v48 = vpop.f32.mrb[79].mxu1  ;;  %12368 = vmatprep.mubr.msk.f32.mxu1 %vm130_vm0, %v1780_v37 }
 0x404   :  { %11862 = vmatmul.mubr.msk.f32.gmra.mrb[206].mxu0 %vm130_vm0, %v1091_v53 }
 0x406   :  { %v12214_v61 = vpop.f32.mrb[80].mxu1  ;;  %v1781_v54 = vpop.trf.xlu0 }
 0x407   :  { %v1108_v50 = vpop.trf.xlu1  ;;  %v5902_v7 = vpop.f32.mrb[81].mxu1  ;;  %12369 = vmatmul.mubr.msk.f32.gmra.mrb[184].mxu1 %vm130_vm0, %v1781_v54 }
 0x408   :  { %11864 = vmatprep.mubr.msk.f32.mxu0 %vm130_vm0, %v1108_v50 }
 0x40a   :  { %v12217_v43 = vpop.f32.mrb[82].mxu1  ;;  %v1782_v41 = vpop.trf.xlu0 }
 0x40b   :  { %v1109_v15 = vpop.trf.xlu1  ;;  %v5912_v3 = vpop.f32.mrb[83].mxu1  ;;  %12371 = vmatprep.mubr.msk.f32.mxu1 %vm130_vm0, %v1782_v41 }
 0x40c   :  { %11865 = vmatmul.mubr.msk.f32.gmra.mrb[208].mxu0 %vm130_vm0, %v1109_v15 }
 0x40e   :  { %v12220_v42 = vpop.f32.mrb[84].mxu1  ;;  %v1783_v34 = vpop.trf.xlu0 }
 0x40f   :  { %v1110_v26 = vpop.trf.xlu1  ;;  %v5922_v9 = vpop.f32.mrb[85].mxu1  ;;  %12372 = vmatmul.mubr.msk.f32.gmra.mrb[186].mxu1 %vm130_vm0, %v1783_v34 }
 0x410   :  { %11867 = vmatprep.mubr.msk.f32.mxu0 %vm130_vm0, %v1110_v26 }
 0x412   :  { %v12223_v23 = vpop.f32.mrb[86].mxu1  ;;  %v1784_v38 = vpop.trf.xlu0 }
 0x413   :  { %v1111_v8 = vpop.trf.xlu1  ;;  %v5932_v31 = vpop.f32.mrb[87].mxu1  ;;  %12374 = vmatprep.mubr.msk.f32.mxu1 %vm130_vm0, %v1784_v38 }
 0x414   :  { %11868 = vmatmul.mubr.msk.f32.gmra.mrb[210].mxu0 %vm130_vm0, %v1111_v8 }
 0x416   :  { %v12226_v6 = vpop.f32.mrb[88].mxu1  ;;  %v1785_v21 = vpop.trf.xlu0 }
 0x417   :  { %v1112_v40 = vpop.trf.xlu1  ;;  %v13859_v39 = vpop.f32.mrb[89].mxu1  ;;  %12375 = vmatmul.mubr.msk.f32.gmra.mrb[188].mxu1 %vm130_vm0, %v1785_v21 }
 0x418   :  { %11870 = vmatprep.mubr.msk.f32.mxu0 %vm130_vm0, %v1112_v40 }
 0x41a   :  { %v12229_v18 = vpop.f32.mrb[90].mxu1  ;;  %v1786_v5 = vpop.trf.xlu0 }
 0x41b   :  { %v1113_v30 = vpop.trf.xlu1  ;;  %v5952_v2 = vpop.f32.mrb[91].mxu1  ;;  %12377 = vmatprep.mubr.msk.f32.mxu1 %vm130_vm0, %v1786_v5 }
 0x41c   :  { %11871 = vmatmul.mubr.msk.f32.gmra.mrb[212].mxu0 %vm130_vm0, %v1113_v30 }
 0x41e   :  { %v12232_v4 = vpop.f32.mrb[92].mxu1  ;;  %v1787_v10 = vpop.trf.xlu0 }
 0x41f   :  { %v1114_v37 = vpop.trf.xlu1  ;;  %v5962_v53 = vpop.f32.mrb[93].mxu1  ;;  %12378 = vmatmul.mubr.msk.f32.gmra.mrb[190].mxu1 %vm130_vm0, %v1787_v10 }
 0x420   :  { %11873 = vmatprep.mubr.msk.f32.mxu0 %vm130_vm0, %v1114_v37 }
 0x422   :  { %v12235_v48 = vpop.f32.mrb[94].mxu1  ;;  %v1788_v61 = vpop.trf.xlu0 }
 0x423   :  { %v1115_v54 = vpop.trf.xlu1  ;;  %v5972_v50 = vpop.f32.mrb[95].mxu1  ;;  %12380 = vmatprep.mubr.msk.f32.mxu1 %vm130_vm0, %v1788_v61 }
 0x424   :  { %11874 = vmatmul.mubr.msk.f32.gmra.mrb[214].mxu0 %vm130_vm0, %v1115_v54 }
 0x426   :  { %v12238_v7 = vpop.f32.mrb[96].mxu1  ;;  %v1789_v43 = vpop.trf.xlu0 }
 0x427   :  { %v1116_v41 = vpop.trf.xlu1  ;;  %v5982_v15 = vpop.f32.mrb[97].mxu1  ;;  %12381 = vmatmul.mubr.msk.f32.gmra.mrb[192].mxu1 %vm130_vm0, %v1789_v43 }
 0x428   :  { %11876 = vmatprep.mubr.msk.f32.mxu0 %vm130_vm0, %v1116_v41 }
 0x42a   :  { %v12241_v3 = vpop.f32.mrb[98].mxu1  ;;  %v1790_v42 = vpop.trf.xlu0 }
 0x42b   :  { %v1117_v34 = vpop.trf.xlu1  ;;  %v5992_v26 = vpop.f32.mrb[99].mxu1  ;;  %12383 = vmatprep.mubr.msk.f32.mxu1 %vm130_vm0, %v1790_v42 }
 0x42c   :  { %11877 = vmatmul.mubr.msk.f32.gmra.mrb[216].mxu0 %vm130_vm0, %v1117_v34 }
 0x42e   :  { %v1791_v9 = vpop.trf.xlu0  ;;  %v12244_v23 = vpop.f32.mrb[100].mxu1 }
 0x42f   :  { %v1118_v38 = vpop.trf.xlu1  ;;  %12384 = vmatmul.mubr.msk.f32.gmra.mrb[194].mxu1 %vm130_vm0, %v1791_v9  ;;  %v6002_v8 = vpop.f32.mrb[101].mxu1 }
 0x430   :  { %11879 = vmatprep.mubr.msk.f32.mxu0 %vm130_vm0, %v1118_v38 }
 0x432   :  { %v1792_v31 = vpop.trf.xlu0  ;;  %v12247_v6 = vpop.f32.mrb[102].mxu1 }
 0x433   :  { %v1119_v21 = vpop.trf.xlu1  ;;  %12386 = vmatprep.mubr.msk.f32.mxu1 %vm130_vm0, %v1792_v31  ;;  %v6012_v40 = vpop.f32.mrb[103].mxu1 }
 0x434   :  { %11880 = vmatmul.mubr.msk.f32.gmra.mrb[218].mxu0 %vm130_vm0, %v1119_v21 }
 0x436   :  { %v12250_v18 = vpop.f32.mrb[104].mxu1  ;;  %v1793_v5 = vpop.trf.xlu0 }
 0x437   :  { %v1120_v30 = vpop.trf.xlu1  ;;  %v13877_v2 = vpop.f32.mrb[105].mxu1  ;;  %12387 = vmatmul.mubr.msk.f32.gmra.mrb[196].mxu1 %vm130_vm0, %v1793_v5 }
 0x438   :  { %11882 = vmatprep.mubr.msk.f32.mxu0 %vm130_vm0, %v1120_v30 }
 0x43a   :  { %v12253_v4 = vpop.f32.mrb[106].mxu1  ;;  %v1794_v10 = vpop.trf.xlu0  ;;  %1860 = vxpose.xlu0.b32.start [1/2] (short) %v13274_v16, 128 }
 0x43b   :  { %v1121_v37 = vpop.trf.xlu1  ;;  %v6032_v53 = vpop.f32.mrb[107].mxu1  ;;  %12389 = vmatprep.mubr.msk.f32.mxu1 %vm130_vm0, %v1794_v10 }
 0x43c   :  { %11883 = vmatmul.mubr.msk.f32.gmra.mrb[220].mxu0 %vm130_vm0, %v1121_v37 }
 0x43e   :  { %v12256_v48 = vpop.f32.mrb[108].mxu1  ;;  %v1795_v61 = vpop.trf.xlu0  ;;  %1861 = vxpose.xlu0.b32.end [2/2] (short) %v13270_v52, 128 }
 0x43f   :  { %v1122_v54 = vpop.trf.xlu1  ;;  %1188 = vxpose.xlu1.b32.start [1/2] (short) %v13140_v45, 128  ;;  %v6042_v50 = vpop.f32.mrb[109].mxu1  ;;  %12390 = vmatmul.mubr.msk.f32.gmra.mrb[198].mxu1 %vm130_vm0, %v1795_v61 }
 0x440   :  { %11885 = vmatprep.mubr.msk.f32.mxu0 %vm130_vm0, %v1122_v54 }
 0x442   :  { %v12259_v7 = vpop.f32.mrb[110].mxu1  ;;  %v1812_v16 = vpop.trf.xlu0 }
 0x443   :  { %1189 = vxpose.xlu1.b32.end [2/2] (short) %v13138_v44, 128  ;;  %v1123_v43 = vpop.trf.xlu1  ;;  %v6052_v41 = vpop.f32.mrb[111].mxu1  ;;  %12392 = vmatprep.mubr.msk.f32.mxu1 %vm130_vm0, %v1812_v16 }
 0x444   :  { %11886 = vmatmul.mubr.msk.f32.gmra.mrb[222].mxu0 %vm130_vm0, %v1123_v43 }
 0x446   :  { %v12262_v15 = vpop.f32.mrb[112].mxu1  ;;  %v1813_v52 = vpop.trf.xlu0 }
 0x447   :  { %v1140_v3 = vpop.trf.xlu1  ;;  %v6062_v42 = vpop.f32.mrb[113].mxu1  ;;  %12393 = vmatmul.mubr.msk.f32.gmra.mrb[200].mxu1 %vm130_vm0, %v1813_v52 }
 0x448   :  { %11888 = vmatprep.mubr.msk.f32.mxu0 %vm130_vm0, %v1140_v3 }
 0x44a   :  { %v12265_v45 = vpop.f32.mrb[114].mxu1  ;;  %v1814_v34 = vpop.trf.xlu0 }
 0x44b   :  { %v1141_v26 = vpop.trf.xlu1  ;;  %v6072_v9 = vpop.f32.mrb[115].mxu1  ;;  %12395 = vmatprep.mubr.msk.f32.mxu1 %vm130_vm0, %v1814_v34 }
 0x44c   :  { %11889 = vmatmul.mubr.msk.f32.gmra.mrb[224].mxu0 %vm130_vm0, %v1141_v26 }
 0x44e   :  { %v12268_v44 = vpop.f32.mrb[116].mxu1  ;;  %v1815_v23 = vpop.trf.xlu0 }
 0x44f   :  { %v1142_v38 = vpop.trf.xlu1  ;;  %v6082_v8 = vpop.f32.mrb[117].mxu1  ;;  %12396 = vmatmul.mubr.msk.f32.gmra.mrb[202].mxu1 %vm130_vm0, %v1815_v23 }
 0x450   :  { %11891 = vmatprep.mubr.msk.f32.mxu0 %vm130_vm0, %v1142_v38 }
 0x452   :  { %v12271_v31 = vpop.f32.mrb[118].mxu1  ;;  %v1816_v6 = vpop.trf.xlu0 }
 0x453   :  { %v1143_v21 = vpop.trf.xlu1  ;;  %v6092_v40 = vpop.f32.mrb[119].mxu1  ;;  %12398 = vmatprep.mubr.msk.f32.mxu1 %vm130_vm0, %v1816_v6 }
 0x454   :  { %11892 = vmatmul.mubr.msk.f32.gmra.mrb[226].mxu0 %vm130_vm0, %v1143_v21 }
 0x456   :  { %v12274_v18 = vpop.f32.mrb[120].mxu1  ;;  %v1817_v5 = vpop.trf.xlu0 }
 0x457   :  { %v1144_v30 = vpop.trf.xlu1  ;;  %v13899_v4 = vpop.f32.mrb[121].mxu1  ;;  %12399 = vmatmul.mubr.msk.f32.gmra.mrb[204].mxu1 %vm130_vm0, %v1817_v5 }
 0x458   :  { %11894 = vmatprep.mubr.msk.f32.mxu0 %vm130_vm0, %v1144_v30 }
 0x45a   :  { %v12277_v10 = vpop.f32.mrb[122].mxu1  ;;  %v1818_v37 = vpop.trf.xlu0 }
 0x45b   :  { %v1145_v53 = vpop.trf.xlu1  ;;  %v6112_v48 = vpop.f32.mrb[123].mxu1  ;;  %12401 = vmatprep.mubr.msk.f32.mxu1 %vm130_vm0, %v1818_v37 }
 0x45c   :  { %11895 = vmatmul.mubr.msk.f32.gmra.mrb[228].mxu0 %vm130_vm0, %v1145_v53 }
 0x45e   :  { %v12280_v61 = vpop.f32.mrb[124].mxu1  ;;  %v1819_v54 = vpop.trf.xlu0 }
 0x45f   :  { %v1146_v50 = vpop.trf.xlu1  ;;  %v6122_v7 = vpop.f32.mrb[125].mxu1  ;;  %12402 = vmatmul.mubr.msk.f32.gmra.mrb[206].mxu1 %vm130_vm0, %v1819_v54  ;;  %v14451_v61 = vld [vmem:[#allocation22_spill] sm:$0xff] }
 0x460   :  { %11897 = vmatprep.mubr.msk.f32.mxu0 %vm130_vm0, %v1146_v50 }
 0x462   :  { %v12283_v16 = vpop.f32.mrb[126].mxu1  ;;  %v1820_v43 = vpop.trf.xlu0 }
 0x463   :  { %v1147_v41 = vpop.trf.xlu1  ;;  %v6132_v15 = vpop.f32.mrb[127].mxu1  ;;  %12404 = vmatprep.mubr.msk.f32.mxu1 %vm130_vm0, %v1820_v43  ;;  %v14452_v43 = vld [vmem:[#allocation21_spill] sm:$0xff] }
 0x464   :  { %11898 = vmatmul.mubr.msk.f32.gmra.mrb[230].mxu0 %vm130_vm0, %v1147_v41  ;;  %v14453_v15 = vld [vmem:[#allocation12_spill] sm:$0xff] }
 0x466   :  { %v12286_v52 = vpop.f32.mrb[128].mxu1  ;;  %v1821_v3 = vpop.trf.xlu0 }
 0x467   :  { %v1148_v42 = vpop.trf.xlu1  ;;  %v6142_v45 = vpop.f32.mrb[129].mxu1  ;;  %12405 = vmatmul.mubr.msk.f32.gmra.mrb[208].mxu1 %vm130_vm0, %v1821_v3 }
 0x468   :  { %11900 = vmatprep.mubr.msk.f32.mxu0 %vm130_vm0, %v1148_v42  ;;  %v14454_v45 = vld [vmem:[#allocation11_spill] sm:$0xff] }
 0x46a   :  { %v12289_v34 = vpop.f32.mrb[130].mxu1  ;;  %v1822_v26 = vpop.trf.xlu0 }
 0x46b   :  { %v1149_v9 = vpop.trf.xlu1  ;;  %v6152_v44 = vpop.f32.mrb[131].mxu1  ;;  %12407 = vmatprep.mubr.msk.f32.mxu1 %vm130_vm0, %v1822_v26 }
 0x46c   :  { %11901 = vmatmul.mubr.msk.f32.gmra.mrb[232].mxu0 %vm130_vm0, %v1149_v9 }
 0x46e   :  { %v1823_v23 = vpop.trf.xlu0  ;;  %v12292_v38 = vpop.f32.mrb[132].mxu1 }
 0x46f   :  { %v1150_v8 = vpop.trf.xlu1  ;;  %12408 = vmatmul.mubr.msk.f32.gmra.mrb[210].mxu1 %vm130_vm0, %v1823_v23  ;;  %v6162_v31 = vpop.f32.mrb[133].mxu1 }
 0x470   :  { %11903 = vmatprep.mubr.msk.f32.mxu0 %vm130_vm0, %v1150_v8 }
 0x472   :  { %v1824_v6 = vpop.trf.xlu0  ;;  %v12295_v21 = vpop.f32.mrb[134].mxu1 }
 0x473   :  { %v1151_v40 = vpop.trf.xlu1  ;;  %12410 = vmatprep.mubr.msk.f32.mxu1 %vm130_vm0, %v1824_v6  ;;  %v6172_v18 = vpop.f32.mrb[135].mxu1 }
 0x474   :  { %11904 = vmatmul.mubr.msk.f32.gmra.mrb[234].mxu0 %vm130_vm0, %v1151_v40 }
 0x476   :  { %v12298_v5 = vpop.f32.mrb[136].mxu1  ;;  %v1825_v30 = vpop.trf.xlu0 }
 0x477   :  { %v1152_v10 = vpop.trf.xlu1  ;;  %v13917_v37 = vpop.f32.mrb[137].mxu1  ;;  %12411 = vmatmul.mubr.msk.f32.gmra.mrb[212].mxu1 %vm130_vm0, %v1825_v30 }
 0x478   :  { %11906 = vmatprep.mubr.msk.f32.mxu0 %vm130_vm0, %v1152_v10 }
 0x47a   :  { %v12301_v53 = vpop.f32.mrb[138].mxu1  ;;  %v1826_v48 = vpop.trf.xlu0  ;;  %1892 = vxpose.xlu0.b32.start [1/2] (short) %v14451_v61, 128 }
 0x47b   :  { %v1153_v54 = vpop.trf.xlu1  ;;  %v6192_v50 = vpop.f32.mrb[139].mxu1  ;;  %12413 = vmatprep.mubr.msk.f32.mxu1 %vm130_vm0, %v1826_v48 }
 0x47c   :  { %11907 = vmatmul.mubr.msk.f32.gmra.mrb[236].mxu0 %vm130_vm0, %v1153_v54 }
 0x47e   :  { %v12304_v7 = vpop.f32.mrb[140].mxu1  ;;  %v1827_v16 = vpop.trf.xlu0  ;;  %1893 = vxpose.xlu0.b32.end [2/2] (short) %v14452_v43, 128 }
 0x47f   :  { %v1154_v41 = vpop.trf.xlu1  ;;  %1220 = vxpose.xlu1.b32.start [1/2] (short) %v14453_v15, 128  ;;  %v6202_v52 = vpop.f32.mrb[141].mxu1  ;;  %12414 = vmatmul.mubr.msk.f32.gmra.mrb[214].mxu1 %vm130_vm0, %v1827_v16 }
 0x480   :  { %11909 = vmatprep.mubr.msk.f32.mxu0 %vm130_vm0, %v1154_v41 }
 0x482   :  { %v12307_v3 = vpop.f32.mrb[142].mxu1  ;;  %v1844_v42 = vpop.trf.xlu0 }
 0x483   :  { %1221 = vxpose.xlu1.b32.end [2/2] (short) %v14454_v45, 128  ;;  %v1155_v34 = vpop.trf.xlu1  ;;  %v6212_v26 = vpop.f32.mrb[143].mxu1  ;;  %12416 = vmatprep.mubr.msk.f32.mxu1 %vm130_vm0, %v1844_v42 }
 0x484   :  { %11910 = vmatmul.mubr.msk.f32.gmra.mrb[238].mxu0 %vm130_vm0, %v1155_v34 }
 0x486   :  { %v12310_v9 = vpop.f32.mrb[144].mxu1  ;;  %v1845_v44 = vpop.trf.xlu0 }
 0x487   :  { %v1172_v23 = vpop.trf.xlu1  ;;  %v6222_v38 = vpop.f32.mrb[145].mxu1  ;;  %12417 = vmatmul.mubr.msk.f32.gmra.mrb[216].mxu1 %vm130_vm0, %v1845_v44 }
 0x488   :  { %11912 = vmatprep.mubr.msk.f32.mxu0 %vm130_vm0, %v1172_v23 }
 0x48a   :  { %v12313_v8 = vpop.f32.mrb[146].mxu1  ;;  %v1846_v31 = vpop.trf.xlu0 }
 0x48b   :  { %v1173_v6 = vpop.trf.xlu1  ;;  %v6232_v21 = vpop.f32.mrb[147].mxu1  ;;  %12419 = vmatprep.mubr.msk.f32.mxu1 %vm130_vm0, %v1846_v31 }
 0x48c   :  { %11913 = vmatmul.mubr.msk.f32.gmra.mrb[240].mxu0 %vm130_vm0, %v1173_v6 }
 0x48e   :  { %v12316_v40 = vpop.f32.mrb[148].mxu1  ;;  %v1847_v18 = vpop.trf.xlu0 }
 0x48f   :  { %v1174_v5 = vpop.trf.xlu1  ;;  %v6242_v30 = vpop.f32.mrb[149].mxu1  ;;  %12420 = vmatmul.mubr.msk.f32.gmra.mrb[218].mxu1 %vm130_vm0, %v1847_v18 }
 0x490   :  { %11915 = vmatprep.mubr.msk.f32.mxu0 %vm130_vm0, %v1174_v5 }
 0x492   :  { %v12319_v10 = vpop.f32.mrb[150].mxu1  ;;  %v1848_v53 = vpop.trf.xlu0 }
 0x493   :  { %v1175_v48 = vpop.trf.xlu1  ;;  %v6252_v61 = vpop.f32.mrb[151].mxu1  ;;  %12422 = vmatprep.mubr.msk.f32.mxu1 %vm130_vm0, %v1848_v53 }
 0x494   :  { %11916 = vmatmul.mubr.msk.f32.gmra.mrb[242].mxu0 %vm130_vm0, %v1175_v48 }
 0x496   :  { %v12322_v54 = vpop.f32.mrb[152].mxu1  ;;  %v1849_v50 = vpop.trf.xlu0 }
 0x497   :  { %v1176_v7 = vpop.trf.xlu1  ;;  %v13939_v16 = vpop.f32.mrb[153].mxu1  ;;  %12423 = vmatmul.mubr.msk.f32.gmra.mrb[220].mxu1 %vm130_vm0, %v1849_v50 }
 0x498   :  { %11918 = vmatprep.mubr.msk.f32.mxu0 %vm130_vm0, %v1176_v7 }
 0x49a   :  { %v12325_v43 = vpop.f32.mrb[154].mxu1  ;;  %v1850_v41 = vpop.trf.xlu0 }
 0x49b   :  { %v1177_v15 = vpop.trf.xlu1  ;;  %v6272_v52 = vpop.f32.mrb[155].mxu1  ;;  %12425 = vmatprep.mubr.msk.f32.mxu1 %vm130_vm0, %v1850_v41 }
 0x49c   :  { %11919 = vmatmul.mubr.msk.f32.gmra.mrb[244].mxu0 %vm130_vm0, %v1177_v15 }
 0x49e   :  { %v12328_v3 = vpop.f32.mrb[156].mxu1  ;;  %v1851_v42 = vpop.trf.xlu0 }
 0x49f   :  { %v1178_v45 = vpop.trf.xlu1  ;;  %v11842_v34 = vpop.f32.mrb[192].mxu0  ;;  %12426 = vmatmul.mubr.msk.f32.gmra.mrb[222].mxu1 %vm130_vm0, %v1851_v42 }
 0x4a0   :  { %v13946_v26 = vpop.f32.mrb[193].mxu0  ;;  %v6282_v9 = vpop.f32.mrb[157].mxu1  ;;  %11921 = vmatprep.mubr.msk.f32.mxu0 %vm130_vm0, %v1178_v45 }
 0x4a1   :  { %v13951_v44 = vmul.f32 %v13946_v26, %v13946_v26 }
 0x4a2   :  { %v12331_v23 = vpop.f32.mrb[158].mxu1  ;;  %v1852_v38 = vpop.trf.xlu0 }
 0x4a3   :  { %v7797_v8 = vsub.f32 %v13859_v39, %v13951_v44  ;;  %v1179_v31 = vpop.trf.xlu1  ;;  %v6292_v6 = vpop.f32.mrb[159].mxu1  ;;  %12428 = vmatprep.mubr.msk.f32.mxu1 %vm130_vm0, %v1852_v38 }
 0x4a4   :  { %11922 = vmatmul.mubr.msk.f32.gmra.mrb[246].mxu0 %vm130_vm0, %v1179_v31 }
 0x4a6   :  { %v12334_v21 = vpop.f32.mrb[160].mxu1  ;;  %v1853_v40 = vpop.trf.xlu0 }
 0x4a7   :  { %v1180_v18 = vpop.trf.xlu1  ;;  %v6302_v5 = vpop.f32.mrb[161].mxu1  ;;  %12429 = vmatmul.mubr.msk.f32.gmra.mrb[224].mxu1 %vm130_vm0, %v1853_v40 }
 0x4a8   :  { %11924 = vmatprep.mubr.msk.f32.mxu0 %vm130_vm0, %v1180_v18  ;;  %v11845_v30 = vpop.f32.mrb[194].mxu0  ;;  %v14455_v5 = vld [vmem:[#allocation24_spill] sm:$0xff] }
 0x4a9   :  { %v4672_v10 = vpop.f32.mrb[195].mxu0 }
 0x4aa   :  { %v12337_v53 = vpop.f32.mrb[162].mxu1  ;;  %v1854_v48 = vpop.trf.xlu0 }
 0x4ab   :  { %v1181_v61 = vpop.trf.xlu1  ;;  %v6312_v54 = vpop.f32.mrb[163].mxu1  ;;  %12431 = vmatprep.mubr.msk.f32.mxu1 %vm130_vm0, %v1854_v48 }
 0x4ac   :  { %11925 = vmatmul.mubr.msk.f32.gmra.mrb[248].mxu0 %vm130_vm0, %v1181_v61  ;;  %v14456_v61 = vld [vmem:[#allocation23_spill] sm:$0xff] }
 0x4ae   :  { %v1855_v50 = vpop.trf.xlu0  ;;  %v12340_v7 = vpop.f32.mrb[164].mxu1 }
 0x4af   :  { %v1182_v43 = vpop.trf.xlu1  ;;  %12432 = vmatmul.mubr.msk.f32.gmra.mrb[226].mxu1 %vm130_vm0, %v1855_v50  ;;  %v6322_v41 = vpop.f32.mrb[165].mxu1  ;;  %v14457_v50 = vld [vmem:[#allocation14_spill] sm:$0xff] }
 0x4b0   :  { %11927 = vmatprep.mubr.msk.f32.mxu0 %vm130_vm0, %v1182_v43  ;;  %v11848_v15 = vpop.f32.mrb[196].mxu0 }
 0x4b1   :  { %v4682_v52 = vpop.f32.mrb[197].mxu0 }
 0x4b2   :  { %v1856_v3 = vpop.trf.xlu0  ;;  %v12343_v42 = vpop.f32.mrb[166].mxu1 }
 0x4b3   :  { %v1183_v45 = vpop.trf.xlu1  ;;  %12434 = vmatprep.mubr.msk.f32.mxu1 %vm130_vm0, %v1856_v3  ;;  %v6332_v34 = vpop.f32.mrb[167].mxu1  ;;  %v14458_v3 = vld [vmem:[#allocation13_spill] sm:$0xff] }
 0x4b4   :  { %11928 = vmatmul.mubr.msk.f32.gmra.mrb[250].mxu0 %vm130_vm0, %v1183_v45 }
 0x4b6   :  { %v12346_v9 = vpop.f32.mrb[168].mxu1  ;;  %v1857_v23 = vpop.trf.xlu0 }
 0x4b7   :  { %v1184_v38 = vpop.trf.xlu1  ;;  %v13965_v31 = vpop.f32.mrb[169].mxu1  ;;  %12435 = vmatmul.mubr.msk.f32.gmra.mrb[228].mxu1 %vm130_vm0, %v1857_v23 }
 0x4b8   :  { %11930 = vmatprep.mubr.msk.f32.mxu0 %vm130_vm0, %v1184_v38  ;;  %v11851_v6 = vpop.f32.mrb[198].mxu0 }
 0x4b9   :  { %v4692_v21 = vpop.f32.mrb[199].mxu0 }
 0x4ba   :  { %v12349_v40 = vpop.f32.mrb[170].mxu1  ;;  %v1858_v18 = vpop.trf.xlu0  ;;  %1924 = vxpose.xlu0.b32.start [1/2] (short) %v14455_v5, 128 }
 0x4bb   :  { %v1185_v30 = vpop.trf.xlu1  ;;  %v6352_v10 = vpop.f32.mrb[171].mxu1  ;;  %12437 = vmatprep.mubr.msk.f32.mxu1 %vm130_vm0, %v1858_v18 }
 0x4bc   :  { %11931 = vmatmul.mubr.msk.f32.gmra.mrb[252].mxu0 %vm130_vm0, %v1185_v30 }
 0x4be   :  { %v12352_v53 = vpop.f32.mrb[172].mxu1  ;;  %v1859_v48 = vpop.trf.xlu0  ;;  %1925 = vxpose.xlu0.b32.end [2/2] (short) %v14456_v61, 128 }
 0x4bf   :  { %v1186_v54 = vpop.trf.xlu1  ;;  %1252 = vxpose.xlu1.b32.start [1/2] (short) %v14457_v50, 128  ;;  %v6362_v7 = vpop.f32.mrb[173].mxu1  ;;  %12438 = vmatmul.mubr.msk.f32.gmra.mrb[230].mxu1 %vm130_vm0, %v1859_v48 }
 0x4c0   :  { %11933 = vmatprep.mubr.msk.f32.mxu0 %vm130_vm0, %v1186_v54  ;;  %v11854_v43 = vpop.f32.mrb[200].mxu0 }
 0x4c1   :  { %v4702_v41 = vpop.f32.mrb[201].mxu0 }
 0x4c2   :  { %v12355_v15 = vpop.f32.mrb[174].mxu1  ;;  %v1876_v52 = vpop.trf.xlu0 }
 0x4c3   :  { %1253 = vxpose.xlu1.b32.end [2/2] (short) %v14458_v3, 128  ;;  %v1187_v42 = vpop.trf.xlu1  ;;  %v6372_v45 = vpop.f32.mrb[175].mxu1  ;;  %12440 = vmatprep.mubr.msk.f32.mxu1 %vm130_vm0, %v1876_v52 }
 0x4c4   :  { %11934 = vmatmul.mubr.msk.f32.gmra.mrb[254].mxu0 %vm130_vm0, %v1187_v42 }
 0x4c6   :  { %v12358_v34 = vpop.f32.mrb[176].mxu1  ;;  %v1877_v9 = vpop.trf.xlu0 }
 0x4c7   :  { %v1204_v23 = vpop.trf.xlu1  ;;  %v6382_v38 = vpop.f32.mrb[177].mxu1  ;;  %12441 = vmatmul.mubr.msk.f32.gmra.mrb[232].mxu1 %vm130_vm0, %v1877_v9 }
 0x4c8   :  { %11936 = vmatprep.mubr.msk.f32.mxu0 %vm130_vm0, %v1204_v23  ;;  %v11857_v6 = vpop.f32.mrb[202].mxu0 }
 0x4c9   :  { %v4712_v21 = vpop.f32.mrb[203].mxu0 }
 0x4ca   :  { %v12361_v40 = vpop.f32.mrb[178].mxu1  ;;  %v1878_v18 = vpop.trf.xlu0 }
 0x4cb   :  { %v1205_v5 = vpop.trf.xlu1  ;;  %v6392_v30 = vpop.f32.mrb[179].mxu1  ;;  %12443 = vmatprep.mubr.msk.f32.mxu1 %vm130_vm0, %v1878_v18 }
 0x4cc   :  { %11937 = vmatmul.mubr.msk.f32.gmra.mrb[0].mxu0 %vm130_vm0, %v1205_v5 }
 0x4ce   :  { %v12364_v10 = vpop.f32.mrb[180].mxu1  ;;  %v1879_v53 = vpop.trf.xlu0 }
 0x4cf   :  { %v1206_v48 = vpop.trf.xlu1  ;;  %v6402_v61 = vpop.f32.mrb[181].mxu1  ;;  %12444 = vmatmul.mubr.msk.f32.gmra.mrb[234].mxu1 %vm130_vm0, %v1879_v53  ;;  %v14002_v10 = vmul.f32 %v13402_v17, %v13402_v17 }
 0x4d0   :  { %v11860_v54 = vpop.f32.mrb[204].mxu0  ;;  %11939 = vmatprep.mubr.msk.f32.mxu0 %vm130_vm0, %v1206_v48 }
 0x4d1   :  { %v4722_v50 = vpop.f32.mrb[205].mxu0 }
 0x4d2   :  { %v12367_v7 = vpop.f32.mrb[182].mxu1  ;;  %v1880_v43 = vpop.trf.xlu0 }
 0x4d3   :  { %v1207_v41 = vpop.trf.xlu1  ;;  %v6412_v15 = vpop.f32.mrb[183].mxu1  ;;  %12446 = vmatprep.mubr.msk.f32.mxu1 %vm130_vm0, %v1880_v43 }
 0x4d4   :  { %11940 = vmatmul.mubr.msk.f32.gmra.mrb[2].mxu0 %vm130_vm0, %v1207_v41 }
 0x4d6   :  { %v1881_v52 = vpop.trf.xlu0 }
 0x4d7   :  { %v1208_v3 = vpop.trf.xlu1  ;;  %12447 = vmatmul.mubr.msk.f32.gmra.mrb[236].mxu1 %vm130_vm0, %v1881_v52  ;;  %v11863_v42 = vpop.f32.mrb[206].mxu0 }
 0x4d8   :  { %v4732_v45 = vpop.f32.mrb[207].mxu0  ;;  %11942 = vmatprep.mubr.msk.f32.mxu0 %vm130_vm0, %v1208_v3 }
 0x4da   :  { %v12370_v34 = vpop.f32.mrb[184].mxu1  ;;  %v1882_v9 = vpop.trf.xlu0 }
 0x4db   :  { %v1209_v23 = vpop.trf.xlu1  ;;  %v13989_v38 = vpop.f32.mrb[185].mxu1  ;;  %12449 = vmatprep.mubr.msk.f32.mxu1 %vm130_vm0, %v1882_v9 }
 0x4dc   :  { %11943 = vmatmul.mubr.msk.f32.gmra.mrb[4].mxu0 %vm130_vm0, %v1209_v23 }
 0x4de   :  { %v1883_v6 = vpop.trf.xlu0 }
 0x4df   :  { %v1210_v21 = vpop.trf.xlu1  ;;  %v11866_v40 = vpop.f32.mrb[208].mxu0  ;;  %12450 = vmatmul.mubr.msk.f32.gmra.mrb[238].mxu1 %vm130_vm0, %v1883_v6 }
 0x4e0   :  { %v4742_v18 = vpop.f32.mrb[209].mxu0  ;;  %11945 = vmatprep.mubr.msk.f32.mxu0 %vm130_vm0, %v1210_v21 }
 0x4e1   :  { %v13995_v5 = vmul.f32 %v4742_v18, %v4742_v18  ;;  %v13998_v30 = vmul.f32 %v4742_v18, %v13402_v17 }
 0x4e2   :  { %v12373_v53 = vpop.f32.mrb[186].mxu1  ;;  %v1884_v48 = vpop.trf.xlu0 }
 0x4e3   :  { %v7813_v61 = vsub.f32 %v13877_v2, %v13995_v5  ;;  %v1211_v54 = vpop.trf.xlu1  ;;  %v6432_v50 = vpop.f32.mrb[187].mxu1  ;;  %12452 = vmatprep.mubr.msk.f32.mxu1 %vm130_vm0, %v1884_v48  ;;  %v14009_v7 = vadd.f32 %v13995_v5, %v14002_v10 }
 0x4e4   :  { %11946 = vmatmul.mubr.msk.f32.gmra.mrb[6].mxu0 %vm130_vm0, %v1211_v54 }
 0x4e6   :  { %v1885_v43 = vpop.trf.xlu0 }
 0x4e7   :  { %v1212_v41 = vpop.trf.xlu1  ;;  %12453 = vmatmul.mubr.msk.f32.gmra.mrb[240].mxu1 %vm130_vm0, %v1885_v43  ;;  %v11869_v17 = vpop.f32.mrb[210].mxu0 }
 0x4e8   :  { %11948 = vmatprep.mubr.msk.f32.mxu0 %vm130_vm0, %v1212_v41  ;;  %v4752_v15 = vpop.f32.mrb[211].mxu0 }
 0x4e9   :  { %v14459_v15 = vld [vmem:[#allocation26_spill] sm:$0xff] }
 0x4ea   :  { %v12376_v52 = vpop.f32.mrb[188].mxu1  ;;  %v1886_v3 = vpop.trf.xlu0 }
 0x4eb   :  { %v1213_v42 = vpop.trf.xlu1  ;;  %v6442_v45 = vpop.f32.mrb[189].mxu1  ;;  %12455 = vmatprep.mubr.msk.f32.mxu1 %vm130_vm0, %v1886_v3 }
 0x4ec   :  { %11949 = vmatmul.mubr.msk.f32.gmra.mrb[8].mxu0 %vm130_vm0, %v1213_v42  ;;  %v14460_v45 = vld [vmem:[#allocation25_spill] sm:$0xff] }
 0x4ee   :  { %v1887_v34 = vpop.trf.xlu0 }
 0x4ef   :  { %v1214_v9 = vpop.trf.xlu1  ;;  %12456 = vmatmul.mubr.msk.f32.gmra.mrb[242].mxu1 %vm130_vm0, %v1887_v34  ;;  %v11872_v23 = vpop.f32.mrb[212].mxu0 }
 0x4f0   :  { %11951 = vmatprep.mubr.msk.f32.mxu0 %vm130_vm0, %v1214_v9  ;;  %v4762_v6 = vpop.f32.mrb[213].mxu0  ;;  %v14461_v9 = vld [vmem:[#allocation16_spill] sm:$0xff] }
 0x4f2   :  { %v12379_v21 = vpop.f32.mrb[190].mxu1  ;;  %v1888_v40 = vpop.trf.xlu0 }
 0x4f3   :  { %v1215_v18 = vpop.trf.xlu1  ;;  %v6452_v53 = vpop.f32.mrb[191].mxu1  ;;  %12458 = vmatprep.mubr.msk.f32.mxu1 %vm130_vm0, %v1888_v40 }
 0x4f4   :  { %11952 = vmatmul.mubr.msk.f32.gmra.mrb[10].mxu0 %vm130_vm0, %v1215_v18  ;;  %v14462_v18 = vld [vmem:[#allocation15_spill] sm:$0xff] }
 0x4f6   :  { %v1889_v48 = vpop.trf.xlu0 }
 0x4f7   :  { %v1216_v54 = vpop.trf.xlu1  ;;  %12459 = vmatmul.mubr.msk.f32.gmra.mrb[244].mxu1 %vm130_vm0, %v1889_v48  ;;  %v11875_v50 = vpop.f32.mrb[214].mxu0 }
 0x4f8   :  { %11954 = vmatprep.mubr.msk.f32.mxu0 %vm130_vm0, %v1216_v54  ;;  %v4772_v43 = vpop.f32.mrb[215].mxu0 }
 0x4fa   :  { %v12382_v41 = vpop.f32.mrb[192].mxu1  ;;  %v1890_v17 = vpop.trf.xlu0  ;;  %1956 = vxpose.xlu0.b32.start [1/2] (short) %v14459_v15, 128 }
 0x4fb   :  { %v1217_v52 = vpop.trf.xlu1  ;;  %v6462_v3 = vpop.f32.mrb[193].mxu1  ;;  %12461 = vmatprep.mubr.msk.f32.mxu1 %vm130_vm0, %v1890_v17 }
 0x4fc   :  { %11955 = vmatmul.mubr.msk.f32.gmra.mrb[12].mxu0 %vm130_vm0, %v1217_v52 }
 0x4fe   :  { %v1891_v42 = vpop.trf.xlu0  ;;  %1957 = vxpose.xlu0.b32.end [2/2] (short) %v14460_v45, 128 }
 0x4ff   :  { %v1218_v34 = vpop.trf.xlu1  ;;  %1284 = vxpose.xlu1.b32.start [1/2] (short) %v14461_v9, 128  ;;  %12462 = vmatmul.mubr.msk.f32.gmra.mrb[246].mxu1 %vm130_vm0, %v1891_v42  ;;  %v11878_v23 = vpop.f32.mrb[216].mxu0 }
 0x500   :  { %11957 = vmatprep.mubr.msk.f32.mxu0 %vm130_vm0, %v1218_v34  ;;  %v4782_v6 = vpop.f32.mrb[217].mxu0 }
 0x502   :  { %v12385_v21 = vpop.f32.mrb[194].mxu1  ;;  %v1908_v40 = vpop.trf.xlu0 }
 0x503   :  { %1285 = vxpose.xlu1.b32.end [2/2] (short) %v14462_v18, 128  ;;  %v1219_v53 = vpop.trf.xlu1  ;;  %v6472_v48 = vpop.f32.mrb[195].mxu1  ;;  %12464 = vmatprep.mubr.msk.f32.mxu1 %vm130_vm0, %v1908_v40 }
 0x504   :  { %11958 = vmatmul.mubr.msk.f32.gmra.mrb[14].mxu0 %vm130_vm0, %v1219_v53 }
 0x506   :  { %v1909_v54 = vpop.trf.xlu0 }
 0x507   :  { %v1236_v50 = vpop.trf.xlu1  ;;  %12465 = vmatmul.mubr.msk.f32.gmra.mrb[248].mxu1 %vm130_vm0, %v1909_v54  ;;  %v11881_v43 = vpop.f32.mrb[218].mxu0 }
 0x508   :  { %11960 = vmatprep.mubr.msk.f32.mxu0 %vm130_vm0, %v1236_v50  ;;  %v4792_v41 = vpop.f32.mrb[219].mxu0 }
 0x50a   :  { %v12388_v17 = vpop.f32.mrb[196].mxu1  ;;  %v1910_v15 = vpop.trf.xlu0 }
 0x50b   :  { %v1237_v52 = vpop.trf.xlu1  ;;  %v6482_v3 = vpop.f32.mrb[197].mxu1  ;;  %12467 = vmatprep.mubr.msk.f32.mxu1 %vm130_vm0, %v1910_v15 }
 0x50c   :  { %11961 = vmatmul.mubr.msk.f32.gmra.mrb[16].mxu0 %vm130_vm0, %v1237_v52 }
 0x50e   :  { %v1911_v42 = vpop.trf.xlu0 }
 0x50f   :  { %v1238_v45 = vpop.trf.xlu1  ;;  %12468 = vmatmul.mubr.msk.f32.gmra.mrb[250].mxu1 %vm130_vm0, %v1911_v42  ;;  %v11884_v34 = vpop.f32.mrb[220].mxu0 }
 0x510   :  { %v4802_v9 = vpop.f32.mrb[221].mxu0  ;;  %11963 = vmatprep.mubr.msk.f32.mxu0 %vm130_vm0, %v1238_v45 }
 0x511   :  { %v14055_v9 = vmul.f32 %v13454_v1, %v13454_v1 }
 0x512   :  { %v12391_v23 = vpop.f32.mrb[198].mxu1  ;;  %v1912_v6 = vpop.trf.xlu0 }
 0x513   :  { %v1239_v21 = vpop.trf.xlu1  ;;  %v6492_v40 = vpop.f32.mrb[199].mxu1  ;;  %12470 = vmatprep.mubr.msk.f32.mxu1 %vm130_vm0, %v1912_v6 }
 0x514   :  { %11964 = vmatmul.mubr.msk.f32.gmra.mrb[18].mxu0 %vm130_vm0, %v1239_v21 }
 0x516   :  { %v1913_v18 = vpop.trf.xlu0 }
 0x517   :  { %v1240_v53 = vpop.trf.xlu1  ;;  %12471 = vmatmul.mubr.msk.f32.gmra.mrb[252].mxu1 %vm130_vm0, %v1913_v18  ;;  %v11887_v48 = vpop.f32.mrb[222].mxu0 }
 0x518   :  { %v4812_v54 = vpop.f32.mrb[223].mxu0  ;;  %11966 = vmatprep.mubr.msk.f32.mxu0 %vm130_vm0, %v1240_v53 }
 0x51a   :  { %v12394_v50 = vpop.f32.mrb[200].mxu1  ;;  %v1914_v43 = vpop.trf.xlu0 }
 0x51b   :  { %v1241_v41 = vpop.trf.xlu1  ;;  %v14042_v17 = vpop.f32.mrb[201].mxu1  ;;  %12473 = vmatprep.mubr.msk.f32.mxu1 %vm130_vm0, %v1914_v43 }
 0x51c   :  { %11967 = vmatmul.mubr.msk.f32.gmra.mrb[20].mxu0 %vm130_vm0, %v1241_v41 }
 0x51e   :  { %v1915_v15 = vpop.trf.xlu0 }
 0x51f   :  { %v1242_v52 = vpop.trf.xlu1  ;;  %v11890_v3 = vpop.f32.mrb[224].mxu0  ;;  %12474 = vmatmul.mubr.msk.f32.gmra.mrb[254].mxu1 %vm130_vm0, %v1915_v15 }
 0x520   :  { %v4822_v42 = vpop.f32.mrb[225].mxu0  ;;  %11969 = vmatprep.mubr.msk.f32.mxu0 %vm130_vm0, %v1242_v52 }
 0x521   :  { %v14048_v45 = vmul.f32 %v4822_v42, %v4822_v42  ;;  %v14051_v34 = vmul.f32 %v4822_v42, %v13454_v1 }
 0x522   :  { %v12397_v23 = vpop.f32.mrb[202].mxu1  ;;  %v1916_v6 = vpop.trf.xlu0 }
 0x523   :  { %v7829_v21 = vsub.f32 %v13899_v4, %v14048_v45  ;;  %v1243_v40 = vpop.trf.xlu1  ;;  %v6512_v18 = vpop.f32.mrb[203].mxu1  ;;  %12476 = vmatprep.mubr.msk.f32.mxu1 %vm130_vm0, %v1916_v6  ;;  %v14062_v53 = vadd.f32 %v14048_v45, %v14055_v9 }
 0x524   :  { %11970 = vmatmul.mubr.msk.f32.gmra.mrb[22].mxu0 %vm130_vm0, %v1243_v40 }
 0x526   :  { %v1917_v48 = vpop.trf.xlu0 }
 0x527   :  { %v1244_v54 = vpop.trf.xlu1  ;;  %12477 = vmatmul.mubr.msk.f32.gmra.mrb[0].mxu1 %vm130_vm0, %v1917_v48  ;;  %v11893_v1 = vpop.f32.mrb[226].mxu0 }
 0x528   :  { %11972 = vmatprep.mubr.msk.f32.mxu0 %vm130_vm0, %v1244_v54  ;;  %v4832_v50 = vpop.f32.mrb[227].mxu0 }
 0x52a   :  { %v12400_v43 = vpop.f32.mrb[204].mxu1  ;;  %v1918_v41 = vpop.trf.xlu0 }
 0x52b   :  { %v1245_v15 = vpop.trf.xlu1  ;;  %v6522_v52 = vpop.f32.mrb[205].mxu1  ;;  %12479 = vmatprep.mubr.msk.f32.mxu1 %vm130_vm0, %v1918_v41 }
 0x52c   :  { %11973 = vmatmul.mubr.msk.f32.gmra.mrb[24].mxu0 %vm130_vm0, %v1245_v15 }
 0x52e   :  { %v1919_v3 = vpop.trf.xlu0 }
 0x52f   :  { %v1246_v42 = vpop.trf.xlu1  ;;  %12480 = vmatmul.mubr.msk.f32.gmra.mrb[2].mxu1 %vm130_vm0, %v1919_v3  ;;  %v11896_v23 = vpop.f32.mrb[228].mxu0  ;;  %v14463_v3 = vld [vmem:[#allocation28_spill] sm:$0xff] }
 0x530   :  { %11975 = vmatprep.mubr.msk.f32.mxu0 %vm130_vm0, %v1246_v42  ;;  %v4842_v6 = vpop.f32.mrb[229].mxu0 }
 0x532   :  { %v12403_v40 = vpop.f32.mrb[206].mxu1  ;;  %v1920_v18 = vpop.trf.xlu0 }
 0x533   :  { %v1247_v48 = vpop.trf.xlu1  ;;  %v6532_v54 = vpop.f32.mrb[207].mxu1  ;;  %12482 = vmatprep.mubr.msk.f32.mxu1 %vm130_vm0, %v1920_v18  ;;  %v14464_v40 = vld [vmem:[#allocation27_spill] sm:$0xff] }
 0x534   :  { %11976 = vmatmul.mubr.msk.f32.gmra.mrb[26].mxu0 %vm130_vm0, %v1247_v48  ;;  %v14465_v48 = vld [vmem:[#allocation18_spill] sm:$0xff] }
 0x536   :  { %v1921_v1 = vpop.trf.xlu0 }
 0x537   :  { %v1248_v50 = vpop.trf.xlu1  ;;  %12483 = vmatmul.mubr.msk.f32.gmra.mrb[4].mxu1 %vm130_vm0, %v1921_v1  ;;  %v11899_v43 = vpop.f32.mrb[230].mxu0 }
 0x538   :  { %11978 = vmatprep.mubr.msk.f32.mxu0 %vm130_vm0, %v1248_v50  ;;  %v4852_v41 = vpop.f32.mrb[231].mxu0 }
 0x539   :  { %v14466_v41 = vld [vmem:[#allocation17_spill] sm:$0xff] }
 0x53a   :  { %v12406_v15 = vpop.f32.mrb[208].mxu1  ;;  %v1922_v52 = vpop.trf.xlu0  ;;  %1988 = vxpose.xlu0.b32.start [1/2] (short) %v14463_v3, 128 }
 0x53b   :  { %v1249_v42 = vpop.trf.xlu1  ;;  %v6542_v23 = vpop.f32.mrb[209].mxu1  ;;  %12485 = vmatprep.mubr.msk.f32.mxu1 %vm130_vm0, %v1922_v52 }
 0x53c   :  { %11979 = vmatmul.mubr.msk.f32.gmra.mrb[28].mxu0 %vm130_vm0, %v1249_v42 }
 0x53e   :  { %v1923_v6 = vpop.trf.xlu0  ;;  %1989 = vxpose.xlu0.b32.end [2/2] (short) %v14464_v40, 128 }
 0x53f   :  { %v1250_v18 = vpop.trf.xlu1  ;;  %1316 = vxpose.xlu1.b32.start [1/2] (short) %v14465_v48, 128  ;;  %12486 = vmatmul.mubr.msk.f32.gmra.mrb[6].mxu1 %vm130_vm0, %v1923_v6  ;;  %v11902_v54 = vpop.f32.mrb[232].mxu0 }
 0x540   :  { %11981 = vmatprep.mubr.msk.f32.mxu0 %vm130_vm0, %v1250_v18  ;;  %v4862_v1 = vpop.f32.mrb[233].mxu0 }
 0x542   :  { %v12409_v50 = vpop.f32.mrb[210].mxu1  ;;  %v1940_v43 = vpop.trf.xlu0 }
 0x543   :  { %1317 = vxpose.xlu1.b32.end [2/2] (short) %v14466_v41, 128  ;;  %v1251_v15 = vpop.trf.xlu1  ;;  %v6552_v52 = vpop.f32.mrb[211].mxu1  ;;  %12488 = vmatprep.mubr.msk.f32.mxu1 %vm130_vm0, %v1940_v43 }
 0x544   :  { %11982 = vmatmul.mubr.msk.f32.gmra.mrb[30].mxu0 %vm130_vm0, %v1251_v15 }
 0x546   :  { %v1941_v3 = vpop.trf.xlu0 }
 0x547   :  { %v1268_v42 = vpop.trf.xlu1  ;;  %12489 = vmatmul.mubr.msk.f32.gmra.mrb[8].mxu1 %vm130_vm0, %v1941_v3  ;;  %v11905_v23 = vpop.f32.mrb[234].mxu0 }
 0x548   :  { %11984 = vmatprep.mubr.msk.f32.mxu0 %vm130_vm0, %v1268_v42  ;;  %v4872_v6 = vpop.f32.mrb[235].mxu0 }
 0x54a   :  { %v12412_v40 = vpop.f32.mrb[212].mxu1  ;;  %v1942_v18 = vpop.trf.xlu0 }
 0x54b   :  { %v1269_v48 = vpop.trf.xlu1  ;;  %v6562_v54 = vpop.f32.mrb[213].mxu1  ;;  %12491 = vmatprep.mubr.msk.f32.mxu1 %vm130_vm0, %v1942_v18 }
 0x54c   :  { %11985 = vmatmul.mubr.msk.f32.gmra.mrb[32].mxu0 %vm130_vm0, %v1269_v48 }
 0x54e   :  { %v1943_v1 = vpop.trf.xlu0 }
 0x54f   :  { %v1270_v50 = vpop.trf.xlu1  ;;  %12492 = vmatmul.mubr.msk.f32.gmra.mrb[10].mxu1 %vm130_vm0, %v1943_v1  ;;  %v11908_v43 = vpop.f32.mrb[236].mxu0 }
 0x550   :  { %v4882_v41 = vpop.f32.mrb[237].mxu0  ;;  %11987 = vmatprep.mubr.msk.f32.mxu0 %vm130_vm0, %v1270_v50 }
 0x552   :  { %v12415_v15 = vpop.f32.mrb[214].mxu1  ;;  %v1944_v52 = vpop.trf.xlu0 }
 0x553   :  { %v1271_v3 = vpop.trf.xlu1  ;;  %v6572_v42 = vpop.f32.mrb[215].mxu1  ;;  %12494 = vmatprep.mubr.msk.f32.mxu1 %vm130_vm0, %v1944_v52 }
 0x554   :  { %11988 = vmatmul.mubr.msk.f32.gmra.mrb[34].mxu0 %vm130_vm0, %v1271_v3 }
 0x556   :  { %v1945_v23 = vpop.trf.xlu0 }
 0x557   :  { %v1272_v6 = vpop.trf.xlu1  ;;  %12495 = vmatmul.mubr.msk.f32.gmra.mrb[12].mxu1 %vm130_vm0, %v1945_v23  ;;  %v11911_v40 = vpop.f32.mrb[238].mxu0 }
 0x558   :  { %v4892_v18 = vpop.f32.mrb[239].mxu0  ;;  %11990 = vmatprep.mubr.msk.f32.mxu0 %vm130_vm0, %v1272_v6 }
 0x55a   :  { %v12418_v48 = vpop.f32.mrb[216].mxu1  ;;  %v1946_v54 = vpop.trf.xlu0 }
 0x55b   :  { %v1273_v1 = vpop.trf.xlu1  ;;  %v14095_v50 = vpop.f32.mrb[217].mxu1  ;;  %12497 = vmatprep.mubr.msk.f32.mxu1 %vm130_vm0, %v1946_v54 }
 0x55c   :  { %11991 = vmatmul.mubr.msk.f32.gmra.mrb[36].mxu0 %vm130_vm0, %v1273_v1 }
 0x55e   :  { %v1947_v43 = vpop.trf.xlu0 }
 0x55f   :  { %v1274_v41 = vpop.trf.xlu1  ;;  %v11914_v15 = vpop.f32.mrb[240].mxu0  ;;  %12498 = vmatmul.mubr.msk.f32.gmra.mrb[14].mxu1 %vm130_vm0, %v1947_v43 }
 0x560   :  { %v4902_v52 = vpop.f32.mrb[241].mxu0  ;;  %11993 = vmatprep.mubr.msk.f32.mxu0 %vm130_vm0, %v1274_v41 }
 0x561   :  { %v7461_v3 = vmul.f32 %v4902_v52, %v4902_v52  ;;  %v14102_v42 = vmul.f32 %v4902_v52, %v13470_v62 }
 0x562   :  { %v12421_v23 = vpop.f32.mrb[218].mxu1  ;;  %v1948_v6 = vpop.trf.xlu0 }
 0x563   :  { %v7845_v40 = vsub.f32 %v13917_v37, %v7461_v3  ;;  %v8741_v18 = vadd.f32 %v7461_v3, %v13657_v51  ;;  %v1275_v48 = vpop.trf.xlu1  ;;  %v6592_v54 = vpop.f32.mrb[219].mxu1  ;;  %12500 = vmatprep.mubr.msk.f32.mxu1 %vm130_vm0, %v1948_v6 }
 0x564   :  { %11994 = vmatmul.mubr.msk.f32.gmra.mrb[38].mxu0 %vm130_vm0, %v1275_v48 }
 0x565   :  { %v8997_v1 = vadd.f32 %v7845_v40, %v7717_v57  ;;  %v8869_v41 = vadd.f32 0.0001, %v8741_v18 }
 0x566   :  { %v1949_v43 = vpop.trf.xlu0 }
 0x567   :  { %v9125_v62 = vadd.f32 0.0009, %v8997_v1  ;;  %v1276_v15 = vpop.trf.xlu1  ;;  %12501 = vmatmul.mubr.msk.f32.gmra.mrb[16].mxu1 %vm130_vm0, %v1949_v43  ;;  %v11917_v52 = vpop.f32.mrb[242].mxu0 }
 0x568   :  { %11996 = vmatprep.mubr.msk.f32.mxu0 %vm130_vm0, %v1276_v15  ;;  %v4912_v37 = vpop.f32.mrb[243].mxu0 }
 0x569   :  { %v14113_v3 = vmul.f32 %v9125_v62, %v8869_v41 }
 0x56a   :  { %v12424_v23 = vpop.f32.mrb[220].mxu1  ;;  %v1950_v6 = vpop.trf.xlu0 }
 0x56b   :  { %v1277_v54 = vpop.trf.xlu1  ;;  %v6602_v48 = vpop.f32.mrb[221].mxu1  ;;  %12503 = vmatprep.mubr.msk.f32.mxu1 %vm130_vm0, %v1950_v6  ;;  %12650 = vrcp.f32 %v14113_v3 }
 0x56c   :  { %11997 = vmatmul.mubr.msk.f32.gmra.mrb[40].mxu0 %vm130_vm0, %v1277_v54  ;;  %v14467_v54 = vld [vmem:[#allocation30_spill] sm:$0xff] }
 0x56e   :  { %v1951_v51 = vpop.trf.xlu0 }
 0x56f   :  { %v1278_v36 = vpop.trf.xlu1  ;;  %12504 = vmatmul.mubr.msk.f32.gmra.mrb[18].mxu1 %vm130_vm0, %v1951_v51  ;;  %v11920_v57 = vpop.f32.mrb[244].mxu0 }
 0x570   :  { %11999 = vmatprep.mubr.msk.f32.mxu0 %vm130_vm0, %v1278_v36  ;;  %v4922_v40 = vpop.f32.mrb[245].mxu0  ;;  %v14468_v57 = vld [vmem:[#allocation29_spill] sm:$0xff] }
 0x572   :  { %v12427_v18 = vpop.f32.mrb[222].mxu1  ;;  %v1952_v1 = vpop.trf.xlu0 }
 0x573   :  { %v1279_v43 = vpop.trf.xlu1  ;;  %v6612_v41 = vpop.f32.mrb[223].mxu1  ;;  %12506 = vmatprep.mubr.msk.f32.mxu1 %vm130_vm0, %v1952_v1  ;;  %v14469_v18 = vld [vmem:[#allocation20_spill] sm:$0xff] }
 0x574   :  { %12000 = vmatmul.mubr.msk.f32.gmra.mrb[42].mxu0 %vm130_vm0, %v1279_v43 }
 0x576   :  { %v1953_v62 = vpop.trf.xlu0 }
 0x577   :  { %v1280_v15 = vpop.trf.xlu1  ;;  %12507 = vmatmul.mubr.msk.f32.gmra.mrb[20].mxu1 %vm130_vm0, %v1953_v62  ;;  %v11923_v52 = vpop.f32.mrb[246].mxu0 }
 0x578   :  { %12002 = vmatprep.mubr.msk.f32.mxu0 %vm130_vm0, %v1280_v15  ;;  %v4932_v37 = vpop.f32.mrb[247].mxu0  ;;  %v14470_v15 = vld [vmem:[#allocation19_spill] sm:$0xff] }
 0x57a   :  { %v12430_v23 = vpop.f32.mrb[224].mxu1  ;;  %v1954_v6 = vpop.trf.xlu0  ;;  %2020 = vxpose.xlu0.b32.start [1/2] (short) %v14467_v54, 128 }
 0x57b   :  { %v1281_v48 = vpop.trf.xlu1  ;;  %v6622_v51 = vpop.f32.mrb[225].mxu1  ;;  %12509 = vmatprep.mubr.msk.f32.mxu1 %vm130_vm0, %v1954_v6 }
 0x57c   :  { %12003 = vmatmul.mubr.msk.f32.gmra.mrb[44].mxu0 %vm130_vm0, %v1281_v48 }
 0x57e   :  { %v1955_v36 = vpop.trf.xlu0  ;;  %2021 = vxpose.xlu0.b32.end [2/2] (short) %v14468_v57, 128 }
 0x57f   :  { %v1282_v40 = vpop.trf.xlu1  ;;  %1348 = vxpose.xlu1.b32.start [1/2] (short) %v14469_v18, 128  ;;  %12510 = vmatmul.mubr.msk.f32.gmra.mrb[22].mxu1 %vm130_vm0, %v1955_v36  ;;  %v11926_v1 = vpop.f32.mrb[248].mxu0 }
 0x580   :  { %12005 = vmatprep.mubr.msk.f32.mxu0 %vm130_vm0, %v1282_v40  ;;  %v4942_v43 = vpop.f32.mrb[249].mxu0 }
 0x582   :  { %v12433_v41 = vpop.f32.mrb[226].mxu1  ;;  %v1972_v62 = vpop.trf.xlu0 }
 0x583   :  { %1349 = vxpose.xlu1.b32.end [2/2] (short) %v14470_v15, 128  ;;  %v1283_v52 = vpop.trf.xlu1  ;;  %v6632_v37 = vpop.f32.mrb[227].mxu1  ;;  %12512 = vmatprep.mubr.msk.f32.mxu1 %vm130_vm0, %v1972_v62 }
 0x584   :  { %12006 = vmatmul.mubr.msk.f32.gmra.mrb[46].mxu0 %vm130_vm0, %v1283_v52 }
 0x586   :  { %v1973_v23 = vpop.trf.xlu0 }
 0x587   :  { %v1300_v6 = vpop.trf.xlu1  ;;  %12513 = vmatmul.mubr.msk.f32.gmra.mrb[24].mxu1 %vm130_vm0, %v1973_v23  ;;  %v11929_v54 = vpop.f32.mrb[250].mxu0 }
 0x588   :  { %12008 = vmatprep.mubr.msk.f32.mxu0 %vm130_vm0, %v1300_v6  ;;  %v4952_v48 = vpop.f32.mrb[251].mxu0 }
 0x58a   :  { %v12436_v51 = vpop.f32.mrb[228].mxu1  ;;  %v1974_v36 = vpop.trf.xlu0 }
 0x58b   :  { %v1301_v57 = vpop.trf.xlu1  ;;  %v6642_v40 = vpop.f32.mrb[229].mxu1  ;;  %12515 = vmatprep.mubr.msk.f32.mxu1 %vm130_vm0, %v1974_v36 }
 0x58c   :  { %12009 = vmatmul.mubr.msk.f32.gmra.mrb[48].mxu0 %vm130_vm0, %v1301_v57 }
 0x58e   :  { %v1975_v18 = vpop.trf.xlu0 }
 0x58f   :  { %v1302_v1 = vpop.trf.xlu1  ;;  %12516 = vmatmul.mubr.msk.f32.gmra.mrb[26].mxu1 %vm130_vm0, %v1975_v18  ;;  %v11932_v43 = vpop.f32.mrb[252].mxu0  ;;  %v8069_v18 = vmul.f32 2.0, %v13998_v30 }
 0x590   :  { %v4962_v41 = vpop.f32.mrb[253].mxu0  ;;  %12011 = vmatprep.mubr.msk.f32.mxu0 %vm130_vm0, %v1302_v1 }
 0x592   :  { %v12439_v62 = vpop.f32.mrb[230].mxu1  ;;  %v1976_v15 = vpop.trf.xlu0 }
 0x593   :  { %v1303_v52 = vpop.trf.xlu1  ;;  %v6652_v37 = vpop.f32.mrb[231].mxu1  ;;  %12518 = vmatprep.mubr.msk.f32.mxu1 %vm130_vm0, %v1976_v15 }
 0x594   :  { %12012 = vmatmul.mubr.msk.f32.gmra.mrb[50].mxu0 %vm130_vm0, %v1303_v52  ;;  %v8197_v52 = vadd.f32 0.0001, %v8069_v18 }
 0x596   :  { %v1977_v23 = vpop.trf.xlu0 }
 0x597   :  { %v1304_v6 = vpop.trf.xlu1  ;;  %12519 = vmatmul.mubr.msk.f32.gmra.mrb[28].mxu1 %vm130_vm0, %v1977_v23  ;;  %v11935_v54 = vpop.f32.mrb[254].mxu0 }
 0x598   :  { %v4972_v48 = vpop.f32.mrb[255].mxu0  ;;  %12014 = vmatprep.mubr.msk.f32.mxu0 %vm130_vm0, %v1304_v6 }
 0x59a   :  { %v12442_v51 = vpop.f32.mrb[232].mxu1  ;;  %v1978_v36 = vpop.trf.xlu0 }
 0x59b   :  { %v1305_v57 = vpop.trf.xlu1  ;;  %v6662_v40 = vpop.f32.mrb[233].mxu1  ;;  %12521 = vmatprep.mubr.msk.f32.mxu1 %vm130_vm0, %v1978_v36 }
 0x59c   :  { %v7941_v1 = vsub.f32 %v6662_v40, %v13998_v30  ;;  %12015 = vmatmul.mubr.msk.f32.gmra.mrb[52].mxu0 %vm130_vm0, %v1305_v57 }
 0x59e   :  { %v8325_v43 = vmul.f32 2.0, %v7941_v1  ;;  %v1979_v41 = vpop.trf.xlu0 }
 0x59f   :  { %v1306_v62 = vpop.trf.xlu1  ;;  %v11938_v15 = vpop.f32.mrb[0].mxu0  ;;  %12522 = vmatmul.mubr.msk.f32.gmra.mrb[30].mxu1 %vm130_vm0, %v1979_v41 }
 0x5a0   :  { %v8453_v37 = vadd.f32 0.0009, %v8325_v43  ;;  %v4982_v23 = vpop.f32.mrb[1].mxu0  ;;  %12017 = vmatprep.mubr.msk.f32.mxu0 %vm130_vm0, %v1306_v62 }
 0x5a1   :  { %v7477_v6 = vmul.f32 %v4982_v23, %v4982_v23  ;;  %v14150_v54 = vmul.f32 %v4982_v23, %v13508_v22 }
 0x5a2   :  { %v14152_v48 = vmul.f32 %v8453_v37, %v8197_v52  ;;  %v12445_v30 = vpop.f32.mrb[234].mxu1  ;;  %v1980_v51 = vpop.trf.xlu0 }
 0x5a3   :  { %v7861_v36 = vsub.f32 %v13939_v16, %v7477_v6  ;;  %v8757_v57 = vadd.f32 %v7477_v6, %v13715_v29  ;;  %v1307_v40 = vpop.trf.xlu1  ;;  %v6672_v1 = vpop.f32.mrb[235].mxu1  ;;  %12524 = vmatprep.mubr.msk.f32.mxu1 %vm130_vm0, %v1980_v51 }
 0x5a4   :  { %12018 = vmatmul.mubr.msk.f32.gmra.mrb[54].mxu0 %vm130_vm0, %v1307_v40 }
 0x5a5   :  { %v9013_v18 = vadd.f32 %v7861_v36, %v7733_v49  ;;  %v8885_v43 = vadd.f32 0.0001, %v8757_v57 }
 0x5a6   :  { %v1981_v22 = vpop.trf.xlu0 }
 0x5a7   :  { %v9141_v41 = vadd.f32 0.0009, %v9013_v18  ;;  %v1308_v62 = vpop.trf.xlu1  ;;  %12525 = vmatmul.mubr.msk.f32.gmra.mrb[32].mxu1 %vm130_vm0, %v1981_v22  ;;  %v11941_v15 = vpop.f32.mrb[2].mxu0 }
 0x5a8   :  { %12020 = vmatprep.mubr.msk.f32.mxu0 %vm130_vm0, %v1308_v62  ;;  %v4992_v16 = vpop.f32.mrb[3].mxu0 }
 0x5a9   :  { %v14163_v52 = vmul.f32 %v9141_v41, %v8885_v43 }
 0x5aa   :  { %v12448_v37 = vpop.f32.mrb[236].mxu1  ;;  %v1982_v23 = vpop.trf.xlu0 }
 0x5ab   :  { %v1309_v6 = vpop.trf.xlu1  ;;  %v6682_v30 = vpop.f32.mrb[237].mxu1  ;;  %12527 = vmatprep.mubr.msk.f32.mxu1 %vm130_vm0, %v1982_v23  ;;  %12652 = vrcp.f32 %v14163_v52 }
 0x5ac   :  { %12021 = vmatmul.mubr.msk.f32.gmra.mrb[56].mxu0 %vm130_vm0, %v1309_v6  ;;  %v14471_v6 = vld [vmem:[#allocation31_spill] sm:$0xff] }
 0x5ae   :  { %v1983_v29 = vpop.trf.xlu0 }
 0x5af   :  { %v1310_v59 = vpop.trf.xlu1  ;;  %12528 = vmatmul.mubr.msk.f32.gmra.mrb[34].mxu1 %vm130_vm0, %v1983_v29  ;;  %v11944_v49 = vpop.f32.mrb[4].mxu0 }
 0x5b0   :  { %12023 = vmatprep.mubr.msk.f32.mxu0 %vm130_vm0, %v1310_v59  ;;  %v5002_v51 = vpop.f32.mrb[5].mxu0 }
 0x5b2   :  { %v12451_v36 = vpop.f32.mrb[238].mxu1  ;;  %v1984_v57 = vpop.trf.xlu0 }
 0x5b3   :  { %v1311_v40 = vpop.trf.xlu1  ;;  %v6692_v1 = vpop.f32.mrb[239].mxu1  ;;  %12530 = vmatprep.mubr.msk.f32.mxu1 %vm130_vm0, %v1984_v57  ;;  %v14472_v36 = vld [vmem:[#allocation32_spill] sm:$0xff] }
 0x5b4   :  { %12024 = vmatmul.mubr.msk.f32.gmra.mrb[58].mxu0 %vm130_vm0, %v1311_v40 }
 0x5b6   :  { %v1985_v18 = vpop.trf.xlu0 }
 0x5b7   :  { %v1312_v22 = vpop.trf.xlu1  ;;  %12531 = vmatmul.mubr.msk.f32.gmra.mrb[36].mxu1 %vm130_vm0, %v1985_v18  ;;  %v11947_v43 = vpop.f32.mrb[6].mxu0 }
 0x5b8   :  { %12026 = vmatprep.mubr.msk.f32.mxu0 %vm130_vm0, %v1312_v22  ;;  %v5012_v41 = vpop.f32.mrb[7].mxu0 }
 0x5ba   :  { %v12454_v62 = vpop.f32.mrb[240].mxu1  ;;  %v1986_v15 = vpop.trf.xlu0  ;;  %2052 = vxpose.xlu0.b32.start [1/2] (short) %v13311_v20, 128 }
 0x5bb   :  { %v1313_v16 = vpop.trf.xlu1  ;;  %v6702_v37 = vpop.f32.mrb[241].mxu1  ;;  %12533 = vmatprep.mubr.msk.f32.mxu1 %vm130_vm0, %v1986_v15 }
 0x5bc   :  { %12027 = vmatmul.mubr.msk.f32.gmra.mrb[60].mxu0 %vm130_vm0, %v1313_v16 }
 0x5be   :  { %v1987_v23 = vpop.trf.xlu0  ;;  %2053 = vxpose.xlu0.b32.end [2/2] (short) %v14471_v6, 128 }
 0x5bf   :  { %v1314_v30 = vpop.trf.xlu1  ;;  %2084 = vxpose.xlu1.b32.start [1/2] (short) %v13316_v11, 128  ;;  %12534 = vmatmul.mubr.msk.f32.gmra.mrb[38].mxu1 %vm130_vm0, %v1987_v23  ;;  %v11950_v29 = vpop.f32.mrb[8].mxu0 }
 0x5c0   :  { %12029 = vmatprep.mubr.msk.f32.mxu0 %vm130_vm0, %v1314_v30  ;;  %v5022_v59 = vpop.f32.mrb[9].mxu0 }
 0x5c2   :  { %v12457_v49 = vpop.f32.mrb[242].mxu1  ;;  %v2004_v20 = vpop.trf.xlu0 }
 0x5c3   :  { %v1315_v51 = vpop.trf.xlu1  ;;  %2085 = vxpose.xlu1.b32.end [2/2] (short) %v14472_v36, 128  ;;  %v6712_v57 = vpop.f32.mrb[243].mxu1  ;;  %12536 = vmatprep.mubr.msk.f32.mxu1 %vm130_vm0, %v2004_v20 }
 0x5c4   :  { %12030 = vmatmul.mubr.msk.f32.gmra.mrb[62].mxu0 %vm130_vm0, %v1315_v51 }
 0x5c6   :  { %v2005_v40 = vpop.trf.xlu0 }
 0x5c7   :  { %v1332_v1 = vpop.trf.xlu1  ;;  %12537 = vmatmul.mubr.msk.f32.gmra.mrb[40].mxu1 %vm130_vm0, %v2005_v40  ;;  %v11953_v11 = vpop.f32.mrb[10].mxu0 }
 0x5c8   :  { %12032 = vmatprep.mubr.msk.f32.mxu0 %vm130_vm0, %v1332_v1  ;;  %v5032_v18 = vpop.f32.mrb[11].mxu0 }
 0x5c9   :  { %v8085_v18 = vmul.f32 2.0, %v14051_v34 }
 0x5ca   :  { %v12460_v22 = vpop.f32.mrb[244].mxu1  ;;  %v2006_v43 = vpop.trf.xlu0 }
 0x5cb   :  { %v1333_v41 = vpop.trf.xlu1  ;;  %v6722_v62 = vpop.f32.mrb[245].mxu1  ;;  %12539 = vmatprep.mubr.msk.f32.mxu1 %vm130_vm0, %v2006_v43 }
 0x5cc   :  { %12033 = vmatmul.mubr.msk.f32.gmra.mrb[64].mxu0 %vm130_vm0, %v1333_v41 }
 0x5ce   :  { %v2007_v15 = vpop.trf.xlu0 }
 0x5cf   :  { %v1334_v16 = vpop.trf.xlu1  ;;  %12540 = vmatmul.mubr.msk.f32.gmra.mrb[42].mxu1 %vm130_vm0, %v2007_v15  ;;  %v11956_v37 = vpop.f32.mrb[12].mxu0 }
 0x5d0   :  { %v5042_v23 = vpop.f32.mrb[13].mxu0  ;;  %12035 = vmatprep.mubr.msk.f32.mxu0 %vm130_vm0, %v1334_v16  ;;  %v8213_v16 = vadd.f32 0.0001, %v8085_v18 }
 0x5d2   :  { %v12463_v6 = vpop.f32.mrb[246].mxu1  ;;  %v2008_v30 = vpop.trf.xlu0 }
 0x5d3   :  { %v1335_v29 = vpop.trf.xlu1  ;;  %v6732_v59 = vpop.f32.mrb[247].mxu1  ;;  %12542 = vmatprep.mubr.msk.f32.mxu1 %vm130_vm0, %v2008_v30 }
 0x5d4   :  { %12036 = vmatmul.mubr.msk.f32.gmra.mrb[66].mxu0 %vm130_vm0, %v1335_v29 }
 0x5d6   :  { %v2009_v49 = vpop.trf.xlu0 }
 0x5d7   :  { %v1336_v20 = vpop.trf.xlu1  ;;  %12543 = vmatmul.mubr.msk.f32.gmra.mrb[44].mxu1 %vm130_vm0, %v2009_v49  ;;  %v11959_v51 = vpop.f32.mrb[14].mxu0 }
 0x5d8   :  { %v5052_v36 = vpop.f32.mrb[15].mxu0  ;;  %12038 = vmatprep.mubr.msk.f32.mxu0 %vm130_vm0, %v1336_v20 }
 0x5da   :  { %v12466_v57 = vpop.f32.mrb[248].mxu1  ;;  %v2010_v40 = vpop.trf.xlu0 }
 0x5db   :  { %v1337_v1 = vpop.trf.xlu1  ;;  %v6742_v11 = vpop.f32.mrb[249].mxu1  ;;  %12545 = vmatprep.mubr.msk.f32.mxu1 %vm130_vm0, %v2010_v40 }
 0x5dc   :  { %v7957_v22 = vsub.f32 %v6742_v11, %v14051_v34  ;;  %12039 = vmatmul.mubr.msk.f32.gmra.mrb[68].mxu0 %vm130_vm0, %v1337_v1 }
 0x5de   :  { %v8341_v43 = vmul.f32 2.0, %v7957_v22  ;;  %v2011_v41 = vpop.trf.xlu0 }
 0x5df   :  { %v1338_v62 = vpop.trf.xlu1  ;;  %v11962_v15 = vpop.f32.mrb[16].mxu0  ;;  %12546 = vmatmul.mubr.msk.f32.gmra.mrb[46].mxu1 %vm130_vm0, %v2011_v41 }
 0x5e0   :  { %v8469_v37 = vadd.f32 0.0009, %v8341_v43  ;;  %v5062_v23 = vpop.f32.mrb[17].mxu0  ;;  %12041 = vmatprep.mubr.msk.f32.mxu0 %vm130_vm0, %v1338_v62 }
 0x5e1   :  { %v7493_v6 = vmul.f32 %v5062_v23, %v5062_v23  ;;  %v14200_v30 = vmul.f32 %v5062_v23, %v13536_v47 }
 0x5e2   :  { %v14202_v29 = vmul.f32 %v8469_v37, %v8213_v16  ;;  %v12469_v34 = vpop.f32.mrb[250].mxu1  ;;  %v2012_v59 = vpop.trf.xlu0 }
 0x5e3   :  { %v7877_v49 = vsub.f32 %v13965_v31, %v7493_v6  ;;  %v8773_v20 = vadd.f32 %v7493_v6, %v13755_v35  ;;  %v1339_v51 = vpop.trf.xlu1  ;;  %v6752_v36 = vpop.f32.mrb[251].mxu1  ;;  %12548 = vmatprep.mubr.msk.f32.mxu1 %vm130_vm0, %v2012_v59 }
 0x5e4   :  { %12042 = vmatmul.mubr.msk.f32.gmra.mrb[70].mxu0 %vm130_vm0, %v1339_v51 }
 0x5e5   :  { %v9029_v57 = vadd.f32 %v7877_v49, %v7749_v32  ;;  %v8901_v40 = vadd.f32 0.0001, %v8773_v20 }
 0x5e6   :  { %v2013_v47 = vpop.trf.xlu0 }
 0x5e7   :  { %v9157_v1 = vadd.f32 0.0009, %v9029_v57  ;;  %v1340_v11 = vpop.trf.xlu1  ;;  %12549 = vmatmul.mubr.msk.f32.gmra.mrb[48].mxu1 %vm130_vm0, %v2013_v47  ;;  %v11965_v18 = vpop.f32.mrb[18].mxu0 }
 0x5e8   :  { %12044 = vmatprep.mubr.msk.f32.mxu0 %vm130_vm0, %v1340_v11  ;;  %v5072_v31 = vpop.f32.mrb[19].mxu0 }
 0x5e9   :  { %v14213_v22 = vmul.f32 %v9157_v1, %v8901_v40 }
 0x5ea   :  { %v12472_v43 = vpop.f32.mrb[252].mxu1  ;;  %v2014_v41 = vpop.trf.xlu0 }
 0x5eb   :  { %v1341_v62 = vpop.trf.xlu1  ;;  %v6762_v15 = vpop.f32.mrb[253].mxu1  ;;  %12551 = vmatprep.mubr.msk.f32.mxu1 %vm130_vm0, %v2014_v41  ;;  %12654 = vrcp.f32 %v14213_v22 }
 0x5ec   :  { %12045 = vmatmul.mubr.msk.f32.gmra.mrb[72].mxu0 %vm130_vm0, %v1341_v62 }
 0x5ee   :  { %v2015_v35 = vpop.trf.xlu0 }
 0x5ef   :  { %v1342_v14 = vpop.trf.xlu1  ;;  %12552 = vmatmul.mubr.msk.f32.gmra.mrb[50].mxu1 %vm130_vm0, %v2015_v35  ;;  %v11968_v32 = vpop.f32.mrb[20].mxu0 }
 0x5f0   :  { %12047 = vmatprep.mubr.msk.f32.mxu0 %vm130_vm0, %v1342_v14  ;;  %v5082_v16 = vpop.f32.mrb[21].mxu0 }
 0x5f2   :  { %v12475_v37 = vpop.f32.mrb[254].mxu1  ;;  %v2016_v23 = vpop.trf.xlu0 }
 0x5f3   :  { %v1343_v6 = vpop.trf.xlu1  ;;  %v6772_v34 = vpop.f32.mrb[255].mxu1  ;;  %12554 = vmatprep.mubr.msk.f32.mxu1 %vm130_vm0, %v2016_v23 }
 0x5f4   :  { %12048 = vmatmul.mubr.msk.f32.gmra.mrb[74].mxu0 %vm130_vm0, %v1343_v6 }
 0x5f6   :  { %v2017_v59 = vpop.trf.xlu0 }
 0x5f7   :  { %v1344_v49 = vpop.trf.xlu1  ;;  %12555 = vmatmul.mubr.msk.f32.gmra.mrb[52].mxu1 %vm130_vm0, %v2017_v59  ;;  %v11971_v20 = vpop.f32.mrb[22].mxu0 }
 0x5f8   :  { %12050 = vmatprep.mubr.msk.f32.mxu0 %vm130_vm0, %v1344_v49  ;;  %v5092_v51 = vpop.f32.mrb[23].mxu0 }
 0x5fa   :  { %v12478_v36 = vpop.f32.mrb[0].mxu1  ;;  %v2018_v57 = vpop.trf.xlu0 }
 0x5fb   :  { %v1345_v47 = vpop.trf.xlu1  ;;  %v6782_v40 = vpop.f32.mrb[1].mxu1  ;;  %12557 = vmatprep.mubr.msk.f32.mxu1 %vm130_vm0, %v2018_v57 }
 0x5fc   :  { %12051 = vmatmul.mubr.msk.f32.gmra.mrb[76].mxu0 %vm130_vm0, %v1345_v47 }
 0x5fe   :  { %v2019_v1 = vpop.trf.xlu0 }
 0x5ff   :  { %v1346_v11 = vpop.trf.xlu1  ;;  %12558 = vmatmul.mubr.msk.f32.gmra.mrb[54].mxu1 %vm130_vm0, %v2019_v1  ;;  %v11974_v18 = vpop.f32.mrb[24].mxu0 }
 0x600   :  { %12053 = vmatprep.mubr.msk.f32.mxu0 %vm130_vm0, %v1346_v11  ;;  %v5102_v31 = vpop.f32.mrb[25].mxu0 }
 0x602   :  { %v12481_v43 = vpop.f32.mrb[2].mxu1  ;;  %v2036_v41 = vpop.trf.xlu0 }
 0x603   :  { %v1347_v62 = vpop.trf.xlu1  ;;  %v6792_v15 = vpop.f32.mrb[3].mxu1  ;;  %12560 = vmatprep.mubr.msk.f32.mxu1 %vm130_vm0, %v2036_v41 }
 0x604   :  { %12054 = vmatmul.mubr.msk.f32.gmra.mrb[78].mxu0 %vm130_vm0, %v1347_v62 }
 0x606   :  { %v2037_v35 = vpop.trf.xlu0 }
 0x607   :  { %v1364_v14 = vpop.trf.xlu1  ;;  %12561 = vmatmul.mubr.msk.f32.gmra.mrb[56].mxu1 %vm130_vm0, %v2037_v35  ;;  %v11977_v32 = vpop.f32.mrb[26].mxu0  ;;  %v8101_v35 = vmul.f32 2.0, %v14102_v42 }
 0x608   :  { %12056 = vmatprep.mubr.msk.f32.mxu0 %vm130_vm0, %v1364_v14  ;;  %v5112_v16 = vpop.f32.mrb[27].mxu0 }
 0x60a   :  { %v12484_v37 = vpop.f32.mrb[4].mxu1  ;;  %v2038_v23 = vpop.trf.xlu0 }
 0x60b   :  { %v1365_v6 = vpop.trf.xlu1  ;;  %v6802_v34 = vpop.f32.mrb[5].mxu1  ;;  %12563 = vmatprep.mubr.msk.f32.mxu1 %vm130_vm0, %v2038_v23 }
 0x60c   :  { %12057 = vmatmul.mubr.msk.f32.gmra.mrb[80].mxu0 %vm130_vm0, %v1365_v6  ;;  %v8229_v6 = vadd.f32 0.0001, %v8101_v35 }
 0x60e   :  { %v2039_v59 = vpop.trf.xlu0 }
 0x60f   :  { %v1366_v49 = vpop.trf.xlu1  ;;  %12564 = vmatmul.mubr.msk.f32.gmra.mrb[58].mxu1 %vm130_vm0, %v2039_v59  ;;  %v11980_v20 = vpop.f32.mrb[28].mxu0 }
 0x610   :  { %v5122_v51 = vpop.f32.mrb[29].mxu0  ;;  %12059 = vmatprep.mubr.msk.f32.mxu0 %vm130_vm0, %v1366_v49 }
 0x612   :  { %v12487_v36 = vpop.f32.mrb[6].mxu1  ;;  %v2040_v57 = vpop.trf.xlu0 }
 0x613   :  { %v1367_v47 = vpop.trf.xlu1  ;;  %v6812_v40 = vpop.f32.mrb[7].mxu1  ;;  %12566 = vmatprep.mubr.msk.f32.mxu1 %vm130_vm0, %v2040_v57 }
 0x614   :  { %12060 = vmatmul.mubr.msk.f32.gmra.mrb[82].mxu0 %vm130_vm0, %v1367_v47  ;;  %v12651_v36 = vpop.eup %12650 }
 0x616   :  { %v2041_v1 = vpop.trf.xlu0 }
 0x617   :  { %v1368_v11 = vpop.trf.xlu1  ;;  %12567 = vmatmul.mubr.msk.f32.gmra.mrb[60].mxu1 %vm130_vm0, %v2041_v1  ;;  %v11983_v18 = vpop.f32.mrb[30].mxu0 }
 0x618   :  { %v5132_v31 = vpop.f32.mrb[31].mxu0  ;;  %12062 = vmatprep.mubr.msk.f32.mxu0 %vm130_vm0, %v1368_v11 }
 0x61a   :  { %v12490_v43 = vpop.f32.mrb[8].mxu1  ;;  %v2042_v41 = vpop.trf.xlu0 }
 0x61b   :  { %v1369_v62 = vpop.trf.xlu1  ;;  %v6822_v15 = vpop.f32.mrb[9].mxu1  ;;  %12569 = vmatprep.mubr.msk.f32.mxu1 %vm130_vm0, %v2042_v41 }
 0x61c   :  { %v7973_v14 = vsub.f32 %v6822_v15, %v14102_v42  ;;  %12063 = vmatmul.mubr.msk.f32.gmra.mrb[84].mxu0 %vm130_vm0, %v1369_v62 }
 0x61e   :  { %v8357_v32 = vmul.f32 2.0, %v7973_v14  ;;  %v2043_v16 = vpop.trf.xlu0 }
 0x61f   :  { %v1370_v37 = vpop.trf.xlu1  ;;  %v11986_v23 = vpop.f32.mrb[32].mxu0  ;;  %12570 = vmatmul.mubr.msk.f32.gmra.mrb[62].mxu1 %vm130_vm0, %v2043_v16 }
 0x620   :  { %v8485_v3 = vadd.f32 0.0009, %v8357_v32  ;;  %v5142_v34 = vpop.f32.mrb[33].mxu0  ;;  %12065 = vmatprep.mubr.msk.f32.mxu0 %vm130_vm0, %v1370_v37 }
 0x621   :  { %v7509_v59 = vmul.f32 %v5142_v34, %v5142_v34  ;;  %v14247_v49 = vmul.f32 %v5142_v34, %v13578_v19 }
 0x622   :  { %v8613_v20 = vmul.f32 %v8485_v3, %v8229_v6  ;;  %v12493_v51 = vpop.f32.mrb[10].mxu1  ;;  %v2044_v42 = vpop.trf.xlu0 }
 0x623   :  { %v7893_v57 = vsub.f32 %v13989_v38, %v7509_v59  ;;  %v8789_v47 = vadd.f32 %v7509_v59, %v13798_v55  ;;  %v1371_v40 = vpop.trf.xlu1  ;;  %v6832_v1 = vpop.f32.mrb[11].mxu1  ;;  %12572 = vmatprep.mubr.msk.f32.mxu1 %vm130_vm0, %v2044_v42 }
 0x624   :  { %v14252_v11 = vmul.f32 %v12651_v36, %v8613_v20  ;;  %12066 = vmatmul.mubr.msk.f32.gmra.mrb[86].mxu0 %vm130_vm0, %v1371_v40 }
 0x625   :  { %v9045_v19 = vadd.f32 %v7893_v57, %v7765_v56  ;;  %v8917_v31 = vadd.f32 0.0001, %v8789_v47 }
 0x626   :  { %v2045_v18 = vpop.trf.xlu0 }
 0x627   :  { %v9173_v43 = vadd.f32 0.0009, %v9045_v19  ;;  %v1372_v41 = vpop.trf.xlu1  ;;  %12573 = vmatmul.mubr.msk.f32.gmra.mrb[64].mxu1 %vm130_vm0, %v2045_v18  ;;  %v11989_v38 = vpop.f32.mrb[34].mxu0 }
 0x628   :  { %12068 = vmatprep.mubr.msk.f32.mxu0 %vm130_vm0, %v1372_v41  ;;  %v5152_v62 = vpop.f32.mrb[35].mxu0 }
 0x629   :  { %v14260_v15 = vmul.f32 %v9173_v43, %v8917_v31 }
 0x62a   :  { %v12496_v35 = vpop.f32.mrb[12].mxu1  ;;  %v2046_v14 = vpop.trf.xlu0 }
 0x62b   :  { %v1373_v32 = vpop.trf.xlu1  ;;  %v6842_v16 = vpop.f32.mrb[13].mxu1  ;;  %12575 = vmatprep.mubr.msk.f32.mxu1 %vm130_vm0, %v2046_v14  ;;  %12656 = vrcp.f32 %v14260_v15 }
 0x62c   :  { %12069 = vmatmul.mubr.msk.f32.gmra.mrb[88].mxu0 %vm130_vm0, %v1373_v32 }
 0x62e   :  { %v2047_v55 = vpop.trf.xlu0 }
 0x62f   :  { %v1374_v60 = vpop.trf.xlu1  ;;  %12576 = vmatmul.mubr.msk.f32.gmra.mrb[66].mxu1 %vm130_vm0, %v2047_v55  ;;  %v11992_v56 = vpop.f32.mrb[36].mxu0 }
 0x630   :  { %12071 = vmatprep.mubr.msk.f32.mxu0 %vm130_vm0, %v1374_v60  ;;  %v5162_v37 = vpop.f32.mrb[37].mxu0 }
 0x632   :  { %v12499_v23 = vpop.f32.mrb[14].mxu1  ;;  %v2048_v6 = vpop.trf.xlu0 }
 0x633   :  { %v1375_v3 = vpop.trf.xlu1  ;;  %v6852_v34 = vpop.f32.mrb[15].mxu1  ;;  %12578 = vmatprep.mubr.msk.f32.mxu1 %vm130_vm0, %v2048_v6 }
 0x634   :  { %12072 = vmatmul.mubr.msk.f32.gmra.mrb[90].mxu0 %vm130_vm0, %v1375_v3 }
 0x636   :  { %v2049_v59 = vpop.trf.xlu0 }
 0x637   :  { %v1376_v20 = vpop.trf.xlu1  ;;  %12579 = vmatmul.mubr.msk.f32.gmra.mrb[68].mxu1 %vm130_vm0, %v2049_v59  ;;  %v11995_v51 = vpop.f32.mrb[38].mxu0 }
 0x638   :  { %12074 = vmatprep.mubr.msk.f32.mxu0 %vm130_vm0, %v1376_v20  ;;  %v5172_v42 = vpop.f32.mrb[39].mxu0 }
 0x63a   :  { %v12502_v36 = vpop.f32.mrb[16].mxu1  ;;  %v2050_v57 = vpop.trf.xlu0 }
 0x63b   :  { %v1377_v47 = vpop.trf.xlu1  ;;  %v6862_v40 = vpop.f32.mrb[17].mxu1  ;;  %12581 = vmatprep.mubr.msk.f32.mxu1 %vm130_vm0, %v2050_v57 }
 0x63c   :  { %12075 = vmatmul.mubr.msk.f32.gmra.mrb[92].mxu0 %vm130_vm0, %v1377_v47 }
 0x63e   :  { %v2051_v1 = vpop.trf.xlu0 }
 0x63f   :  { %v1378_v19 = vpop.trf.xlu1  ;;  %12582 = vmatmul.mubr.msk.f32.gmra.mrb[70].mxu1 %vm130_vm0, %v2051_v1  ;;  %v11998_v18 = vpop.f32.mrb[40].mxu0 }
 0x640   :  { %12077 = vmatprep.mubr.msk.f32.mxu0 %vm130_vm0, %v1378_v19  ;;  %v5182_v31 = vpop.f32.mrb[41].mxu0 }
 0x642   :  { %v12505_v43 = vpop.f32.mrb[18].mxu1  ;;  %v2068_v41 = vpop.trf.xlu0 }
 0x643   :  { %v1379_v38 = vpop.trf.xlu1  ;;  %v6872_v62 = vpop.f32.mrb[19].mxu1  ;;  %12584 = vmatprep.mubr.msk.f32.mxu1 %vm130_vm0, %v2068_v41 }
 0x644   :  { %12078 = vmatmul.mubr.msk.f32.gmra.mrb[94].mxu0 %vm130_vm0, %v1379_v38  ;;  %v12653_v43 = vpop.eup %12652 }
 0x645   :  { %12080 = vmatprep.mubr.msk.f32.mxu0 %vm130_vm0, %v13379_v46 }
 0x646   :  { %v2069_v35 = vpop.trf.xlu0 }
 0x647   :  { %12585 = vmatmul.mubr.msk.f32.gmra.mrb[72].mxu1 %vm130_vm0, %v2069_v35  ;;  %v12001_v14 = vpop.f32.mrb[42].mxu0 }
 0x648   :  { %12081 = vmatmul.mubr.msk.f32.gmra.mrb[96].mxu0 %vm130_vm0, %v13383_v28  ;;  %v5192_v32 = vpop.f32.mrb[43].mxu0 }
 0x649   :  { %12083 = vmatprep.mubr.msk.f32.mxu0 %vm130_vm0, %v13387_v25 }
 0x64a   :  { %v12508_v16 = vpop.f32.mrb[20].mxu1  ;;  %v2070_v55 = vpop.trf.xlu0 }
 0x64b   :  { %v6882_v60 = vpop.f32.mrb[21].mxu1  ;;  %12587 = vmatprep.mubr.msk.f32.mxu1 %vm130_vm0, %v2070_v55 }
 0x64c   :  { %12084 = vmatmul.mubr.msk.f32.gmra.mrb[98].mxu0 %vm130_vm0, %v13391_v0  ;;  %v14473_v0 = vld [vmem:[#allocation33_spill] sm:$0xff] }
 0x64d   :  { %12086 = vmatprep.mubr.msk.f32.mxu0 %vm130_vm0, %v13395_v12 }
 0x64e   :  { %v2071_v46 = vpop.trf.xlu0 }
 0x64f   :  { %12588 = vmatmul.mubr.msk.f32.gmra.mrb[74].mxu1 %vm130_vm0, %v2071_v46  ;;  %v12004_v56 = vpop.f32.mrb[44].mxu0 }
 0x650   :  { %12087 = vmatmul.mubr.msk.f32.gmra.mrb[100].mxu0 %vm130_vm0, %v13399_v27  ;;  %v5202_v28 = vpop.f32.mrb[45].mxu0 }
 0x651   :  { %12089 = vmatprep.mubr.msk.f32.mxu0 %vm130_vm0, %v13405_v13  ;;  %v8117_v13 = vmul.f32 2.0, %v14150_v54 }
 0x652   :  { %v12511_v25 = vpop.f32.mrb[22].mxu1  ;;  %v2072_v37 = vpop.trf.xlu0 }
 0x653   :  { %v6892_v23 = vpop.f32.mrb[23].mxu1  ;;  %12590 = vmatprep.mubr.msk.f32.mxu1 %vm130_vm0, %v2072_v37  ;;  %v8245_v57 = vadd.f32 0.0001, %v8117_v13 }
 0x654   :  { %12090 = vmatmul.mubr.msk.f32.gmra.mrb[102].mxu0 %vm130_vm0, %v14473_v0 }
 0x656   :  { %v2073_v12 = vpop.trf.xlu0 }
 0x657   :  { %12591 = vmatmul.mubr.msk.f32.gmra.mrb[76].mxu1 %vm130_vm0, %v2073_v12  ;;  %v12007_v6 = vpop.f32.mrb[46].mxu0 }
 0x658   :  { %v5212_v3 = vpop.f32.mrb[47].mxu0  ;;  %v2100_v6 = vpop.trf.xlu1 }
 0x65a   :  { %v12514_v27 = vpop.f32.mrb[24].mxu1  ;;  %v2074_v34 = vpop.trf.xlu0 }
 0x65b   :  { %v6902_v59 = vpop.f32.mrb[25].mxu1  ;;  %12593 = vmatprep.mubr.msk.f32.mxu1 %vm130_vm0, %v2074_v34 }
 0x65c   :  { %v7989_v20 = vsub.f32 %v6902_v59, %v14150_v54 }
 0x65e   :  { %v8373_v51 = vmul.f32 2.0, %v7989_v20  ;;  %v2075_v42 = vpop.trf.xlu0  ;;  %v2101_v20 = vpop.trf.xlu1 }
 0x65f   :  { %v12010_v36 = vpop.f32.mrb[48].mxu0  ;;  %12594 = vmatmul.mubr.msk.f32.gmra.mrb[78].mxu1 %vm130_vm0, %v2075_v42 }
 0x660   :  { %v8501_v47 = vadd.f32 0.0009, %v8373_v51  ;;  %v5222_v40 = vpop.f32.mrb[49].mxu0 }
 0x661   :  { %v7525_v1 = vmul.f32 %v5222_v40, %v5222_v40  ;;  %v14303_v52 = vmul.f32 %v5222_v40, %v13610_v63 }
 0x662   :  { %v8629_v19 = vmul.f32 %v8501_v47, %v8245_v57  ;;  %v12517_v18 = vpop.f32.mrb[26].mxu1  ;;  %v2076_v31 = vpop.trf.xlu0 }
 0x663   :  { %v7909_v41 = vsub.f32 %v14042_v17, %v7525_v1  ;;  %v8805_v54 = vadd.f32 %v7525_v1, %v13831_v24  ;;  %v6912_v38 = vpop.f32.mrb[27].mxu1  ;;  %12596 = vmatprep.mubr.msk.f32.mxu1 %vm130_vm0, %v2076_v31 }
 0x664   :  { %v14308_v62 = vmul.f32 %v12653_v43, %v8629_v19 }
 0x665   :  { %v9061_v35 = vadd.f32 %v7909_v41, %v7781_v58  ;;  %v8933_v63 = vadd.f32 0.0001, %v8805_v54 }
 0x666   :  { %v2077_v14 = vpop.trf.xlu0 }
 0x667   :  { %v9189_v32 = vadd.f32 0.0009, %v9061_v35  ;;  %12597 = vmatmul.mubr.msk.f32.gmra.mrb[80].mxu1 %vm130_vm0, %v2077_v14  ;;  %v12013_v16 = vpop.f32.mrb[50].mxu0  ;;  %v8133_v14 = vmul.f32 2.0, %v14200_v30 }
 0x668   :  { %v5232_v55 = vpop.f32.mrb[51].mxu0 }
 0x669   :  { %v14314_v60 = vmul.f32 %v9189_v32, %v8933_v63  ;;  %v8261_v55 = vadd.f32 0.0001, %v8133_v14 }
 0x66a   :  { %v12520_v17 = vpop.f32.mrb[28].mxu1  ;;  %v2078_v46 = vpop.trf.xlu0 }
 0x66b   :  { %v6922_v56 = vpop.f32.mrb[29].mxu1  ;;  %12599 = vmatprep.mubr.msk.f32.mxu1 %vm130_vm0, %v2078_v46 }
 0x66e   :  { %v2079_v28 = vpop.trf.xlu0 }
 0x66f   :  { %12600 = vmatmul.mubr.msk.f32.gmra.mrb[82].mxu1 %vm130_vm0, %v2079_v28  ;;  %v12016_v25 = vpop.f32.mrb[52].mxu0 }
 0x670   :  { %v5242_v24 = vpop.f32.mrb[53].mxu0 }
 0x672   :  { %v12523_v33 = vpop.f32.mrb[30].mxu1  ;;  %v2080_v58 = vpop.trf.xlu0 }
 0x673   :  { %v6932_v37 = vpop.f32.mrb[31].mxu1  ;;  %12602 = vmatprep.mubr.msk.f32.mxu1 %vm130_vm0, %v2080_v58  ;;  %v12655_v33 = vpop.eup %12654 }
 0x676   :  { %v2081_v23 = vpop.trf.xlu0 }
 0x677   :  { %12603 = vmatmul.mubr.msk.f32.gmra.mrb[84].mxu1 %vm130_vm0, %v2081_v23  ;;  %v12019_v0 = vpop.f32.mrb[54].mxu0 }
 0x678   :  { %v5252_v12 = vpop.f32.mrb[55].mxu0 }
 0x67a   :  { %v12526_v3 = vpop.f32.mrb[32].mxu1  ;;  %v2082_v27 = vpop.trf.xlu0 }
 0x67b   :  { %v6942_v34 = vpop.f32.mrb[33].mxu1  ;;  %12605 = vmatprep.mubr.msk.f32.mxu1 %vm130_vm0, %v2082_v27 }
 0x67e   :  { %v2083_v59 = vpop.trf.xlu0 }
 0x67f   :  { %12606 = vmatmul.mubr.msk.f32.gmra.mrb[86].mxu1 %vm130_vm0, %v2083_v59  ;;  %v12022_v13 = vpop.f32.mrb[56].mxu0  ;;  %v2102_v59 = vpop.trf.xlu1 }
 0x680   :  { %12608 = vmatprep.mubr.msk.f32.mxu1 %vm130_vm0, %v2100_v6  ;;  %v5262_v51 = vpop.f32.mrb[57].mxu0 }
 0x682   :  { %v12529_v42 = vpop.f32.mrb[34].mxu1 }
 0x683   :  { %v6952_v36 = vpop.f32.mrb[35].mxu1  ;;  %12609 = vmatmul.mubr.msk.f32.gmra.mrb[88].mxu1 %vm130_vm0, %v2101_v20  ;;  %v2103_v13 = vpop.trf.xlu1 }
 0x684   :  { %12611 = vmatprep.mubr.msk.f32.mxu1 %vm130_vm0, %v2102_v59 }
 0x687   :  { %v12025_v57 = vpop.f32.mrb[58].mxu0  ;;  %12612 = vmatmul.mubr.msk.f32.gmra.mrb[90].mxu1 %vm130_vm0, %v2103_v13  ;;  %v2104_v39 = vpop.trf.xlu1 }
 0x688   :  { %v5272_v47 = vpop.f32.mrb[59].mxu0  ;;  %12614 = vmatprep.mubr.msk.f32.mxu1 %vm130_vm0, %v2104_v39 }
 0x68a   :  { %v12532_v40 = vpop.f32.mrb[36].mxu1 }
 0x68b   :  { %v6962_v1 = vpop.f32.mrb[37].mxu1 }
 0x68f   :  { %v12028_v19 = vpop.f32.mrb[60].mxu0 }
 0x690   :  { %v5282_v18 = vpop.f32.mrb[61].mxu0 }
 0x692   :  { %v12535_v31 = vpop.f32.mrb[38].mxu1 }
 0x693   :  { %v6972_v43 = vpop.f32.mrb[39].mxu1 }
 0x697   :  { %v12031_v41 = vpop.f32.mrb[62].mxu0 }
 0x698   :  { %v5292_v54 = vpop.f32.mrb[63].mxu0 }
 0x69a   :  { %v12538_v38 = vpop.f32.mrb[40].mxu1 }
 0x69b   :  { %v6982_v35 = vpop.f32.mrb[41].mxu1 }
 0x69c   :  { %v8005_v63 = vsub.f32 %v6982_v35, %v14200_v30 }
 0x69e   :  { %v8389_v32 = vmul.f32 2.0, %v8005_v63 }
 0x69f   :  { %v12034_v16 = vpop.f32.mrb[64].mxu0 }
 0x6a0   :  { %v8517_v17 = vadd.f32 0.0009, %v8389_v32  ;;  %v5302_v46 = vpop.f32.mrb[65].mxu0 }
 0x6a1   :  { %v7541_v56 = vmul.f32 %v5302_v46, %v5302_v46  ;;  %v14328_v28 = vmul.f32 %v5302_v46, %v13946_v26 }
 0x6a2   :  { %v8645_v25 = vmul.f32 %v8517_v17, %v8261_v55  ;;  %v12541_v24 = vpop.f32.mrb[42].mxu1 }
 0x6a3   :  { %v7925_v22 = vsub.f32 %v14095_v50, %v7541_v56  ;;  %v8821_v58 = vadd.f32 %v7541_v56, %v13951_v44  ;;  %v6992_v37 = vpop.f32.mrb[43].mxu1 }
 0x6a4   :  { %v14332_v23 = vmul.f32 %v12655_v33, %v8645_v25 }
 0x6a5   :  { %v9077_v30 = vadd.f32 %v7925_v22, %v7797_v8  ;;  %v8949_v0 = vadd.f32 0.0001, %v8821_v58  ;;  %v2105_v8 = vpop.trf.xlu1 }
 0x6a6   :  { %12615 = vmatmul.mubr.msk.f32.gmra.mrb[92].mxu1 %vm130_vm0, %v2105_v8 }
 0x6a7   :  { %v9205_v12 = vadd.f32 0.0009, %v9077_v30  ;;  %v12037_v6 = vpop.f32.mrb[66].mxu0 }
 0x6a8   :  { %v5312_v3 = vpop.f32.mrb[67].mxu0 }
 0x6a9   :  { %v14337_v26 = vmul.f32 %v9205_v12, %v8949_v0  ;;  %v2106_v40 = vpop.trf.xlu1  ;;  %v8149_v0 = vmul.f32 2.0, %v14247_v49 }
 0x6aa   :  { %v12544_v27 = vpop.f32.mrb[44].mxu1  ;;  %12617 = vmatprep.mubr.msk.f32.mxu1 %vm130_vm0, %v2106_v40 }
 0x6ab   :  { %v7002_v34 = vpop.f32.mrb[45].mxu1 }
 0x6ac   :  { %v8277_v34 = vadd.f32 0.0001, %v8149_v0 }
 0x6ad   :  { %v2107_v19 = vpop.trf.xlu1 }
 0x6ae   :  { %12618 = vmatmul.mubr.msk.f32.gmra.mrb[94].mxu1 %vm130_vm0, %v2107_v19 }
 0x6af   :  { %v12040_v50 = vpop.f32.mrb[68].mxu0 }
 0x6b0   :  { %v5322_v20 = vpop.f32.mrb[69].mxu0 }
 0x6b1   :  { %v2108_v41 = vpop.trf.xlu1 }
 0x6b2   :  { %v12547_v51 = vpop.f32.mrb[46].mxu1  ;;  %12620 = vmatprep.mubr.msk.f32.mxu1 %vm130_vm0, %v2108_v41 }
 0x6b3   :  { %v7012_v42 = vpop.f32.mrb[47].mxu1  ;;  %v12657_v51 = vpop.eup %12656 }
 0x6b5   :  { %v2109_v38 = vpop.trf.xlu1 }
 0x6b6   :  { %12621 = vmatmul.mubr.msk.f32.gmra.mrb[96].mxu1 %vm130_vm0, %v2109_v38 }
 0x6b7   :  { %v12043_v44 = vpop.f32.mrb[70].mxu0 }
 0x6b8   :  { %v5332_v36 = vpop.f32.mrb[71].mxu0  ;;  %v8837_v44 = vadd.f32 0.0001, %v14009_v7 }
 0x6b9   :  { %v2110_v32 = vpop.trf.xlu1 }
 0x6ba   :  { %v12550_v57 = vpop.f32.mrb[48].mxu1  ;;  %12623 = vmatprep.mubr.msk.f32.mxu1 %vm130_vm0, %v2110_v32 }
 0x6bb   :  { %v7022_v47 = vpop.f32.mrb[49].mxu1 }
 0x6bd   :  { %v2111_v55 = vpop.trf.xlu1 }
 0x6be   :  { %12624 = vmatmul.mubr.msk.f32.gmra.mrb[98].mxu1 %vm130_vm0, %v2111_v55 }
 0x6bf   :  { %v12046_v1 = vpop.f32.mrb[72].mxu0 }
 0x6c0   :  { %v5342_v18 = vpop.f32.mrb[73].mxu0 }
 0x6c1   :  { %v2112_v25 = vpop.trf.xlu1 }
 0x6c2   :  { %v12553_v31 = vpop.f32.mrb[50].mxu1  ;;  %12626 = vmatprep.mubr.msk.f32.mxu1 %vm130_vm0, %v2112_v25 }
 0x6c3   :  { %v7032_v43 = vpop.f32.mrb[51].mxu1 }
 0x6c5   :  { %v2113_v33 = vpop.trf.xlu1 }
 0x6c6   :  { %12627 = vmatmul.mubr.msk.f32.gmra.mrb[100].mxu1 %vm130_vm0, %v2113_v33 }
 0x6c7   :  { %v12049_v54 = vpop.f32.mrb[74].mxu0 }
 0x6c8   :  { %v5352_v35 = vpop.f32.mrb[75].mxu0 }
 0x6c9   :  { %v2114_v30 = vpop.trf.xlu1 }
 0x6ca   :  { %v12556_v14 = vpop.f32.mrb[52].mxu1  ;;  %12629 = vmatprep.mubr.msk.f32.mxu1 %vm130_vm0, %v2114_v30 }
 0x6cb   :  { %v7042_v63 = vpop.f32.mrb[53].mxu1 }
 0x6cd   :  { %v2115_v27 = vpop.trf.xlu1 }
 0x6ce   :  { %12630 = vmatmul.mubr.msk.f32.gmra.mrb[102].mxu1 %vm130_vm0, %v2115_v27 }
 0x6cf   :  { %v12052_v16 = vpop.f32.mrb[76].mxu0 }
 0x6d0   :  { %v5362_v17 = vpop.f32.mrb[77].mxu0 }
 0x6d2   :  { %v12559_v46 = vpop.f32.mrb[54].mxu1 }
 0x6d3   :  { %v7052_v56 = vpop.f32.mrb[55].mxu1 }
 0x6d7   :  { %v12055_v24 = vpop.f32.mrb[78].mxu0 }
 0x6d8   :  { %v5372_v22 = vpop.f32.mrb[79].mxu0 }
 0x6da   :  { %v12562_v58 = vpop.f32.mrb[56].mxu1 }
 0x6db   :  { %v7062_v37 = vpop.f32.mrb[57].mxu1 }
 0x6dc   :  { %v8021_v12 = vsub.f32 %v7062_v37, %v14247_v49  ;;  %v8165_v37 = vmul.f32 2.0, %v14303_v52 }
 0x6de   :  { %v8405_v6 = vmul.f32 2.0, %v8021_v12 }
 0x6df   :  { %v12058_v3 = vpop.f32.mrb[80].mxu0 }
 0x6e0   :  { %v8533_v59 = vadd.f32 0.0009, %v8405_v6  ;;  %v5382_v50 = vpop.f32.mrb[81].mxu0 }
 0x6e1   :  { %v7685_v13 = vsub.f32 %v5382_v50, %v14002_v10 }
 0x6e2   :  { %v8661_v15 = vmul.f32 %v8533_v59, %v8277_v34  ;;  %v12565_v20 = vpop.f32.mrb[58].mxu1  ;;  %v8293_v34 = vadd.f32 0.0001, %v8165_v37  ;;  %v8181_v37 = vmul.f32 2.0, %v14328_v28 }
 0x6e3   :  { %v8965_v42 = vadd.f32 %v7813_v61, %v7685_v13  ;;  %v7072_v49 = vpop.f32.mrb[59].mxu1 }
 0x6e4   :  { %v14360_v39 = vmul.f32 %v12657_v51, %v8661_v15 }
 0x6e5   :  { %v9093_v8 = vadd.f32 0.0009, %v8965_v42 }
 0x6e7   :  { %v9221_v36 = vmul.f32 %v9093_v8, %v8837_v44  ;;  %v12061_v57 = vpop.f32.mrb[82].mxu0  ;;  %v9605_v44 = vlaneseq }
 0x6e8   :  { %v5392_v47 = vpop.f32.mrb[83].mxu0 }
 0x6e9   :  { %12658 = vrcp.f32 %v9221_v36  ;;  %v9606_v4 = vshrl.u32 %v9605_v44, 7  ;;  %v9623_v45 = vand.u32 127, %v9605_v44 }
 0x6ea   :  { %v12568_v40 = vpop.f32.mrb[60].mxu1  ;;  %12660 = vrcp.f32 %v14314_v60  ;;  %v8853_v60 = vadd.f32 0.0001, %v14062_v53 }
 0x6eb   :  { %v7082_v1 = vpop.f32.mrb[61].mxu1  ;;  %vm9624_vm1 = vcmp.lt.s32.totalorder %v9606_v4, 6  ;;  %vm9640_vm2 = vcmp.lt.s32.totalorder %v9623_v45, 6 }
 0x6ec   :  { %vm14374_vm3 = vmand %vm9624_vm1, %vm9640_vm2 }
 0x6ef   :  { %v12064_v10 = vpop.f32.mrb[84].mxu0 }
 0x6f0   :  { %v5402_v19 = vpop.f32.mrb[85].mxu0 }
 0x6f1   :  { %v9721_v19 = vsel %vm14374_vm3, %v14252_v11, 0.0  ;;  %v9753_v11 = vsel %vm14374_vm3, %v14332_v23, 0.0 }
 0x6f2   :  { %v12571_v18 = vpop.f32.mrb[62].mxu1 }
 0x6f3   :  { %v12659_v31 = vpop.eup %12658  ;;  %v7092_v43 = vpop.f32.mrb[63].mxu1 }
 0x6f4   :  { %v14364_v2 = vmul.f32 %v12659_v31, %v14152_v48  ;;  %v12661_v51 = vpop.eup %12660 }
 0x6f6   :  { %v9689_v10 = vsel %vm14374_vm3, %v14364_v2, 0.0  ;;  %v9881_v2 = vsel %vm9817_vm4, %v9721_v19, 0.0 }
 0x6f7   :  { %v12067_v5 = vpop.f32.mrb[86].mxu0 }
 0x6f8   :  { %v5412_v61 = vpop.f32.mrb[87].mxu0  ;;  %v9818_v5 = vsel %vm9817_vm4, %v9689_v10, 0.0 }
 0x6fa   :  { %v12574_v41 = vpop.f32.mrb[64].mxu1 }
 0x6fb   :  { %v7102_v54 = vpop.f32.mrb[65].mxu1 }
 0x6ff   :  { %v12070_v7 = vpop.f32.mrb[88].mxu0 }
 0x700   :  { %v5422_v38 = vpop.f32.mrb[89].mxu0 }
 0x701   :  { %v9769_v38 = vsel %vm14374_vm3, %v14360_v39, 0.0 }
 0x702   :  { %v12577_v35 = vpop.f32.mrb[66].mxu1 }
 0x703   :  { %v7112_v14 = vpop.f32.mrb[67].mxu1 }
 0x704   :  { %v9945_v14 = vsel %vm9817_vm4, %v9753_v11, 0.0 }
 0x707   :  { %v12073_v63 = vpop.f32.mrb[90].mxu0 }
 0x708   :  { %v5432_v32 = vpop.f32.mrb[91].mxu0 }
 0x70a   :  { %v12580_v16 = vpop.f32.mrb[68].mxu1 }
 0x70b   :  { %v7122_v55 = vpop.f32.mrb[69].mxu1  ;;  %v9977_v16 = vsel %vm9817_vm4, %v9769_v38, 0.0 }
 0x70f   :  { %v12076_v17 = vpop.f32.mrb[92].mxu0 }
 0x710   :  { %v5442_v46 = vpop.f32.mrb[93].mxu0 }
 0x712   :  { %v12583_v56 = vpop.f32.mrb[70].mxu1 }
 0x713   :  { %v7132_v25 = vpop.f32.mrb[71].mxu1 }
 0x717   :  { %v12079_v24 = vpop.f32.mrb[94].mxu0 }
 0x718   :  { %v5452_v33 = vpop.f32.mrb[95].mxu0 }
 0x71a   :  { %v12586_v48 = vpop.f32.mrb[72].mxu1 }
 0x71b   :  { %v12082_v22 = vpop.f32.mrb[96].mxu0  ;;  %v7142_v58 = vpop.f32.mrb[73].mxu1 }
 0x71c   :  { %v5462_v30 = vpop.f32.mrb[97].mxu0  ;;  %v8037_v0 = vsub.f32 %v7142_v58, %v14303_v52 }
 0x71d   :  { %v7701_v12 = vsub.f32 %v5462_v30, %v14055_v9 }
 0x71e   :  { %v8421_v6 = vmul.f32 2.0, %v8037_v0 }
 0x71f   :  { %v8981_v3 = vadd.f32 %v7829_v21, %v7701_v12  ;;  %v12085_v27 = vpop.f32.mrb[98].mxu0  ;;  %v8309_v12 = vadd.f32 0.0001, %v8181_v37 }
 0x720   :  { %v8549_v59 = vadd.f32 0.0009, %v8421_v6  ;;  %v5472_v50 = vpop.f32.mrb[99].mxu0 }
 0x721   :  { %v9109_v13 = vadd.f32 0.0009, %v8981_v3 }
 0x722   :  { %v8677_v15 = vmul.f32 %v8549_v59, %v8293_v34  ;;  %v12589_v20 = vpop.f32.mrb[74].mxu1 }
 0x723   :  { %v9237_v42 = vmul.f32 %v9109_v13, %v8853_v60  ;;  %v12088_v49 = vpop.f32.mrb[100].mxu0  ;;  %v7152_v52 = vpop.f32.mrb[75].mxu1 }
 0x724   :  { %v9542_v9 = vmul.f32 %v12661_v51, %v8677_v15  ;;  %v5482_v8 = vpop.f32.mrb[101].mxu0 }
 0x725   :  { %12662 = vrcp.f32 %v9237_v42 }
 0x726   :  { %12664 = vrcp.f32 %v14337_v26 }
 0x727   :  { %v12091_v36 = vpop.f32.mrb[102].mxu0 }
 0x728   :  { %v5492_v21 = vpop.f32.mrb[103].mxu0 }
 0x72a   :  { %v12592_v57 = vpop.f32.mrb[76].mxu1 }
 0x72b   :  { %v7162_v47 = vpop.f32.mrb[77].mxu1 }
 0x72f   :  { %v12663_v53 = vpop.eup %12662 }
 0x730   :  { %v9382_v1 = vmul.f32 %v12663_v53, %v14202_v29  ;;  %v9737_v29 = vsel %vm14374_vm3, %v14308_v62, 0.0  ;;  %v9785_v62 = vsel %vm14374_vm3, %v9542_v9, 0.0  ;;  %v12665_v27 = vpop.eup %12664 }
 0x731   :  { %v9913_v7 = vsel %vm9817_vm4, %v9737_v29, 0.0  ;;  %v10009_v23 = vsel %vm9817_vm4, %v9785_v62, 0.0 }
 0x732   :  { %v12595_v18 = vpop.f32.mrb[78].mxu1  ;;  %v9705_v31 = vsel %vm14374_vm3, %v9382_v1, 0.0 }
 0x733   :  { %v7172_v43 = vpop.f32.mrb[79].mxu1  ;;  %v9849_v61 = vsel %vm9817_vm4, %v9705_v31, 0.0 }
 0x734   :  { %v9850_v41 = vadd.f32 %v9849_v61, %v9818_v5 }
 0x736   :  { %v9882_v54 = vadd.f32 %v9881_v2, %v9850_v41 }
 0x738   :  { %v9914_v35 = vadd.f32 %v9913_v7, %v9882_v54 }
 0x73a   :  { %v12598_v63 = vpop.f32.mrb[80].mxu1  ;;  %v9946_v32 = vadd.f32 %v9945_v14, %v9914_v35 }
 0x73b   :  { %v7182_v55 = vpop.f32.mrb[81].mxu1 }
 0x73c   :  { %v9978_v17 = vadd.f32 %v9977_v16, %v9946_v32 }
 0x73e   :  { %v10010_v46 = vadd.f32 %v10009_v23, %v9978_v17 }
 0x742   :  { %v12601_v56 = vpop.f32.mrb[82].mxu1 }
 0x743   :  { %v7192_v25 = vpop.f32.mrb[83].mxu1 }
 0x74a   :  { %v12604_v24 = vpop.f32.mrb[84].mxu1 }
 0x74b   :  { %v7202_v33 = vpop.f32.mrb[85].mxu1 }
 0x752   :  { %v12607_v39 = vpop.f32.mrb[86].mxu1 }
 0x753   :  { %v7212_v48 = vpop.f32.mrb[87].mxu1 }
 0x756   :  { %v12610_v22 = vpop.f32.mrb[88].mxu1 }
 0x757   :  { %v7222_v58 = vpop.f32.mrb[89].mxu1 }
 0x758   :  { %v8053_v30 = vsub.f32 %v7222_v58, %v14328_v28 }
 0x75a   :  { %v8437_v0 = vmul.f32 2.0, %v8053_v30  ;;  %v12613_v26 = vpop.f32.mrb[90].mxu1 }
 0x75b   :  { %v7232_v13 = vpop.f32.mrb[91].mxu1 }
 0x75c   :  { %v8565_v6 = vadd.f32 0.0009, %v8437_v0 }
 0x75e   :  { %v8693_v3 = vmul.f32 %v8565_v6, %v8309_v12 }
 0x760   :  { %v9574_v34 = vmul.f32 %v12665_v27, %v8693_v3 }
 0x762   :  { %v9801_v59 = vsel %vm14374_vm3, %v9574_v34, 0.0 }
 0x763   :  { %v10041_v50 = vsel %vm9817_vm4, %v9801_v59, 0.0 }
 0x764   :  { %v10042_v60 = vadd.f32 %v10041_v50, %v10010_v46 }
 0x766   :  { %10073 = vadd.xlane.f32.xlu0 %v10042_v60 }
 0x779   :  { %v12616_v15 = vpop.f32.mrb[92].mxu1 }
 0x77a   :  { %v7242_v20 = vpop.f32.mrb[93].mxu1 }
 0x781   :  { %v12619_v51 = vpop.f32.mrb[94].mxu1 }
 0x782   :  { %v7252_v42 = vpop.f32.mrb[95].mxu1 }
 0x789   :  { %v12622_v28 = vpop.f32.mrb[96].mxu1 }
 0x78a   :  { %v7262_v49 = vpop.f32.mrb[97].mxu1 }
 0x791   :  { %v12625_v52 = vpop.f32.mrb[98].mxu1 }
 0x792   :  { %v7272_v44 = vpop.f32.mrb[99].mxu1 }
 0x799   :  { %v12628_v9 = vpop.f32.mrb[100].mxu1 }
 0x79a   :  { %v7282_v8 = vpop.f32.mrb[101].mxu1 }
 0x7a1   :  { %v12631_v36 = vpop.f32.mrb[102].mxu1 }
 0x7a2   :  { %v7292_v4 = vpop.f32.mrb[103].mxu1 }
 0x7f3   :  { %v10074_v45 = vpop.xlane.xlu0 %10073 }
 0x7f4   :  { %v10075_v21 = vrot.slane %v10074_v45, 4 }
 0x7f6   :  { %v10076_v57 = vadd.f32 %v10075_v21, %v10074_v45 }
 0x7f8   :  { %v10077_v47 = vrot.slane %v10076_v57, 2 }
 0x7fa   :  { %v10078_v53 = vadd.f32 %v10077_v47, %v10076_v57 }
 0x7fc   :  { %v10079_v40 = vrot.slane %v10078_v53, 1 }
 0x7fe   :  { %v10080_v1 = vadd.f32 %v10079_v40, %v10078_v53 }
 0x800   :  { %12642 = vpush %v10080_v1 }
 0x831   :  { %s12643_s21 = spop %12642 }
 0x832   :  { %v10082_v10 = vstv %s12643_s21 }
 0x833   :  { %10083 = vst [vmem:[#allocation7] sm:$0xff] %v10082_v10 }
 0x834   :  { %12721 = shalt.err (!%p12718_p6)
}
 0x835   :  { %s12722_s25 = scalar_lea.hbm %s14427_s4, 128 }
 0x836   :  { %p12723_p7 = scmp.ne.s32.totalorder %s14427_s4, %s12722_s25  ;;  %p12726_p8 = scmp.lt.u32.totalorder %s12722_s25, %s14427_s4 }
 0x838   :  { %p12728_p9 = pnand %p12726_p8, %p12723_p7 }
 0x83a   :  { %12731 = shalt.err (!%p12728_p9)
}
 0x83b   :  { %10093 = dma.vmem_to_hbm [thread:$0]  %s10091_s20, 128, %s14427_s4, [#allocation4]  }
 0x83c   :  { %12736 = dma.done.wait [#allocation4], 128  }
 0x83d   :  { %12737 = vsyncadd [#allocation4], 4294967168 }
 0x83e   :  { %10097 = vsyncpa [#allocation3], 1 }
 0x83f   :  { %10098 = vsyncpa [#allocation6], 1 }
 0x840   :  { %10099 = vsyncpa [#allocation4], 1 }

</bundles_post_ra>
